<compile_context>
chip_gen: v7x
topology: tpu7x:2x2x1
jax: 0.10.0
libtpu: 0.0.40
codegen_flags: <defaults>
</compile_context>

<pallas_src>
import math
import numpy as np
import jax
import jax.numpy as jnp
from jax.experimental import pallas as pl
from jax.experimental.pallas import tpu as pltpu


def _bilinear_matrix(in_size: int, out_size: int) -> np.ndarray:
    """(out_size, in_size) 1-D bilinear interpolation matrix, align_corners=True."""
    m = np.zeros((out_size, in_size), dtype=np.float32)
    if out_size == 1 or in_size == 1:
        m[:, 0] = 1.0
        return m
    scale = (in_size - 1) / (out_size - 1)
    for i in range(out_size):
        s = i * scale
        lo = min(int(math.floor(s)), in_size - 1)
        hi = min(lo + 1, in_size - 1)
        f = s - lo
        m[i, lo] += 1.0 - f
        m[i, hi] += f
    return m


def upsample_conv_kernel(x_ref, whp_ref, wwcat_ref, wmat_ref, o_ref):
    # x_ref:     (1, H, C_in*W)       pre-transposed input, lanes = (ci, w)
    # whp_ref:   (Hout+2, H)          row-interp matrix, conv zero-pad rows folded in
    # wwcat_ref: (W, 3*Wout)          col-interp matrices for kx=0,1,2 (pad folded in)
    # wmat_ref:  (C_out, 9*C_in + 1)  packed conv weights, col (ky*3+kx)*C_in+ci, last = bias
    # o_ref:     (1, C_out, Hout*Wout)
    cdt = whp_ref.dtype
    h = x_ref.shape[1]
    h_pad = whp_ref.shape[0]                 # Hout + 2
    h_out = h_pad - 2
    w = wwcat_ref.shape[0]
    w_out = wwcat_ref.shape[1] // 3
    c_in = x_ref.shape[2] // w
    n_flat = h_out * w_out

    # 1) Row interpolation (+ conv zero-pad rows): ONE unbatched MXU matmul.
    r = jnp.dot(whp_ref[...], x_ref[0], preferred_element_type=jnp.float32)
    r = r.astype(cdt)                                          # (Hout+2, C_in*W)

    # 2) Move channels from lanes to rows (channel-major) with C_in static lane
    #    slices + one concat, so steps 3-4 stay single-matmul / single-reshape.
    r2 = jnp.concatenate([r[:, ci * w:(ci + 1) * w] for ci in range(c_in)],
                         axis=0)                               # (C_in*(Hout+2), W)

    # 3) Column interpolation for all three horizontal conv taps at once
    #    (kx shifts + zero pad folded into wwcat): ONE MXU matmul.
    u = jnp.dot(r2, wwcat_ref[...], preferred_element_type=jnp.float32)
    u = u.astype(cdt).reshape(c_in, h_pad, 3 * w_out)          # (C_in, Hout+2, 3*Wout)

    # 4) im2col assembled once: 9 static (ky, kx) window slices (sublane windows +
    #    disjoint lane blocks straight out of the column matmul), one concat, one
    #    bulk reshape; a ones row folds the bias into the conv matmul.
    slabs = [u[:, ky:ky + h_out, kx * w_out:(kx + 1) * w_out]
             for ky in range(3) for kx in range(3)]            # 9 x (C_in, Hout, Wout)
    rhs = jnp.concatenate(slabs, axis=0)                       # (9*C_in, Hout, Wout)
    rhs = rhs.reshape(9 * c_in, n_flat)                        # (9*C_in, Hout*Wout)
    rhs = jnp.concatenate([rhs, jnp.ones((1, n_flat), dtype=rhs.dtype)], axis=0)

    # 5) Fused 3x3 conv (+bias): ONE MXU matmul, f32 accumulation, lane-dense store.
    out = jnp.dot(wmat_ref[...], rhs, preferred_element_type=jnp.float32)
    o_ref[0] = out.astype(o_ref.dtype)


def upsample_forward(x, wh, ww, wconv, bias, *, compute_dtype=jnp.bfloat16):
    """x: (B, C_in, H, W); wh: (Hout, H); ww: (Wout, W); wconv: (C_out, C_in, 3, 3)."""
    b_sz, c_in, h, w = x.shape
    c_out = wconv.shape[0]
    h_out, w_out = wh.shape[0], ww.shape[0]
    n_flat = h_out * w_out
    f32 = jnp.float32

    # Row-interp matrix with the conv's zero-pad rows folded in.
    whp = jnp.zeros((h_out + 2, h), f32).at[1:-1, :].set(wh.astype(f32))
    # Column-interp matrices for the three horizontal conv taps (kx = 0,1,2),
    # concatenated along lanes; conv zero-pad columns folded in.
    wwp = jnp.zeros((w_out + 2, w), f32).at[1:-1, :].set(ww.astype(f32))
    wwcat = jnp.concatenate([wwp[kx:kx + w_out, :].T for kx in range(3)], axis=1)
    # Packed conv weights (C_out, 9*C_in), column order (ky, kx, ci); bias folded in
    # as an extra column matched by the ones row in the im2col RHS.
    wmat = jnp.transpose(wconv.astype(f32), (0, 2, 3, 1)).reshape(c_out, 9 * c_in)
    wmat_aug = jnp.concatenate([wmat, bias.astype(f32)[:, None]], axis=1)

    # Pre-transpose x so the row interpolation is one unbatched matmul
    # (rows = h, lanes = (ci, w)).
    x_t = jnp.transpose(x, (0, 2, 1, 3)).reshape(b_sz, h, c_in * w)

    # bf16 operands into the MXU (f32 accumulation in-kernel) on v6e/v7x; pass
    # compute_dtype=jnp.float32 for bit-accurate checking.
    x_t = x_t.astype(compute_dtype)
    whp = whp.astype(compute_dtype)
    wwcat = wwcat.astype(compute_dtype)
    wmat_aug = wmat_aug.astype(compute_dtype)

    out_dtype = x.dtype
    cdt_bytes = jnp.dtype(compute_dtype).itemsize
    out_bytes = jnp.dtype(out_dtype).itemsize

    # VMEM actually needed per grid step (double-buffered blocks + in-kernel
    # intermediates at an f32 upper bound), with 4x headroom; clamped well below
    # v7x's 64 MiB per TensorCore.
    interm = ((h_out + 2) * c_in * (w + 3 * w_out)       # r2 / u
              + (9 * c_in + 1) * n_flat                  # im2col
              + c_out * n_flat) * 4                      # conv accumulator
    blocks = (2 * h * c_in * w * cdt_bytes
              + ((h_out + 2) * h + w * 3 * w_out + c_out * (9 * c_in + 1)) * cdt_bytes
              + 2 * c_out * n_flat * out_bytes)
    vmem_limit = int(min(64 * 1024 * 1024, max(4 * 1024 * 1024, 4 * (interm + blocks))))

    flops = 2 * b_sz * ((h_out + 2) * h * c_in * w             # row interp
                        + (h_out + 2) * c_in * w * 3 * w_out   # col interp (3 taps)
                        + c_out * (9 * c_in + 1) * n_flat)     # fused conv
    bytes_accessed = ((x_t.size + whp.size + wwcat.size + wmat_aug.size) * cdt_bytes
                      + b_sz * c_out * n_flat * out_bytes)

    grid_spec = pltpu.PrefetchScalarGridSpec(
        num_scalar_prefetch=0,
        grid=(b_sz,),
        in_specs=[
            pl.BlockSpec((1, h, c_in * w), lambda b: (b, 0, 0)),
            pl.BlockSpec((h_out + 2, h), lambda b: (0, 0)),
            pl.BlockSpec((w, 3 * w_out), lambda b: (0, 0)),
            pl.BlockSpec((c_out, 9 * c_in + 1), lambda b: (0, 0)),
        ],
        out_specs=pl.BlockSpec((1, c_out, n_flat), lambda b: (b, 0, 0)),
    )
    out_flat = pl.pallas_call(
        upsample_conv_kernel,
        out_shape=jax.ShapeDtypeStruct((b_sz, c_out, n_flat), out_dtype),
        grid_spec=grid_spec,
        compiler_params=pltpu.CompilerParams(
            dimension_semantics=("parallel",),   # one image per step; megacore on v7x
            vmem_limit_bytes=vmem_limit,
        ),
        cost_estimate=pl.CostEstimate(
            flops=int(flops), transcendentals=0, bytes_accessed=int(bytes_accessed)),
    )(x_t, whp, wwcat, wmat_aug)
    # Lane-dense kernel output (pitch Hout*Wout, multiple of 128 here) -> NCHW.
    return out_flat.reshape(b_sz, c_out, h_out, w_out)


def reference(x, wh, ww, wconv, bias):
    up = jnp.einsum("oh,bchw->bcow", wh, x)
    up = jnp.einsum("pw,bcow->bcop", ww, up)
    out = jax.lax.conv_general_dilated(
        up, wconv, window_strides=(1, 1), padding=((1, 1), (1, 1)),
        dimension_numbers=("NCHW", "OIHW", "NCHW"))
    return out + bias[None, :, None, None]


if __name__ == "__main__":
    B, C_IN, C_OUT, H, W, SCALE = 2, 4, 8, 16, 16, 2
    H_OUT, W_OUT = H * SCALE, W * SCALE

    key = jax.random.PRNGKey(0)
    k1, k2, k3 = jax.random.split(key, 3)
    x = jax.random.normal(k1, (B, C_IN, H, W), dtype=jnp.float32)
    wconv = 0.1 * jax.random.normal(k2, (C_OUT, C_IN, 3, 3), dtype=jnp.float32)
    bias = 0.1 * jax.random.normal(k3, (C_OUT,), dtype=jnp.float32)

    wh = jnp.asarray(_bilinear_matrix(H, H_OUT))   # (H_OUT, H)
    ww = jnp.asarray(_bilinear_matrix(W, W_OUT))   # (W_OUT, W)

    ref = jax.block_until_ready(reference(x, wh, ww, wconv, bias))

    # f32 MXU operands: tight check of the kernel's semantics.
    out_f32 = jax.block_until_ready(
        upsample_forward(x, wh, ww, wconv, bias, compute_dtype=jnp.float32))
    assert out_f32.shape == (B, C_OUT, H_OUT, W_OUT), out_f32.shape
    np.testing.assert_allclose(np.asarray(out_f32), np.asarray(ref),
                               rtol=2e-4, atol=2e-4)

    # Default bf16 MXU operands (f32 accumulation): the fast path on v6e/v7x.
    # Loosened tolerance per review (bf16 inputs vs f32 reference).
    out_bf16 = jax.block_until_ready(upsample_forward(x, wh, ww, wconv, bias))
    np.testing.assert_allclose(np.asarray(out_bf16), np.asarray(ref),
                               rtol=5e-2, atol=5e-2)

    print("KERNEL_OK")
</pallas_src>

<mosaic_0001>
module attributes {stable_mosaic.version = 11 : i64} {
  func.func @upsample_conv_kernel(%arg0: i32, %arg1: memref<1x16x64xf32, #tpu.memory_space<vmem>>, %arg2: memref<34x16xf32, #tpu.memory_space<vmem>>, %arg3: memref<16x96xf32, #tpu.memory_space<vmem>>, %arg4: memref<8x37xf32, #tpu.memory_space<vmem>>, %arg5: memref<1x8x1024xf32, #tpu.memory_space<vmem>>) attributes {dimension_semantics = [#tpu.dimension_semantics<parallel>], iteration_bounds = array<i64: 2>, scalar_prefetch = 0 : i64, scratch_operands = 0 : i64, tpu.core_type = #tpu.core_type<tc>, window_params = [{transform_indices = @transform_0, window_bounds = array<i64: 1, 16, 64>}, {pipeline_mode = #tpu.pipeline_mode<synchronous>, transform_indices = @transform_1, window_bounds = array<i64: 34, 16>}, {pipeline_mode = #tpu.pipeline_mode<synchronous>, transform_indices = @transform_2, window_bounds = array<i64: 16, 96>}, {pipeline_mode = #tpu.pipeline_mode<synchronous>, transform_indices = @transform_3, window_bounds = array<i64: 8, 37>}, {transform_indices = @transform_4, window_bounds = array<i64: 1, 8, 1024>}]} {
    %c0 = arith.constant 0 : index
    %c0_0 = arith.constant 0 : index
    %0 = vector.load %arg2[%c0, %c0_0] : memref<34x16xf32, #tpu.memory_space<vmem>>, vector<34x16xf32>
    %c0_1 = arith.constant 0 : index
    %c0_2 = arith.constant 0 : index
    %c0_3 = arith.constant 0 : index
    %1 = vector.load %arg1[%c0_1, %c0_2, %c0_3] : memref<1x16x64xf32, #tpu.memory_space<vmem>>, vector<1x16x64xf32>
    %2 = vector.shape_cast %1 : vector<1x16x64xf32> to vector<16x64xf32>
    %cst = arith.constant dense<0.000000e+00> : vector<34x64xf32>
    %3 = tpu.matmul %0, %2, %cst {dimension_numbers = #tpu.dot_dimension_numbers<[1], [0], [0], [1], [0, 0, 1, 1], [], []>} : vector<34x16xf32>, vector<16x64xf32>, vector<34x64xf32> -> vector<34x64xf32>
    %4 = vector.extract_strided_slice %3 {offsets = [0, 0], sizes = [34, 16], strides = [1, 1]} : vector<34x64xf32> to vector<34x16xf32>
    %5 = vector.extract_strided_slice %3 {offsets = [0, 16], sizes = [34, 16], strides = [1, 1]} : vector<34x64xf32> to vector<34x16xf32>
    %6 = vector.extract_strided_slice %3 {offsets = [0, 32], sizes = [34, 16], strides = [1, 1]} : vector<34x64xf32> to vector<34x16xf32>
    %7 = vector.extract_strided_slice %3 {offsets = [0, 48], sizes = [34, 16], strides = [1, 1]} : vector<34x64xf32> to vector<34x16xf32>
    %8 = tpu.concatenate %4, %5, %6, %7 in 0 : vector<34x16xf32>, vector<34x16xf32>, vector<34x16xf32>, vector<34x16xf32> -> vector<136x16xf32>
    %c0_4 = arith.constant 0 : index
    %c0_5 = arith.constant 0 : index
    %9 = vector.load %arg3[%c0_4, %c0_5] : memref<16x96xf32, #tpu.memory_space<vmem>>, vector<16x96xf32>
    %cst_6 = arith.constant dense<0.000000e+00> : vector<136x96xf32>
    %10 = tpu.matmul %8, %9, %cst_6 {dimension_numbers = #tpu.dot_dimension_numbers<[1], [0], [0], [1], [0, 0, 1, 1], [], []>} : vector<136x16xf32>, vector<16x96xf32>, vector<136x96xf32> -> vector<136x96xf32>
    %11 = vector.shape_cast %10 : vector<136x96xf32> to vector<4x34x96xf32>
    %12 = vector.extract_strided_slice %11 {offsets = [0, 0, 0], sizes = [4, 32, 32], strides = [1, 1, 1]} : vector<4x34x96xf32> to vector<4x32x32xf32>
    %13 = vector.extract_strided_slice %11 {offsets = [0, 0, 32], sizes = [4, 32, 32], strides = [1, 1, 1]} : vector<4x34x96xf32> to vector<4x32x32xf32>
    %14 = vector.extract_strided_slice %11 {offsets = [0, 0, 64], sizes = [4, 32, 32], strides = [1, 1, 1]} : vector<4x34x96xf32> to vector<4x32x32xf32>
    %15 = vector.extract_strided_slice %11 {offsets = [0, 1, 0], sizes = [4, 32, 32], strides = [1, 1, 1]} : vector<4x34x96xf32> to vector<4x32x32xf32>
    %16 = vector.extract_strided_slice %11 {offsets = [0, 1, 32], sizes = [4, 32, 32], strides = [1, 1, 1]} : vector<4x34x96xf32> to vector<4x32x32xf32>
    %17 = vector.extract_strided_slice %11 {offsets = [0, 1, 64], sizes = [4, 32, 32], strides = [1, 1, 1]} : vector<4x34x96xf32> to vector<4x32x32xf32>
    %18 = vector.extract_strided_slice %11 {offsets = [0, 2, 0], sizes = [4, 32, 32], strides = [1, 1, 1]} : vector<4x34x96xf32> to vector<4x32x32xf32>
    %19 = vector.extract_strided_slice %11 {offsets = [0, 2, 32], sizes = [4, 32, 32], strides = [1, 1, 1]} : vector<4x34x96xf32> to vector<4x32x32xf32>
    %20 = vector.extract_strided_slice %11 {offsets = [0, 2, 64], sizes = [4, 32, 32], strides = [1, 1, 1]} : vector<4x34x96xf32> to vector<4x32x32xf32>
    %21 = tpu.concatenate %12, %13, %14, %15, %16, %17, %18, %19, %20 in 0 : vector<4x32x32xf32>, vector<4x32x32xf32>, vector<4x32x32xf32>, vector<4x32x32xf32>, vector<4x32x32xf32>, vector<4x32x32xf32>, vector<4x32x32xf32>, vector<4x32x32xf32>, vector<4x32x32xf32> -> vector<36x32x32xf32>
    %22 = vector.shape_cast %21 : vector<36x32x32xf32> to vector<36x1024xf32>
    %cst_7 = arith.constant 1.000000e+00 : f32
    %23 = vector.broadcast %cst_7 : f32 to vector<1x1024xf32>
    %24 = tpu.concatenate %22, %23 in 0 : vector<36x1024xf32>, vector<1x1024xf32> -> vector<37x1024xf32>
    %c0_8 = arith.constant 0 : index
    %c0_9 = arith.constant 0 : index
    %25 = vector.load %arg4[%c0_8, %c0_9] : memref<8x37xf32, #tpu.memory_space<vmem>>, vector<8x37xf32>
    %cst_10 = arith.constant dense<0.000000e+00> : vector<8x1024xf32>
    %26 = tpu.matmul %25, %24, %cst_10 {dimension_numbers = #tpu.dot_dimension_numbers<[1], [0], [0], [1], [0, 0, 1, 1], [], []>} : vector<8x37xf32>, vector<37x1024xf32>, vector<8x1024xf32> -> vector<8x1024xf32>
    %c0_11 = arith.constant 0 : index
    %c0_12 = arith.constant 0 : index
    %c0_13 = arith.constant 0 : index
    %27 = vector.load %arg5[%c0_11, %c0_12, %c0_13] : memref<1x8x1024xf32, #tpu.memory_space<vmem>>, vector<1x8x1024xf32>
    %28 = vector.shape_cast %27 : vector<1x8x1024xf32> to vector<8x1024xf32>
    %29 = vector.shape_cast %26 : vector<8x1024xf32> to vector<1x8x1024xf32>
    tpu.vector_store %arg5[%c0_11, %c0_12, %c0_13], %29 {strides = array<i32>} : memref<1x8x1024xf32, #tpu.memory_space<vmem>>, vector<1x8x1024xf32>,
    return
  }
  func.func @transform_0(%arg0: i32) -> (i32, i32, i32) {
    %c0_i32 = arith.constant 0 : i32
    %c0_i32_0 = arith.constant 0 : i32
    %c0_i32_1 = arith.constant 0 : i32
    return %arg0, %c0_i32, %c0_i32_0 : i32, i32, i32
  }
  func.func @transform_1(%arg0: i32) -> (i32, i32) {
    %c0_i32 = arith.constant 0 : i32
    %c0_i32_0 = arith.constant 0 : i32
    %c0_i32_1 = arith.constant 0 : i32
    return %c0_i32, %c0_i32_0 : i32, i32
  }
  func.func @transform_2(%arg0: i32) -> (i32, i32) {
    %c0_i32 = arith.constant 0 : i32
    %c0_i32_0 = arith.constant 0 : i32
    %c0_i32_1 = arith.constant 0 : i32
    return %c0_i32, %c0_i32_0 : i32, i32
  }
  func.func @transform_3(%arg0: i32) -> (i32, i32) {
    %c0_i32 = arith.constant 0 : i32
    %c0_i32_0 = arith.constant 0 : i32
    %c0_i32_1 = arith.constant 0 : i32
    return %c0_i32, %c0_i32_0 : i32, i32
  }
  func.func @transform_4(%arg0: i32) -> (i32, i32, i32) {
    %c0_i32 = arith.constant 0 : i32
    %c0_i32_0 = arith.constant 0 : i32
    %c0_i32_1 = arith.constant 0 : i32
    return %arg0, %c0_i32, %c0_i32_0 : i32, i32, i32
  }
}

</mosaic_0001>

<bundles_post_ra>
// kernel: tpu_custom_call.1
= control target key start
LH: loop header
LB: loop body
LE: loop exit
PB: predicated region body
PF: predicated region fallthrough
CT: control target
= control target key end

     0   :  { %9 = vsyncpa [#allocation3], 0  ;;  %s11916_s0 = inlined_call_operand.vmem [shape: f32[2,16,64], index: 0, kind: input, shape index: {}]   ;;  %s11917_s1 = inlined_call_operand.vmem [shape: f32[34,16], index: 1, kind: input, shape index: {}]   ;;  %s11918_s2 = inlined_call_operand.vmem [shape: f32[16,96], index: 2, kind: input, shape index: {}]   ;;  %s11919_s3 = inlined_call_operand.vmem [shape: f32[8,37], index: 3, kind: input, shape index: {}]   ;;  %s11920_s4 = inlined_call_operand.hbm [shape: f32[2,8,1024], index: 4, kind: output, shape index: {}]  }
   0x1   :  { %11 = vsyncpa [#allocation3 + $0x1], 0  ;;  %s7469_s15 = smov 0   ;;  %s7471_s16 = smov 0  }
   0x2   :  { %s7473_s17 = smov 0   ;;  %s7475_s18 = smov 0  }
   0x3 LB: > { %s7490_s19 = sadd.s32 4294967295, %s7431_s18   ;;  %s6791_s20 = sadd.s32 4294967294, %s7431_s18   ;;  %s7431_s18 = sphi %s7475_s18, %s13261_s18   ;;  %s7427_s17 = sphi %s7473_s17, %s13260_s17   ;;  %s7423_s16 = sphi %s7471_s16, %s13259_s16   ;;  %s7419_s15 = sphi %s7469_s15, %s13258_s15  }
   0x4   : > { %s7494_s21 = sadd.s32 1, %s7431_s18   ;;  %s113_s22 = sadd.s32 1, %s7427_s17 }
   0x5   : > { %s110_s23 = ssub.s32 %s7431_s18, %s7494_s21  ;;  %p123_p0 = scmp.ne.s32.totalorder %s7427_s17, %s7423_s16 }
   0x6   : > { %p111_p1 = scmp.eq.s32.totalorder %s110_s23, 0  ;;  %p124_p2 = scmp.eq.s32.totalorder %s7490_s19, 1 }
   0x7   : > { %p129_p3 = scmp.ne.s32.totalorder %s7423_s16, %s7419_s15  ;;  %p130_p4 = scmp.eq.s32.totalorder %s6791_s20, 1 }
   0x8   : > { %s7505_s24 = scalar_select %p111_p1, %s7427_s17, %s113_s22  }
   0x9   : > { %p7507_p5 = por %p124_p2, %p123_p0  ;;  %p7511_p6 = por %p130_p4, %p129_p3 }
   0xa   : > { %p6794_p7 = scmp.ge.s32.totalorder %s7431_s18, 1  ;;  %p165_p8 = scmp.lt.s32.totalorder %s7431_s18, 3 }
   0xc   : > { %p166_p9 = pnand %p6794_p7, %p165_p8 }
   0xe   : > { %169 = sbr.rel (%p166_p9) target bundleno = 1515 (0x5eb), region = 36 }
  0x15   : > { %p191_p10 = scmp.lt.s32.totalorder %s7490_s19, 1  ;;  %v7433_v0 = vmov 0.0|0.0   ;;  %vm7434_vm0 = vmmov 0   ;;  %v11921_v1 = vmov 0.0   ;;  %v382_v2 = vld [vmem:[%s11918_s2] sm:$0xff]  ;;  %v383_v3 = vld [vmem:[%s11918_s2 + $0x8] sm:$0xff] }
  0x16   : > { %7042 = vmatprep.subr.bf16.mxu0 %v7433_v0  ;;  %6972 = vmatprep.mubr.msk.f32.mxu0 %vm7434_vm0, %v11921_v1  ;;  %v7046_v4 = vpack.c.bf16 %v383_v3, %v382_v2  ;;  %v196_v8 = vld [vmem:[%s11917_s1] sm:$0xff]  ;;  %vm203_vm1 = vcmask 130048   ;;  %v197_v9 = vld [vmem:[%s11917_s1 + $0x8] sm:$0xff]  ;;  %v198_v10 = vld [vmem:[%s11917_s1 + $0x10] sm:$0xff]  ;;  %s7436_s29 = smov 96   ;;  %s7437_s30 = smov 112  }
  0x17   : > { %s192_s27 = scalar_select %p191_p10, %s7490_s19, 1  ;;  %7045 = vmatprep.subr.bf16.mxu1 %v7433_v0  ;;  %6991 = vmatprep.mubr.msk.f32.mxu1 %vm7434_vm0, %v11921_v1  ;;  %v199_v11 = vld [vmem:[%s11917_s1 + $0x18] sm:$0xff]  ;;  %v200_v12 = vld [vmem:[%s11917_s1 + $0x20] sm:$0x3]  ;;  %vm358_vm2 = vcmask 1045504   ;;  %vm314_vm3 = vcmask 1041408  }
  0x18   : > { %7047 = vmatpush3.bf16.msra.mxu1 %v7046_v4  ;;  %vm336_vm4 = vcmask 1043456   ;;  %s7438_s5 = smov 80   ;;  %vm1329_vm5 = vcmask 1040384   ;;  %vm1330_vm6 = vcmask 1042434   ;;  %vm1332_vm8 = vcmask 1044484   ;;  %s7442_s7 = smov 32  }
  0x19   : > { %s6940_s6 = sshll.u32 %s192_s27, 4  ;;  %vm1331_vm7 = vmor %vm1329_vm5, %vm1330_vm6  ;;  %vm1334_vm10 = vcmask 1046534   ;;  %vm6264_vm12 = vcmask 261120   ;;  %vm6270_vm13 = vcmask 523264   ;;  %vm6276_vm14 = vcmask 785408   ;;  %s188_s10 = sand.u32 1, %s7423_s16  }
  0x1a   : > { %s195_s9 = scalar_lea.vmem %s11916_s0, %s6940_s6  ;;  %s7440_s6 = smov 64   ;;  %vm1333_vm9 = vmor %vm1331_vm7, %vm1332_vm8  ;;  %vm6400_vm15 = vcmask 1044480  }
  0x1b   : > { %v201_v5 = vld [vmem:[%s195_s9] sm:$0xff]  ;;  %v202_v6 = vld [vmem:[%s195_s9 + $0x8] sm:$0xff]  ;;  %vm7691_vm11 = vmor %vm1333_vm9, %vm1334_vm10  ;;  %s6795_s11 = sshll.u32 %s188_s10, 6  ;;  %s6941_s13 = sshll.u32 %s7490_s19, 10 }
  0x1c   : > { %v7043_v7 = vpack.c.bf16 %v202_v6, %v201_v5  ;;  %v7439_v5 = vmov 1983009808   ;;  %s190_s12 = scalar_lea.vmem [#allocation2], %s6795_s11  ;;  %s11874_s23 = scalar_lea.hbm %s11920_s4, %s6941_s13 }
  0x1d   : > { %v590_v6 = vunpack.c.l.s4 %v7439_v5  ;;  %s6732_s14 = sshll.u32 %s190_s12, 4  ;;  %s6718_s27 = scalar_lea.sflag [#allocation3], %s188_s10  ;;  %s11876_s14 = int_to_ptr.vmem [resolvable:$true] %s6732_s14 }
  0x1e   : > { %7044 = vmatpush3.bf16.msra.mxu0 %v7043_v7  ;;  %v592_v7 = vlaneseq  ;;  %s7369_s28 = scalar_lea.vmem %s11876_s14, 1024  ;;  %s7443_s19 = smov [#allocation2]  }
  0x1f   : > { %p7370_p11 = scmp.ne.s32.totalorder %s11876_s14, %s7369_s28 }
  0x21   : > { %6973 = vmatmul.mubr.msk.f32.vlgmr.msra.gmra.mrb[0].mxu0 %vm203_vm1, %v196_v8  ;;  %v591_v8 = vunpack.c.0.s8 %v590_v6  ;;  %p7371_p12 = pnand %p7370_p11, %p7507_p5 }
  0x22   : > { %6975 = vmatprep.mubr.msk.f32.mxu0 %vm7434_vm0, %v11921_v1 }
  0x23   : > { %p7372_p13 = pneg %p7371_p12 }
  0x25   : > { %6976 = vmatmul.mubr.msk.f32.gmra.mrb[2].mxu0 %vm203_vm1, %v197_v9  ;;  %v7640_v9 = vshrl.u32 %v592_v7, 7 }
  0x26   : > { %6978 = vmatprep.mubr.msk.f32.mxu0 %vm7434_vm0, %v11921_v1 }
  0x29   : > { %6979 = vmatmul.mubr.msk.f32.gmra.mrb[4].mxu0 %vm203_vm1, %v198_v10  ;;  %v7643_v10 = vsub.s32 %v591_v8, %v7640_v9 }
  0x2a   : > { %6981 = vmatprep.mubr.msk.f32.mxu0 %vm7434_vm0, %v11921_v1 }
  0x2b   : > { %12202 = vst [vmem:[#allocation5_spill] sm:$0xff] %v7643_v10 }
  0x2d   : > { %6982 = vmatmul.mubr.msk.f32.gmra.mrb[6].mxu0 %vm203_vm1, %v199_v11 }
  0x2e   : > { %6984 = vmatprep.mubr.msk.f32.mxu0 %vm7434_vm0, %v11921_v1 }
  0x31   : > { %6985 = vmatmul.mubr.msk.f32.gmra.mrb[8].mxu0 %vm203_vm1, %v200_v12 }
  0x32   : > { %6489 = vmatprep.mubr.f32.mxu0 %v11921_v1 }
  0xf4   : > { %v285_v13 = vpop.f32.mrb[0].mxu0 }
  0xf5   : > { %v6974_v14 = vpop.f32.mrb[1].mxu0  ;;  %6992 = vmatmul.mubr.msk.f32.vlgmr.msra.gmra.mrb[0].mxu1 %vm203_vm1, %v285_v13  ;;  %v337_v15 = vrot.slane %v285_v13, 4  ;;  %v315_v16 = vrot.slane %v285_v13, 6  ;;  %v359_v21 = vrot.slane %v285_v13, 2 }
  0xf6   : > { %6994 = vmatprep.mubr.msk.f32.mxu1 %vm7434_vm0, %v11921_v1 }
  0xf7   : > { %346 = vrot.lane.b32.xlu1 %v337_v15, %s7436_s29  ;;  %324 = vrot.lane.b32.xlu0 %v315_v16, %s7437_s30 }
  0xf8   : > { %v290_v17 = vpop.f32.mrb[2].mxu0 }
  0xf9   : > { %v316_v18 = vrot.slane %v290_v17, 6  ;;  %v338_v19 = vrot.slane %v290_v17, 4  ;;  %v360_v20 = vrot.slane %v290_v17, 2  ;;  %v6977_v22 = vpop.f32.mrb[3].mxu0  ;;  %6995 = vmatmul.mubr.msk.f32.gmra.mrb[2].mxu1 %vm203_vm1, %v290_v17 }
  0xfa   : > { %6997 = vmatprep.mubr.msk.f32.mxu1 %vm7434_vm0, %v11921_v1 }
  0xfb   : > { %368 = vrot.lane.b32.xlu0 %v359_v21, %s7438_s5  ;;  %v361_v23 = vsel %vm358_vm2, %v359_v21, %v360_v20  ;;  %v317_v24 = vsel %vm314_vm3, %v315_v16, %v316_v18  ;;  %v339_v25 = vsel %vm336_vm4, %v337_v15, %v338_v19 }
  0xfc   : > { %370 = vrot.lane.b32.xlu1 %v361_v23, %s7438_s5  ;;  %v295_v26 = vpop.f32.mrb[4].mxu0 }
  0xfd   : > { %v318_v27 = vrot.slane %v295_v26, 6  ;;  %v340_v28 = vrot.slane %v295_v26, 4  ;;  %v362_v29 = vrot.slane %v295_v26, 2  ;;  %v6980_v30 = vpop.f32.mrb[5].mxu0  ;;  %6998 = vmatmul.mubr.msk.f32.gmra.mrb[4].mxu1 %vm203_vm1, %v295_v26 }
  0xfe   : > { %7000 = vmatprep.mubr.msk.f32.mxu1 %vm7434_vm0, %v11921_v1 }
  0xff   : > { %326 = vrot.lane.b32.xlu0 %v317_v24, %s7437_s30  ;;  %v319_v31 = vsel %vm314_vm3, %v316_v18, %v318_v27  ;;  %v341_v32 = vsel %vm336_vm4, %v338_v19, %v340_v28  ;;  %v363_v33 = vsel %vm358_vm2, %v360_v20, %v362_v29 }
 0x100   : > { %328 = vrot.lane.b32.xlu1 %v319_v31, %s7437_s30  ;;  %v300_v34 = vpop.f32.mrb[6].mxu0 }
 0x101   : > { %v320_v35 = vrot.slane %v300_v34, 6  ;;  %v342_v36 = vrot.slane %v300_v34, 4  ;;  %v364_v37 = vrot.slane %v300_v34, 2  ;;  %v6983_v38 = vpop.f32.mrb[7].mxu0  ;;  %7001 = vmatmul.mubr.msk.f32.gmra.mrb[6].mxu1 %vm203_vm1, %v300_v34 }
 0x102   : > { %7003 = vmatprep.mubr.msk.f32.mxu1 %vm7434_vm0, %v11921_v1 }
 0x103   : > { %348 = vrot.lane.b32.xlu0 %v339_v25, %s7436_s29  ;;  %v321_v39 = vsel %vm314_vm3, %v318_v27, %v320_v35  ;;  %v343_v40 = vsel %vm336_vm4, %v340_v28, %v342_v36  ;;  %v365_v41 = vsel %vm358_vm2, %v362_v29, %v364_v37 }
 0x104   : > { %350 = vrot.lane.b32.xlu1 %v341_v32, %s7436_s29  ;;  %v305_v42 = vpop.f32.mrb[8].mxu0 }
 0x105   : > { %v322_v43 = vrot.slane %v305_v42, 6  ;;  %v344_v44 = vrot.slane %v305_v42, 4  ;;  %v366_v45 = vrot.slane %v305_v42, 2  ;;  %v6986_v46 = vpop.f32.mrb[9].mxu0 }
 0x107   : > { %372 = vrot.lane.b32.xlu0 %v363_v33, %s7438_s5  ;;  %v323_v47 = vsel %vm314_vm3, %v320_v35, %v322_v43  ;;  %v345_v48 = vsel %vm336_vm4, %v342_v36, %v344_v44  ;;  %v367_v49 = vsel %vm358_vm2, %v364_v37, %v366_v45 }
 0x108   : > { %330 = vrot.lane.b32.xlu1 %v321_v39, %s7437_s30 }
 0x10b   : > { %352 = vrot.lane.b32.xlu0 %v343_v40, %s7436_s29 }
 0x10c   : > { %374 = vrot.lane.b32.xlu1 %v365_v41, %s7438_s5 }
 0x10f   : > { %332 = vrot.lane.b32.xlu0 %v323_v47, %s7437_s30 }
 0x110   : > { %354 = vrot.lane.b32.xlu1 %v345_v48, %s7436_s29 }
 0x113   : > { %376 = vrot.lane.b32.xlu0 %v367_v49, %s7438_s5 }
 0x169   : > { %v347_v50 = vpop.permute.xlu1 %346  ;;  %v325_v51 = vpop.permute.xlu0 %324 }
 0x16a   : > { %v379_v52 = vsel %vm314_vm3, %v305_v42, %v325_v51 }
 0x16b   : > { %7004 = vmatmul.mubr.msk.f32.gmra.mrb[8].mxu1 %vm203_vm1, %v379_v52 }
 0x16c   : > { %7006 = vmatprep.mubr.msk.f32.mxu1 %vm7434_vm0, %v11921_v1 }
 0x16d   : > { %v369_v53 = vpop.permute.xlu0 %368 }
 0x16e   : > { %v371_v54 = vpop.permute.xlu1 %370 }
 0x171   : > { %v327_v55 = vpop.permute.xlu0 %326 }
 0x172   : > { %v329_v56 = vpop.permute.xlu1 %328  ;;  %7007 = vmatmul.mubr.msk.f32.gmra.mrb[10].mxu1 %vm203_vm1, %v327_v55 }
 0x173   : > { %7009 = vmatprep.mubr.msk.f32.mxu1 %vm7434_vm0, %v11921_v1 }
 0x175   : > { %v349_v57 = vpop.permute.xlu0 %348 }
 0x176   : > { %v351_v58 = vpop.permute.xlu1 %350  ;;  %7010 = vmatmul.mubr.msk.f32.gmra.mrb[12].mxu1 %vm203_vm1, %v329_v56 }
 0x177   : > { %7012 = vmatprep.mubr.msk.f32.mxu1 %vm7434_vm0, %v11921_v1 }
 0x179   : > { %v373_v59 = vpop.permute.xlu0 %372 }
 0x17a   : > { %v331_v60 = vpop.permute.xlu1 %330 }
 0x17b   : > { %7013 = vmatmul.mubr.msk.f32.gmra.mrb[14].mxu1 %vm203_vm1, %v331_v60 }
 0x17c   : > { %7015 = vmatprep.mubr.msk.f32.mxu1 %vm7434_vm0, %v11921_v1 }
 0x17d   : > { %v353_v61 = vpop.permute.xlu0 %352 }
 0x17e   : > { %v375_v0 = vpop.permute.xlu1 %374 }
 0x181   : > { %v333_v62 = vpop.permute.xlu0 %332 }
 0x182   : > { %v380_v63 = vsel %vm336_vm4, %v333_v62, %v347_v50  ;;  %v355_v2 = vpop.permute.xlu1 %354 }
 0x183   : > { %7016 = vmatmul.mubr.msk.f32.gmra.mrb[16].mxu1 %vm203_vm1, %v380_v63  ;;  %v381_v3 = vsel %vm358_vm2, %v355_v2, %v369_v53 }
 0x184   : > { %7018 = vmatprep.mubr.msk.f32.mxu1 %vm7434_vm0, %v11921_v1 }
 0x185   : > { %v377_v4 = vpop.permute.xlu0 %376 }
 0x187   : > { %7019 = vmatmul.mubr.msk.f32.gmra.mrb[18].mxu1 %vm203_vm1, %v349_v57 }
 0x188   : > { %7021 = vmatprep.mubr.msk.f32.mxu1 %vm7434_vm0, %v11921_v1 }
 0x18b   : > { %7022 = vmatmul.mubr.msk.f32.gmra.mrb[20].mxu1 %vm203_vm1, %v351_v58 }
 0x18c   : > { %7024 = vmatprep.mubr.msk.f32.mxu1 %vm7434_vm0, %v11921_v1 }
 0x18f   : > { %7025 = vmatmul.mubr.msk.f32.gmra.mrb[22].mxu1 %vm203_vm1, %v353_v61 }
 0x190   : > { %7027 = vmatprep.mubr.msk.f32.mxu1 %vm7434_vm0, %v11921_v1 }
 0x193   : > { %7028 = vmatmul.mubr.msk.f32.gmra.mrb[24].mxu1 %vm203_vm1, %v381_v3 }
 0x194   : > { %7030 = vmatprep.mubr.msk.f32.mxu1 %vm7434_vm0, %v11921_v1 }
 0x197   : > { %7031 = vmatmul.mubr.msk.f32.gmra.mrb[26].mxu1 %vm203_vm1, %v371_v54 }
 0x198   : > { %7033 = vmatprep.mubr.msk.f32.mxu1 %vm7434_vm0, %v11921_v1 }
 0x19b   : > { %7034 = vmatmul.mubr.msk.f32.gmra.mrb[28].mxu1 %vm203_vm1, %v373_v59 }
 0x19c   : > { %7036 = vmatprep.mubr.msk.f32.mxu1 %vm7434_vm0, %v11921_v1 }
 0x19f   : > { %7037 = vmatmul.mubr.msk.f32.gmra.mrb[30].mxu1 %vm203_vm1, %v375_v0 }
 0x1a0   : > { %7039 = vmatprep.mubr.msk.f32.mxu1 %vm7434_vm0, %v11921_v1  ;;  %vm6396_vm0 = vcmask 302080  }
 0x1a3   : > { %7040 = vmatmul.mubr.msk.f32.gmra.mrb[32].mxu1 %vm203_vm1, %v377_v4 }
 0x1c8   : > { %v487_v11 = vpop.f32.mrb[0].mxu1 }
 0x1c9   : > { %v7646_v12 = vrot.slane %v487_v11, %v7643_v10  ;;  %v6993_v13 = vpop.f32.mrb[1].mxu1  ;;  %v588_v14 = vcombine.high %v487_v11, %v487_v11 }
 0x1cb   : > { %945 = vrot.lane.b32.xlu1 %v7646_v12, %s7436_s29  ;;  %v7652_v15 = vcombine.high %v7646_v12, %v7646_v12  ;;  %v7657_v18 = vrot.slane %v588_v14, %v7643_v10  ;;  %v6820_v28 = vrot.slane %v7646_v12, 9 }
 0x1cc   : > { %v492_v16 = vpop.f32.mrb[2].mxu1 }
 0x1cd   : > { %12203 = vst [vmem:[#allocation6_spill] sm:$0xff] %v7652_v15  ;;  %947 = vrot.lane.b32.xlu0 %v7652_v15, %s7436_s29  ;;  %v6996_v17 = vpop.f32.mrb[3].mxu1  ;;  %12204 = vst [vmem:[#allocation7_spill] sm:$0xff] %v7657_v18  ;;  %v7667_v21 = vcombine.high %v7657_v18, %v7657_v18  ;;  %v7676_v24 = vrot.slane %v492_v16, %v7643_v10  ;;  %v1338_v26 = vrot.slane %v7652_v15, 7  ;;  %v1341_v31 = vrot.slane %v7657_v18, 7 }
 0x1ce   : > { %v605_v32 = vcombine.high %v492_v16, %v492_v16 }
 0x1cf   : > { %1137 = vrot.lane.b32.xlu1 %v7646_v12, %s7440_s6  ;;  %12205 = vst [vmem:[#allocation8_spill] sm:$0xff] %v7667_v21  ;;  %12206 = vst [vmem:[#allocation9_spill] sm:$0xff] %v7676_v24  ;;  %v7684_v25 = vcombine.high %v7676_v24, %v7676_v24  ;;  %v1340_v29 = vrot.slane %v1338_v26, 2  ;;  %v7700_v30 = vsel %vm7691_vm11, %v6820_v28, %v1338_v26  ;;  %v1344_v36 = vrot.slane %v7667_v21, 7 }
 0x1d0   : > { %v497_v19 = vpop.f32.mrb[4].mxu1  ;;  %v7712_v34 = vrot.slane %v605_v32, %v7643_v10  ;;  %v1343_v37 = vrot.slane %v1341_v31, 2  ;;  %v1347_v39 = vrot.slane %v7676_v24, 7 }
 0x1d1   : > { %1139 = vrot.lane.b32.xlu0 %v7652_v15, %s7440_s6  ;;  %v6999_v20 = vpop.f32.mrb[5].mxu1  ;;  %12207 = vst [vmem:[#allocation10_spill] sm:$0xff] %v7684_v25  ;;  %v7707_v33 = vsel %vm7691_vm11, %v1340_v29, %v1341_v31  ;;  %v1346_v38 = vrot.slane %v1344_v36, 2  ;;  %v7737_v41 = vrot.slane %v497_v19, %v7643_v10  ;;  %v1350_v44 = vrot.slane %v7684_v25, 7 }
 0x1d2   : > { %12210 = vst [vmem:[#allocation11_spill] sm:$0xff] %v7707_v33  ;;  %12211 = vst [vmem:[#allocation12_spill] sm:$0xff] %v7712_v34  ;;  %v7722_v35 = vcombine.high %v7712_v34, %v7712_v34  ;;  %v7734_v40 = vsel %vm7691_vm11, %v1343_v37, %v1344_v36  ;;  %v622_v45 = vcombine.high %v497_v19, %v497_v19  ;;  %v1353_v47 = vrot.slane %v7712_v34, 7 }
 0x1d3   : > { %949 = vrot.lane.b32.xlu1 %v7657_v18, %s7436_s29  ;;  %12213 = vst [vmem:[#allocation14_spill] sm:$0xff] %v7737_v41  ;;  %v7743_v42 = vsel %vm7691_vm11, %v1346_v38, %v1347_v39  ;;  %v7749_v43 = vcombine.high %v7737_v41, %v7737_v41  ;;  %v1352_v46 = vrot.slane %v1350_v44, 2  ;;  %v1349_v48 = vrot.slane %v1347_v39, 2 }
 0x1d4   : > { %v7669_v22 = vpop.f32.mrb[6].mxu1  ;;  %12212 = vst [vmem:[#allocation13_spill] sm:$0xff] %v7722_v35  ;;  %12214 = vst [vmem:[#allocation15_spill] sm:$0xff] %v7743_v42  ;;  %v7762_v49 = vrot.slane %v622_v45, %v7643_v10  ;;  %v1356_v53 = vrot.slane %v7722_v35, 7  ;;  %v1359_v55 = vrot.slane %v7737_v41, 7  ;;  %v1355_v59 = vrot.slane %v1353_v47, 2 }
 0x1d5   : > { %951 = vrot.lane.b32.xlu0 %v7667_v21, %s7436_s29  ;;  %v7002_v23 = vpop.f32.mrb[7].mxu1  ;;  %12215 = vst [vmem:[#allocation16_spill] sm:$0xff] %v7749_v43  ;;  %v7768_v50 = vsel %vm7691_vm11, %v1352_v46, %v1353_v47  ;;  %v7774_v51 = vsel %vm7691_vm11, %v1349_v48, %v1350_v44  ;;  %v7800_v57 = vrot.slane %v7669_v22, %v7643_v10  ;;  %v1362_v60 = vrot.slane %v7749_v43, 7 }
 0x1d6   : > { %12216 = vst [vmem:[#allocation17_spill] sm:$0xff] %v7762_v49  ;;  %12217 = vst [vmem:[#allocation18_spill] sm:$0xff] %v7768_v50  ;;  %v7780_v52 = vcombine.high %v7762_v49, %v7762_v49  ;;  %v1358_v54 = vrot.slane %v1356_v53, 2  ;;  %v639_v61 = vcombine.high %v7669_v22, %v7669_v22  ;;  %v7819_v62 = vsel %vm7691_vm11, %v1355_v59, %v1356_v53 }
 0x1d7   : > { %1141 = vrot.lane.b32.xlu1 %v7657_v18, %s7440_s6  ;;  %12220 = vst [vmem:[#allocation21_spill] sm:$0xff] %v7800_v57  ;;  %v7808_v58 = vcombine.high %v7800_v57, %v7800_v57  ;;  %v1364_v63 = vrot.slane %v1362_v60, 2  ;;  %v1365_v0 = vrot.slane %v7762_v49, 7  ;;  %v1371_v7 = vrot.slane %v7800_v57, 7 }
 0x1d8   : > { %12218 = vst [vmem:[#allocation19_spill] sm:$0xff] %v7780_v52  ;;  %v7794_v56 = vsel %vm7691_vm11, %v1358_v54, %v1359_v55  ;;  %v7825_v2 = vrot.slane %v639_v61, %v7643_v10  ;;  %v1368_v5 = vrot.slane %v7780_v52, 7  ;;  %v1361_v8 = vrot.slane %v1359_v55, 2 }
 0x1d9   : > { %1143 = vrot.lane.b32.xlu0 %v7667_v21, %s7440_s6  ;;  %12219 = vst [vmem:[#allocation20_spill] sm:$0xff] %v7794_v56  ;;  %12221 = vst [vmem:[#allocation22_spill] sm:$0xff] %v7808_v58  ;;  %v7833_v3 = vsel %vm7691_vm11, %v1364_v63, %v1365_v0  ;;  %v1374_v13 = vrot.slane %v7808_v58, 7  ;;  %v1367_v20 = vrot.slane %v1365_v0, 2  ;;  %v1373_v37 = vrot.slane %v1371_v7, 2 }
 0x1da   : > { %12222 = vst [vmem:[#allocation23_spill] sm:$0xff] %v7825_v2  ;;  %12223 = vst [vmem:[#allocation24_spill] sm:$0xff] %v7833_v3  ;;  %v7839_v4 = vcombine.high %v7825_v2, %v7825_v2  ;;  %v1370_v6 = vrot.slane %v1368_v5, 2  ;;  %v7862_v14 = vsel %vm7691_vm11, %v1361_v8, %v1362_v60  ;;  %v1377_v17 = vrot.slane %v7825_v2, 7 }
 0x1db   : > { %953 = vrot.lane.b32.xlu1 %v7676_v24, %s7436_s29  ;;  %v1376_v16 = vrot.slane %v1374_v13, 2  ;;  %v7883_v22 = vsel %vm7691_vm11, %v1367_v20, %v1368_v5  ;;  %v7916_v48 = vsel %vm7691_vm11, %v1373_v37, %v1374_v13 }
 0x1dc   : > { %12224 = vst [vmem:[#allocation25_spill] sm:$0xff] %v7839_v4  ;;  %v7855_v11 = vsel %vm7691_vm11, %v1370_v6, %v1371_v7  ;;  %v1380_v44 = vrot.slane %v7839_v4, 7  ;;  %v1379_v20 = vrot.slane %v1377_v17, 2 }
 0x1dd   : > { %955 = vrot.lane.b32.xlu0 %v7684_v25, %s7436_s29  ;;  %12225 = vst [vmem:[#allocation26_spill] sm:$0xff] %v7855_v11  ;;  %v7873_v19 = vsel %vm7691_vm11, %v1376_v16, %v1377_v17 }
 0x1de   : > { %12226 = vst [vmem:[#allocation27_spill] sm:$0xff] %v7873_v19  ;;  %v1382_v0 = vrot.slane %v1380_v44, 2 }
 0x1df   : > { %1145 = vrot.lane.b32.xlu1 %v7676_v24, %s7440_s6 }
 0x1e1   : > { %1147 = vrot.lane.b32.xlu0 %v7684_v25, %s7440_s6 }
 0x1e3   : > { %1596 = vrot.lane.b32.xlu1 %v7700_v30, %s7436_s29 }
 0x1e5   : > { %1598 = vrot.lane.b32.xlu0 %v7707_v33, %s7436_s29 }
 0x1e7   : > { %1788 = vrot.lane.b32.xlu1 %v7700_v30, %s7440_s6 }
 0x1e9   : > { %1790 = vrot.lane.b32.xlu0 %v7707_v33, %s7440_s6 }
 0x1eb   : > { %957 = vrot.lane.b32.xlu1 %v7712_v34, %s7436_s29 }
 0x1ed   : > { %959 = vrot.lane.b32.xlu0 %v7722_v35, %s7436_s29 }
 0x1ef   : > { %1149 = vrot.lane.b32.xlu1 %v7712_v34, %s7440_s6 }
 0x1f1   : > { %1151 = vrot.lane.b32.xlu0 %v7722_v35, %s7440_s6 }
 0x1f3   : > { %1600 = vrot.lane.b32.xlu1 %v7734_v40, %s7436_s29 }
 0x1f5   : > { %1602 = vrot.lane.b32.xlu0 %v7743_v42, %s7436_s29 }
 0x1f7   : > { %1792 = vrot.lane.b32.xlu1 %v7734_v40, %s7440_s6 }
 0x1f9   : > { %963 = vrot.lane.b32.xlu0 %v7749_v43, %s7436_s29 }
 0x1fb   : > { %961 = vrot.lane.b32.xlu1 %v7737_v41, %s7436_s29 }
 0x1fd   : > { %1155 = vrot.lane.b32.xlu0 %v7749_v43, %s7440_s6 }
 0x1ff   : > { %1153 = vrot.lane.b32.xlu1 %v7737_v41, %s7440_s6 }
 0x201   : > { %1606 = vrot.lane.b32.xlu0 %v7768_v50, %s7436_s29 }
 0x203   : > { %1604 = vrot.lane.b32.xlu1 %v7774_v51, %s7436_s29 }
 0x205   : > { %967 = vrot.lane.b32.xlu0 %v7780_v52, %s7436_s29 }
 0x207   : > { %1794 = vrot.lane.b32.xlu1 %v7743_v42, %s7440_s6 }
 0x209   : > { %1159 = vrot.lane.b32.xlu0 %v7780_v52, %s7440_s6 }
 0x20b   : > { %1796 = vrot.lane.b32.xlu1 %v7774_v51, %s7440_s6 }
 0x20d   : > { %1610 = vrot.lane.b32.xlu0 %v7794_v56, %s7436_s29 }
 0x20f   : > { %965 = vrot.lane.b32.xlu1 %v7762_v49, %s7436_s29 }
 0x211   : > { %1802 = vrot.lane.b32.xlu0 %v7794_v56, %s7440_s6 }
 0x213   : > { %1157 = vrot.lane.b32.xlu1 %v7762_v49, %s7440_s6 }
 0x215   : > { %971 = vrot.lane.b32.xlu0 %v7808_v58, %s7436_s29 }
 0x217   : > { %1608 = vrot.lane.b32.xlu1 %v7819_v62, %s7436_s29 }
 0x219   : > { %1163 = vrot.lane.b32.xlu0 %v7808_v58, %s7440_s6 }
 0x21b   : > { %1800 = vrot.lane.b32.xlu1 %v7819_v62, %s7440_s6 }
 0x21d   : > { %1614 = vrot.lane.b32.xlu0 %v7833_v3, %s7436_s29 }
 0x21f   : > { %1798 = vrot.lane.b32.xlu1 %v7768_v50, %s7440_s6 }
 0x221   : > { %975 = vrot.lane.b32.xlu0 %v7839_v4, %s7436_s29 }
 0x223   : > { %969 = vrot.lane.b32.xlu1 %v7800_v57, %s7436_s29 }
 0x225   : > { %1167 = vrot.lane.b32.xlu0 %v7839_v4, %s7440_s6 }
 0x227   : > { %1161 = vrot.lane.b32.xlu1 %v7800_v57, %s7440_s6 }
 0x229   : > { %1618 = vrot.lane.b32.xlu0 %v7855_v11, %s7436_s29 }
 0x22b   : > { %1612 = vrot.lane.b32.xlu1 %v7862_v14, %s7436_s29 }
 0x22d   : > { %1810 = vrot.lane.b32.xlu0 %v7855_v11, %s7440_s6 }
 0x22f   : > { %1804 = vrot.lane.b32.xlu1 %v7862_v14, %s7440_s6 }
 0x231   : > { %1622 = vrot.lane.b32.xlu0 %v7873_v19, %s7436_s29 }
 0x233   : > { %973 = vrot.lane.b32.xlu1 %v7825_v2, %s7436_s29 }
 0x237   : > { %1165 = vrot.lane.b32.xlu1 %v7825_v2, %s7440_s6 }
 0x23b   : > { %1616 = vrot.lane.b32.xlu1 %v7883_v22, %s7436_s29 }
 0x23d   : > { %v7887_v23 = vpop.permute.xlu1 %945 }
 0x23e   : > { %12227 = vst [vmem:[#allocation28_spill] sm:$0xff] %v7887_v23  ;;  %v507_v26 = vpop.f32.mrb[8].mxu1 }
 0x23f   : > { %v656_v28 = vcombine.high %v507_v26, %v507_v26  ;;  %v7005_v29 = vpop.f32.mrb[9].mxu1  ;;  %1808 = vrot.lane.b32.xlu1 %v7883_v22, %s7440_s6  ;;  %v7891_v31 = vpop.permute.xlu0 %947  ;;  %v7899_v38 = vrot.slane %v507_v26, %v7643_v10 }
 0x240   : > { %12228 = vst [vmem:[#allocation29_spill] sm:$0xff] %v7891_v31 }
 0x241   : > { %v7894_v32 = vrot.slane %v656_v28, %v7643_v10  ;;  %v7896_v36 = vpop.permute.xlu1 %1137  ;;  %12231 = vst [vmem:[#allocation32_spill] sm:$0xff] %v7899_v38  ;;  %v1383_v59 = vrot.slane %v7899_v38, 7 }
 0x242   : > { %12230 = vst [vmem:[#allocation31_spill] sm:$0xff] %v7896_v36 }
 0x243   : > { %12229 = vst [vmem:[#allocation30_spill] sm:$0xff] %v7894_v32  ;;  %1806 = vrot.lane.b32.xlu1 %v7833_v3, %s7440_s6  ;;  %979 = vrot.lane.b32.xlu0 %v7894_v32, %s7436_s29  ;;  %v7905_v39 = vpop.permute.xlu0 %1139  ;;  %v7910_v45 = vcombine.high %v7894_v32, %v7894_v32  ;;  %v7939_v13 = vsel %vm7691_vm11, %v1382_v0, %v1383_v59 }
 0x244   : > { %12232 = vst [vmem:[#allocation33_spill] sm:$0xff] %v7905_v39  ;;  %12239 = vst [vmem:[#allocation40_spill] sm:$0xff] %v7939_v13 }
 0x245   : > { %12233 = vst [vmem:[#allocation34_spill] sm:$0xff] %v7910_v45  ;;  %v512_v46 = vpop.f32.mrb[10].mxu1  ;;  %v7912_v47 = vpop.permute.xlu1 %949  ;;  %v11924_v60 = vrot.slane %v7910_v45, 7 }
 0x246   : > { %12234 = vst [vmem:[#allocation35_spill] sm:$0xff] %v7912_v47  ;;  %v673_v53 = vcombine.high %v512_v46, %v512_v46  ;;  %v7919_v54 = vrot.slane %v512_v46, %v7643_v10  ;;  %v7008_v55 = vpop.f32.mrb[11].mxu1 }
 0x247   : > { %1620 = vrot.lane.b32.xlu1 %v7916_v48, %s7436_s29  ;;  %1171 = vrot.lane.b32.xlu0 %v7894_v32, %s7440_s6  ;;  %v7927_v61 = vpop.permute.xlu0 %951  ;;  %v1392_v8 = vrot.slane %v11924_v60, 2 }
 0x248   : > { %12235 = vst [vmem:[#allocation36_spill] sm:$0xff] %v7919_v54  ;;  %12236 = vst [vmem:[#allocation37_spill] sm:$0xff] %v7927_v61  ;;  %v7930_v63 = vrot.slane %v673_v53, %v7643_v10  ;;  %v11923_v7 = vrot.slane %v7919_v54, 7  ;;  %v7966_v53 = vsel %vm7691_vm11, %v1379_v20, %v1380_v44 }
 0x249   : > { %v517_v5 = vpop.f32.mrb[12].mxu1  ;;  %v7932_v6 = vpop.permute.xlu1 %1141 }
 0x24a   : > { %12237 = vst [vmem:[#allocation38_spill] sm:$0xff] %v7930_v63  ;;  %12238 = vst [vmem:[#allocation39_spill] sm:$0xff] %v7932_v6  ;;  %v7011_v16 = vpop.f32.mrb[13].mxu1  ;;  %v7943_v26 = vcombine.high %v7930_v63, %v7930_v63  ;;  %v7955_v29 = vsel %vm7691_vm11, %v1392_v8, %v11923_v7  ;;  %v7960_v17 = vrot.slane %v517_v5, %v7643_v10 }
 0x24b   : > { %1812 = vrot.lane.b32.xlu1 %v7916_v48, %s7440_s6  ;;  %1626 = vrot.lane.b32.xlu0 %v7939_v13, %s7436_s29  ;;  %v7949_v28 = vpop.permute.xlu0 %1143  ;;  %v7979_v16 = vcombine.high %v7899_v38, %v7899_v38  ;;  %v2274_v58 = vcombine.low %v7734_v40, %v7955_v29 }
 0x24c   : > { %12240 = vst [vmem:[#allocation41_spill] sm:$0xff] %v7943_v26  ;;  %12241 = vst [vmem:[#allocation42_spill] sm:$0xff] %v7949_v28  ;;  %v11925_v55 = vrot.slane %v7943_v26, 7  ;;  %v11926_v44 = vrot.slane %v7960_v17, 7  ;;  %v7441_v28 = vmov 1934713408  }
 0x24d   : > { %v7957_v37 = vpop.permute.xlu1 %953  ;;  %12243 = vst [vmem:[#allocation44_spill] sm:$0xff] %v7960_v17 }
 0x24e   : > { %12242 = vst [vmem:[#allocation43_spill] sm:$0xff] %v7957_v37  ;;  %v7962_v46 = vpop.f32.mrb[14].mxu1  ;;  %v1404_v20 = vrot.slane %v11925_v55, 2  ;;  %v6821_v55 = vrot.slane %v7979_v16, 9 }
 0x24f   : > { %1624 = vrot.lane.b32.xlu1 %v7966_v53, %s7436_s29  ;;  %1818 = vrot.lane.b32.xlu0 %v7939_v13, %s7440_s6  ;;  %v7973_v59 = vpop.permute.xlu0 %955  ;;  %v7014_v0 = vpop.f32.mrb[15].mxu1 }
 0x250   : > { %12244 = vst [vmem:[#allocation45_spill] sm:$0xff] %v7973_v59  ;;  %v7994_v0 = vsel %vm7691_vm11, %v1404_v20, %v11926_v44  ;;  %v8034_v59 = vcombine.high %v7919_v54, %v7919_v54 }
 0x251   : > { %v7975_v8 = vpop.permute.xlu1 %1145 }
 0x252   : > { %12245 = vst [vmem:[#allocation46_spill] sm:$0xff] %v7975_v8  ;;  %v1387_v8 = vrot.slane %v7894_v32, 7  ;;  %12253 = vst [vmem:[#allocation54_spill] sm:$0xff] %v8034_v59 }
 0x253   : > { %1816 = vrot.lane.b32.xlu1 %v7966_v53, %s7440_s6  ;;  %983 = vrot.lane.b32.xlu0 %v7919_v54, %s7436_s29  ;;  %v7988_v1 = vpop.permute.xlu0 %1147 }
 0x254   : > { %12246 = vst [vmem:[#allocation47_spill] sm:$0xff] %v7988_v1  ;;  %v8014_v44 = vsel %vm7691_vm11, %v6821_v55, %v1387_v8  ;;  %v690_v1 = vcombine.high %v517_v5, %v517_v5  ;;  %v8042_v5 = vcombine.high %v7960_v17, %v7960_v17 }
 0x255   : > { %v7996_v7 = vpop.permute.xlu1 %1596 }
 0x256   : > { %12247 = vst [vmem:[#allocation48_spill] sm:$0xff] %v7996_v7  ;;  %v7998_v60 = vpop.f32.mrb[16].mxu1  ;;  %12255 = vst [vmem:[#allocation56_spill] sm:$0xff] %v8042_v5  ;;  %v12264_v57 = vrot.slane %v8042_v5, 7 }
 0x257   : > { %1814 = vrot.lane.b32.xlu1 %v7873_v19, %s7440_s6  ;;  %1175 = vrot.lane.b32.xlu0 %v7919_v54, %s7440_s6  ;;  %v7017_v37 = vpop.f32.mrb[17].mxu1  ;;  %v8006_v6 = vpop.permute.xlu0 %1598 }
 0x258   : > { %12248 = vst [vmem:[#allocation49_spill] sm:$0xff] %v8006_v6  ;;  %v1410_v49 = vrot.slane %v12264_v57, 2 }
 0x259   : > { %v8008_v47 = vpop.permute.xlu1 %1788 }
 0x25a   : > { %12249 = vst [vmem:[#allocation50_spill] sm:$0xff] %v8008_v47  ;;  %v8010_v20 = vpop.f32.mrb[18].mxu1  ;;  %v8045_v47 = vrot.slane %v690_v1, %v7643_v10  ;;  %v12259_v1 = vrot.slane %v7910_v45, 7 }
 0x25b   : > { %1980 = vrot.lane.b32.xlu1 %v7899_v38, %s7436_s29  ;;  %1820 = vrot.lane.b32.xlu0 %v8014_v44, %s7440_s6  ;;  %v7020_v7 = vpop.f32.mrb[19].mxu1  ;;  %v8020_v36 = vpop.permute.xlu0 %1790  ;;  %v8154_v3 = vrot.slane %v8010_v20, %v7643_v10 }
 0x25c   : > { %12250 = vst [vmem:[#allocation51_spill] sm:$0xff] %v8020_v36  ;;  %12256 = vst [vmem:[#allocation57_spill] sm:$0xff] %v8045_v47  ;;  %v8073_v2 = vcombine.high %v8045_v47, %v8045_v47  ;;  %v11946_v52 = vrot.slane %v8045_v47, 7 }
 0x25d   : > { %v8022_v37 = vpop.permute.xlu1 %957  ;;  %12274 = vst [vmem:[#allocation71_spill] sm:$0xff] %v8154_v3 }
 0x25e   : > { %12251 = vst [vmem:[#allocation52_spill] sm:$0xff] %v8022_v37  ;;  %v8024_v6 = vpop.f32.mrb[20].mxu1  ;;  %v1389_v37 = vrot.slane %v1387_v8, 2  ;;  %v1396_v8 = vrot.slane %v8034_v59, 7 }
 0x25f   : > { %1992 = vrot.lane.b32.xlu1 %v7899_v38, %s7440_s6  ;;  %987 = vrot.lane.b32.xlu0 %v7930_v63, %s7436_s29  ;;  %v7023_v55 = vpop.f32.mrb[21].mxu1  ;;  %v8030_v23 = vpop.permute.xlu0 %959 }
 0x260   : > { %12252 = vst [vmem:[#allocation53_spill] sm:$0xff] %v8030_v23  ;;  %v2006_v55 = vunpack.c.l.s4 %v7441_v28  ;;  %v8062_v28 = vsel %vm7691_vm11, %v1389_v37, %v12259_v1  ;;  %v707_v37 = vcombine.high %v7962_v46, %v7962_v46  ;;  %v2058_v1 = vcombine.low %v7700_v30, %v8014_v44 }
 0x261   : > { %v8036_v7 = vpop.permute.xlu1 %1149  ;;  %12260 = vst [vmem:[#allocation60_spill] sm:$0xff] %v8062_v28 }
 0x262   : > { %12254 = vst [vmem:[#allocation55_spill] sm:$0xff] %v8036_v7  ;;  %v8038_v36 = vpop.f32.mrb[22].mxu1  ;;  %v2007_v38 = vunpack.c.0.s8 %v2006_v55  ;;  %v724_v55 = vcombine.high %v7998_v60, %v7998_v60  ;;  %v8105_v57 = vrot.slane %v707_v37, %v7643_v10 }
 0x263   : > { %977 = vrot.lane.b32.xlu1 %v7979_v16, %s7436_s29  ;;  %1179 = vrot.lane.b32.xlu0 %v7930_v63, %s7440_s6  ;;  %v8051_v23 = vpop.permute.xlu0 %1151  ;;  %v7026_v7 = vpop.f32.mrb[23].mxu1 }
 0x264   : > { %12257 = vst [vmem:[#allocation58_spill] sm:$0xff] %v8051_v23  ;;  %v8091_v13 = vsub.s32 %v2007_v38, %v7640_v9  ;;  %12266 = vst [vmem:[#allocation65_spill] sm:$0xff] %v8105_v57  ;;  %v12267_v9 = vrot.slane %v7919_v54, 7 }
 0x265   : > { %v8054_v61 = vpop.permute.xlu1 %1600 }
 0x266   : > { %12258 = vst [vmem:[#allocation59_spill] sm:$0xff] %v8054_v61  ;;  %v8056_v39 = vpop.f32.mrb[24].mxu1  ;;  %v1398_v61 = vrot.slane %v1396_v8, 2  ;;  %v1395_v38 = vrot.slane %v12267_v9, 2 }
 0x267   : > { %1169 = vrot.lane.b32.xlu1 %v7979_v16, %s7440_s6  ;;  %1630 = vrot.lane.b32.xlu0 %v8062_v28, %s7436_s29  ;;  %v7029_v7 = vpop.f32.mrb[25].mxu1  ;;  %v8069_v23 = vpop.permute.xlu0 %1602  ;;  %v792_v9 = vcombine.high %v8056_v39, %v8056_v39 }
 0x268   : > { %12261 = vst [vmem:[#allocation61_spill] sm:$0xff] %v8069_v23  ;;  %v1399_v7 = vrot.slane %v7930_v63, 7  ;;  %v8086_v23 = vrot.slane %v7962_v46, %v7643_v10  ;;  %v8158_v56 = vsel %vm7691_vm11, %v1395_v38, %v1396_v8  ;;  %v12296_v63 = vrot.slane %v8154_v3, 7 }
 0x269   : > { %v8081_v31 = vpop.permute.xlu1 %1792  ;;  %12275 = vst [vmem:[#allocation72_spill] sm:$0xff] %v8158_v56  ;;  %v8182_v38 = vrot.slane %v792_v9, %v7643_v10 }
 0x26a   : > { %12262 = vst [vmem:[#allocation62_spill] sm:$0xff] %v8081_v31  ;;  %12263 = vst [vmem:[#allocation63_spill] sm:$0xff] %v8086_v23  ;;  %v552_v4 = vpop.f32.mrb[26].mxu1  ;;  %v8101_v46 = vsel %vm7691_vm11, %v1398_v61, %v1399_v7  ;;  %v1401_v19 = vrot.slane %v1399_v7, 2  ;;  %v1441_v21 = vrot.slane %v12296_v63, 2 }
 0x26b   : > { %981 = vrot.lane.b32.xlu1 %v7910_v45, %s7436_s29  ;;  %1822 = vrot.lane.b32.xlu0 %v8062_v28, %s7440_s6  ;;  %v7032_v30 = vpop.f32.mrb[27].mxu1  ;;  %v8097_v31 = vpop.permute.xlu0 %963  ;;  %v2490_v40 = vcombine.low %v7774_v51, %v8101_v46  ;;  %v8139_v7 = vrot.slane %v552_v4, %v7643_v10  ;;  %v809_v41 = vcombine.high %v552_v4, %v552_v4  ;;  %v12281_v4 = vrot.slane %v7943_v26, 7 }
 0x26c   : > { %12265 = vst [vmem:[#allocation64_spill] sm:$0xff] %v8097_v31  ;;  %v8113_v30 = vrot.slane %v724_v55, %v7643_v10  ;;  %v8116_v31 = vrot.slane %v2058_v1, %v8091_v13  ;;  %v8130_v55 = vcombine.high %v8086_v23, %v8086_v23  ;;  %v8136_v1 = vsel %vm7691_vm11, %v1410_v49, %v11946_v52 }
 0x26d   : > { %v8118_v61 = vpop.permute.xlu1 %961  ;;  %12271 = vst [vmem:[#allocation69_spill] sm:$0xff] %v8139_v7  ;;  %v12273_v49 = vrot.slane %v8073_v2, 7  ;;  %v2922_v34 = vcombine.low %v7862_v14, %v8136_v1  ;;  %12280 = vst [vmem:[#allocation77_spill] sm:$0xff] %v8182_v38  ;;  %v8193_v14 = vrot.slane %v2490_v40, %v8091_v13  ;;  %v12287_v40 = vrot.slane %v8086_v23, 7 }
 0x26e   : > { %12268 = vst [vmem:[#allocation66_spill] sm:$0xff] %v8116_v31  ;;  %12269 = vst [vmem:[#allocation67_spill] sm:$0xff] %v8118_v61  ;;  %v8124_v11 = vpop.f32.mrb[28].mxu1  ;;  %v2706_v61 = vcombine.low %v7819_v62, %v7994_v0  ;;  %v741_v62 = vcombine.high %v8010_v20, %v8010_v20  ;;  %v8175_v8 = vcombine.high %v8113_v30, %v8113_v30 }
 0x26f   : > { %12270 = vst [vmem:[#allocation68_spill] sm:$0xff] %v8130_v55  ;;  %1173 = vrot.lane.b32.xlu1 %v7910_v45, %s7440_s6  ;;  %991 = vrot.lane.b32.xlu0 %v7960_v17, %s7436_s29  ;;  %v7035_v51 = vpop.f32.mrb[29].mxu1  ;;  %v8145_v37 = vpop.permute.xlu0 %1155  ;;  %v1416_v52 = vrot.slane %v12273_v49, 2  ;;  %v8190_v20 = vsel %vm7691_vm11, %v1401_v19, %v12281_v4  ;;  %12283 = vst [vmem:[#allocation79_spill] sm:$0xff] %v8193_v14  ;;  %v8226_v19 = vrot.slane %v809_v41, %v7643_v10 }
 0x270   : > { %12272 = vst [vmem:[#allocation70_spill] sm:$0xff] %v8145_v37  ;;  %v8161_v51 = vrot.slane %v2274_v58, %v8091_v13  ;;  %v8165_v37 = vcombine.high %v8105_v57, %v8105_v57  ;;  %v8179_v58 = vrot.slane %v7998_v60, %v7643_v10  ;;  %12282 = vst [vmem:[#allocation78_spill] sm:$0xff] %v8190_v20  ;;  %v6822_v45 = vrot.slane %v8113_v30, 9 }
 0x271   : > { %v8169_v49 = vpop.permute.xlu1 %1153  ;;  %v8206_v50 = vrot.slane %v2706_v61, %v8091_v13  ;;  %v8213_v4 = vsel %vm7691_vm11, %v1416_v52, %v12287_v40  ;;  %v8223_v61 = vrot.slane %v741_v62, %v7643_v10  ;;  %12289 = vst [vmem:[#allocation84_spill] sm:$0xff] %v8226_v19  ;;  %v8231_v52 = vrot.slane %v2922_v34, %v8091_v13 }
 0x272   : > { %12276 = vst [vmem:[#allocation73_spill] sm:$0xff] %v8161_v51  ;;  %12277 = vst [vmem:[#allocation74_spill] sm:$0xff] %v8165_v37  ;;  %v8184_v43 = vpop.f32.mrb[30].mxu1  ;;  %v826_v24 = vcombine.high %v8124_v11, %v8124_v11  ;;  %v8242_v62 = vcombine.high %v8182_v38, %v8182_v38  ;;  %v758_v34 = vcombine.high %v8024_v6, %v8024_v6 }
 0x273   : > { %12278 = vst [vmem:[#allocation75_spill] sm:$0xff] %v8169_v49  ;;  %12279 = vst [vmem:[#allocation76_spill] sm:$0xff] %v8179_v58  ;;  %v8197_v49 = vcombine.high %v8139_v7, %v8139_v7  ;;  %1628 = vrot.lane.b32.xlu1 %v8014_v44, %s7436_s29  ;;  %1183 = vrot.lane.b32.xlu0 %v7960_v17, %s7440_s6  ;;  %v7038_v60 = vpop.f32.mrb[31].mxu1  ;;  %v8203_v9 = vpop.permute.xlu0 %1606  ;;  %v8259_v41 = vrot.slane %v8124_v11, %v7643_v10  ;;  %v12299_v11 = vrot.slane %v8175_v8, 7 }
 0x274   : > { %12285 = vst [vmem:[#allocation81_spill] sm:$0xff] %v8203_v9  ;;  %12286 = vst [vmem:[#allocation82_spill] sm:$0xff] %v8206_v50  ;;  %v8219_v60 = vcombine.high %v8154_v3, %v8154_v3  ;;  %v12294_v9 = vrot.slane %v8130_v55, 7  ;;  %v6823_v42 = vrot.slane %v8242_v62, 9  ;;  %v8283_v63 = vcombine.high %v8226_v19, %v8226_v19 }
 0x275   : > { %12284 = vst [vmem:[#allocation80_spill] sm:$0xff] %v8197_v49  ;;  %v8228_v35 = vpop.permute.xlu1 %1604  ;;  %12291 = vst [vmem:[#allocation86_spill] sm:$0xff] %v8231_v52  ;;  %v8279_v33 = vsel %vm7691_vm11, %v6822_v45, %v12299_v11  ;;  %v8286_v54 = vrot.slane %v826_v24, %v7643_v10  ;;  %v12304_v28 = vrot.slane %v8197_v49, 7  ;;  %v8298_v45 = vrot.slane %v758_v34, %v7643_v10 }
 0x276   : > { %12288 = vst [vmem:[#allocation83_spill] sm:$0xff] %v8219_v60  ;;  %12290 = vst [vmem:[#allocation85_spill] sm:$0xff] %v8228_v35  ;;  %v8236_v44 = vpop.f32.mrb[32].mxu1  ;;  %v1422_v18 = vrot.slane %v12294_v9, 2  ;;  %v775_v34 = vcombine.high %v8038_v36, %v8038_v36  ;;  %v8329_v11 = vcombine.high %v8259_v41, %v8259_v41  ;;  %v12313_v49 = vrot.slane %v8105_v57, 7 }
 0x277   : > { %12292 = vst [vmem:[#allocation87_spill] sm:$0xff] %v8242_v62  ;;  %985 = vrot.lane.b32.xlu1 %v8034_v59, %s7436_s29  ;;  %1634 = vrot.lane.b32.xlu0 %v8158_v56, %s7436_s29  ;;  %v8251_v40 = vpop.permute.xlu0 %967  ;;  %v7041_v35 = vpop.f32.mrb[33].mxu1  ;;  %12295 = vst [vmem:[#allocation89_spill] sm:$0xff] %v8259_v41  ;;  %v1490_v15 = vrot.slane %v12304_v28, 2 }
 0x278   : > { %12293 = vst [vmem:[#allocation88_spill] sm:$0xff] %v8251_v40  ;;  %v8267_v35 = vrot.slane %v8024_v6, %v7643_v10  ;;  %v12298_v40 = vrot.slane %v8165_v37, 7  ;;  %12300 = vst [vmem:[#allocation91_spill] sm:$0xff] %v8283_v63  ;;  %v12302_v6 = vrot.slane %v8139_v7, 7  ;;  %v8372_v38 = vrot.slane %v775_v34, %v7643_v10 }
 0x279   : > { %v8269_v9 = vpop.permute.xlu1 %1794  ;;  %12301 = vst [vmem:[#allocation92_spill] sm:$0xff] %v8286_v54  ;;  %12305 = vst [vmem:[#allocation94_spill] sm:$0xff] %v8298_v45  ;;  %v12003_v34 = vrot.slane %v8259_v41, 7 }
 0x27a   : > { %12297 = vst [vmem:[#allocation90_spill] sm:$0xff] %v8269_v9  ;;  %v8273_v25 = vrot.slane %v12298_v40, 2  ;;  %v8292_v9 = vsel %vm7691_vm11, %v6823_v42, %v12302_v6  ;;  %v8308_v42 = vcombine.high %v8223_v61, %v8223_v61  ;;  %v12307_v6 = vrot.slane %v8219_v60, 7  ;;  %12311 = vst [vmem:[#allocation98_spill] sm:$0xff] %v8329_v11 }
 0x27b   : > { %12303 = vst [vmem:[#allocation93_spill] sm:$0xff] %v8292_v9  ;;  %1177 = vrot.lane.b32.xlu1 %v8034_v59, %s7440_s6  ;;  %1824 = vrot.lane.b32.xlu0 %v7955_v29, %s7440_s6  ;;  %v8304_v24 = vpop.permute.xlu0 %1159  ;;  %v2067_v28 = vcombine.low %v8279_v33, %v8292_v9  ;;  %v8337_v9 = vsel %vm7691_vm11, %v1422_v18, %v12313_v49  ;;  %12319 = vst [vmem:[#allocation104_spill] sm:$0xff] %v8372_v38 }
 0x27c   : > { %12306 = vst [vmem:[#allocation95_spill] sm:$0xff] %v8304_v24  ;;  %v8319_v40 = vsel %vm7691_vm11, %v1441_v21, %v12307_v6  ;;  %v12309_v24 = vrot.slane %v8226_v19, 7  ;;  %v8356_v18 = vcombine.high %v8286_v54, %v8286_v54  ;;  %v843_v49 = vcombine.high %v8184_v43, %v8184_v43 }
 0x27d   : > { %12308 = vst [vmem:[#allocation96_spill] sm:$0xff] %v8319_v40  ;;  %v8331_v32 = vpop.permute.xlu1 %1796  ;;  %v8340_v21 = vrot.slane %v2067_v28, %v8091_v13  ;;  %v12318_v28 = vrot.slane %v8223_v61, 7  ;;  %v8387_v19 = vcombine.high %v8298_v45, %v8298_v45  ;;  %v12328_v60 = vrot.slane %v8308_v42, 7 }
 0x27e   : > { %v8325_v59 = vsel %vm7691_vm11, %v1490_v15, %v12309_v24  ;;  %12312 = vst [vmem:[#allocation99_spill] sm:$0xff] %v8331_v32  ;;  %v8347_v24 = vrot.slane %v8038_v36, %v7643_v10  ;;  %v8351_v32 = vcombine.high %v8267_v35, %v8267_v35  ;;  %12316 = vst [vmem:[#allocation102_spill] sm:$0xff] %v8356_v18 }
 0x27f   : > { %12310 = vst [vmem:[#allocation97_spill] sm:$0xff] %v8325_v59  ;;  %12314 = vst [vmem:[#allocation100_spill] sm:$0xff] %v8340_v21  ;;  %v2283_v15 = vcombine.low %v8319_v40, %v8325_v59  ;;  %989 = vrot.lane.b32.xlu1 %v7943_v26, %s7436_s29  ;;  %995 = vrot.lane.b32.xlu0 %v8045_v47, %s7436_s29  ;;  %v8364_v36 = vpop.permute.xlu0 %1610  ;;  %v1447_v6 = vrot.slane %v12318_v28, 2  ;;  %v12324_v59 = vrot.slane %v8283_v63, 7  ;;  %v12334_v63 = vrot.slane %v8356_v18, 7 }
 0x280   : > { %12315 = vst [vmem:[#allocation101_spill] sm:$0xff] %v8347_v24  ;;  %12317 = vst [vmem:[#allocation103_spill] sm:$0xff] %v8364_v36  ;;  %v8381_v36 = vrot.slane %v8184_v43, %v7643_v10  ;;  %v8422_v21 = vcombine.high %v8347_v24, %v8347_v24 }
 0x281   : > { %v8376_v40 = vrot.slane %v2283_v15, %v8091_v13  ;;  %v8383_v28 = vpop.permute.xlu1 %965  ;;  %12323 = vst [vmem:[#allocation108_spill] sm:$0xff] %v8387_v19  ;;  %v1496_v7 = vrot.slane %v12324_v59, 2  ;;  %v12325_v15 = vrot.slane %v8267_v35, 7  ;;  %v8412_v43 = vsel %vm7691_vm11, %v1447_v6, %v12328_v60 }
 0x282   : > { %12321 = vst [vmem:[#allocation106_spill] sm:$0xff] %v8381_v36  ;;  %12322 = vst [vmem:[#allocation107_spill] sm:$0xff] %v8383_v28  ;;  %v8399_v28 = vrot.slane %v843_v49, %v7643_v10  ;;  %v1508_v41 = vrot.slane %v12334_v63, 2  ;;  %v8459_v63 = vrot.slane %v8236_v44, %v7643_v10 }
 0x283   : > { %12320 = vst [vmem:[#allocation105_spill] sm:$0xff] %v8376_v40  ;;  %v1453_v31 = vrot.slane %v12325_v15, 2  ;;  %1181 = vrot.lane.b32.xlu1 %v7943_v26, %s7440_s6  ;;  %1187 = vrot.lane.b32.xlu0 %v8045_v47, %s7440_s6  ;;  %v8405_v59 = vpop.permute.xlu0 %1802  ;;  %v8418_v49 = vsel %vm7691_vm11, %v1496_v7, %v12003_v34  ;;  %12330 = vst [vmem:[#allocation112_spill] sm:$0xff] %v8422_v21  ;;  %v12332_v40 = vrot.slane %v8329_v11, 7 }
 0x284   : > { %12326 = vst [vmem:[#allocation109_spill] sm:$0xff] %v8399_v28  ;;  %12327 = vst [vmem:[#allocation110_spill] sm:$0xff] %v8405_v59  ;;  %v12331_v59 = vrot.slane %v8298_v45, 7  ;;  %v2499_v15 = vcombine.low %v8412_v43, %v8418_v49  ;;  %v8436_v34 = vcombine.high %v8381_v36, %v8381_v36  ;;  %v8452_v26 = vcombine.high %v8372_v38, %v8372_v38 }
 0x285   : > { %12329 = vst [vmem:[#allocation111_spill] sm:$0xff] %v8418_v49  ;;  %v1502_v60 = vrot.slane %v12332_v40, 2  ;;  %v8430_v6 = vpop.permute.xlu1 %1157  ;;  %v12336_v49 = vrot.slane %v8351_v32, 7 }
 0x286   : > { %v1459_v51 = vrot.slane %v12331_v59, 2  ;;  %12333 = vst [vmem:[#allocation113_spill] sm:$0xff] %v8430_v6  ;;  %v8442_v59 = vrot.slane %v8056_v39, %v7643_v10  ;;  %12337 = vst [vmem:[#allocation115_spill] sm:$0xff] %v8452_v26  ;;  %v8455_v7 = vrot.slane %v2499_v15, %v8091_v13  ;;  %v8475_v15 = vcombine.high %v8399_v28, %v8399_v28 }
 0x287   : > { %v8448_v40 = vsel %vm7691_vm11, %v1453_v31, %v12336_v49  ;;  %1632 = vrot.lane.b32.xlu1 %v7955_v29, %s7436_s29  ;;  %1638 = vrot.lane.b32.xlu0 %v8190_v20, %s7436_s29  ;;  %v8465_v39 = vpop.permute.xlu0 %971  ;;  %v12340_v31 = vrot.slane %v8286_v54, 7  ;;  %v12345_v29 = vrot.slane %v8381_v36, 7  ;;  %v860_v6 = vcombine.high %v8236_v44, %v8236_v44 }
 0x288   : > { %12335 = vst [vmem:[#allocation114_spill] sm:$0xff] %v8442_v59  ;;  %12338 = vst [vmem:[#allocation116_spill] sm:$0xff] %v8455_v7  ;;  %v2013_v44 = vcombine.low %v8113_v30, %v8242_v62  ;;  %v12032_v62 = vrot.slane %v8459_v63, 7 }
 0x289   : > { %12339 = vst [vmem:[#allocation117_spill] sm:$0xff] %v8465_v39  ;;  %v8471_v49 = vsel %vm7691_vm11, %v1502_v60, %v12340_v31  ;;  %v8484_v54 = vpop.permute.xlu1 %1608  ;;  %v12343_v60 = vrot.slane %v8387_v19, 7  ;;  %v8498_v11 = vsel %vm7691_vm11, %v1508_v41, %v12345_v29  ;;  %v12351_v29 = vrot.slane %v8372_v38, 7 }
 0x28a   : > { %12341 = vst [vmem:[#allocation118_spill] sm:$0xff] %v8471_v49  ;;  %v2715_v39 = vcombine.low %v8448_v40, %v8471_v49  ;;  %12342 = vst [vmem:[#allocation119_spill] sm:$0xff] %v8484_v54  ;;  %v8502_v49 = vcombine.high %v8442_v59, %v8442_v59  ;;  %v12348_v54 = vrot.slane %v8347_v24, 7 }
 0x28b   : > { %v8490_v31 = vsel %vm7691_vm11, %v1459_v51, %v12343_v60  ;;  %12346 = vst [vmem:[#allocation121_spill] sm:$0xff] %v8498_v11  ;;  %1826 = vrot.lane.b32.xlu1 %v8158_v56, %s7440_s6  ;;  %1830 = vrot.lane.b32.xlu0 %v8190_v20, %s7440_s6  ;;  %v1471_v18 = vrot.slane %v12351_v29, 2  ;;  %v8532_v36 = vpop.permute.xlu0 %1163  ;;  %v12356_v29 = vrot.slane %v8475_v15, 7 }
 0x28c   : > { %12344 = vst [vmem:[#allocation120_spill] sm:$0xff] %v8490_v31  ;;  %12347 = vst [vmem:[#allocation122_spill] sm:$0xff] %v8502_v49  ;;  %v1465_v14 = vrot.slane %v12348_v54, 2  ;;  %v8507_v51 = vrot.slane %v2715_v39, %v8091_v13  ;;  %v2931_v60 = vcombine.low %v8490_v31, %v8498_v11  ;;  %v8520_v54 = vcombine.high %v8459_v63, %v8459_v63 }
 0x28d   : > { %12353 = vst [vmem:[#allocation126_spill] sm:$0xff] %v8532_v36  ;;  %v8534_v41 = vpop.permute.xlu1 %1800  ;;  %v12355_v39 = vrot.slane %v8436_v34, 7  ;;  %v1520_v31 = vrot.slane %v12356_v29, 2  ;;  %v3354_v11 = vcombine.low %v7916_v48, %v8337_v9  ;;  %v12359_v48 = vrot.slane %v8399_v28, 7 }
 0x28e   : > { %12349 = vst [vmem:[#allocation123_spill] sm:$0xff] %v8507_v51  ;;  %12350 = vst [vmem:[#allocation124_spill] sm:$0xff] %v8520_v54  ;;  %v8530_v7 = vrot.slane %v2931_v60, %v8091_v13  ;;  %v12357_v60 = vrot.slane %v8422_v21, 7 }
 0x28f   : > { %12354 = vst [vmem:[#allocation127_spill] sm:$0xff] %v8534_v41  ;;  %v1514_v56 = vrot.slane %v12355_v39, 2  ;;  %v12035_v41 = vrot.slane %v8452_v26, 7  ;;  %v8554_v39 = vrot.slane %v860_v6, %v7643_v10  ;;  %993 = vrot.lane.b32.xlu1 %v8042_v5, %s7436_s29  ;;  %999 = vrot.lane.b32.xlu0 %v8086_v23, %s7436_s29  ;;  %v8570_v29 = vsel %vm7691_vm11, %v1520_v31, %v12032_v62 }
 0x290   : > { %12352 = vst [vmem:[#allocation125_spill] sm:$0xff] %v8530_v7  ;;  %v8548_v36 = vsel %vm7691_vm11, %v1465_v14, %v12357_v60  ;;  %12361 = vst [vmem:[#allocation130_spill] sm:$0xff] %v8570_v29  ;;  %v12362_v60 = vrot.slane %v8179_v58, 7  ;;  %v12363_v31 = vcombine.low %v7646_v12, %v7979_v16  ;;  %v12369_v12 = vcombine.low %v7883_v22, %v8213_v4  ;;  %v12547_v7 = vld [vmem:[#allocation15_spill] sm:$0xff] }
 0x291   : > { %12358 = vst [vmem:[#allocation128_spill] sm:$0xff] %v8554_v39  ;;  %v8564_v14 = vsel %vm7691_vm11, %v1514_v56, %v12359_v48  ;;  %v8584_v56 = vsel %vm7691_vm11, %v1471_v18, %v12035_v41  ;;  %v8594_v6 = vpop.permute.xlu1 %1798  ;;  %v8602_v41 = vrot.slane %v2013_v44, %v8091_v13  ;;  %v8624_v44 = vrot.slane %v3354_v11, %v8091_v13 }
 0x292   : > { %12360 = vst [vmem:[#allocation129_spill] sm:$0xff] %v8564_v14  ;;  %v8578_v20 = vsel %vm7691_vm11, %v8273_v25, %v12362_v60  ;;  %v3147_v48 = vcombine.low %v8548_v36, %v8564_v14  ;;  %v8592_v62 = vrot.slane %v12363_v31, %v8091_v13  ;;  %12365 = vst [vmem:[#allocation132_spill] sm:$0xff] %v8594_v6  ;;  %v12366_v60 = vrot.slane %v8442_v59, 7  ;;  %v8617_v6 = vpop.permute.xlu0 %1614 }
 0x293   : > { %v3363_v18 = vcombine.low %v8584_v56, %v8570_v29  ;;  %12367 = vst [vmem:[#allocation133_spill] sm:$0xff] %v8602_v41  ;;  %v12368_v14 = vrot.slane %v7960_v17, 7  ;;  %v8610_v16 = vrot.slane %v12369_v12, %v8091_v13  ;;  %12373 = vst [vmem:[#allocation136_spill] sm:$0xff] %v8617_v6  ;;  %1185 = vrot.lane.b32.xlu1 %v8042_v5, %s7440_s6  ;;  %1191 = vrot.lane.b32.xlu0 %v8086_v23, %s7440_s6  ;;  %v12544_v41 = vld [vmem:[#allocation11_spill] sm:$0xff] }
 0x294   : > { %12364 = vst [vmem:[#allocation131_spill] sm:$0xff] %v8592_v62  ;;  %v1477_v10 = vrot.slane %v12366_v60, 2  ;;  %v8613_v31 = vrot.slane %v3147_v48, %v8091_v13  ;;  %v12372_v60 = vrot.slane %v8520_v54, 7  ;;  %12374 = vst [vmem:[#allocation137_spill] sm:$0xff] %v8624_v44  ;;  %v12042_v48 = vrot.slane %v8554_v39, 7  ;;  %v12556_v54 = vld [vmem:[#allocation7_spill] sm:$0xff] }
 0x295   : > { %v1407_v52 = vrot.slane %v12368_v14, 2  ;;  %12370 = vst [vmem:[#allocation134_spill] sm:$0xff] %v8610_v16  ;;  %v8627_v22 = vrot.slane %v3363_v18, %v8091_v13  ;;  %v3570_v12 = vcombine.low %v7966_v53, %v8578_v20  ;;  %v8636_v6 = vpop.permute.xlu1 %969  ;;  %v12377_v29 = vrot.slane %v8502_v49, 7  ;;  %v12525_v16 = vld [vmem:[#allocation80_spill] sm:$0xff]  ;;  %v12623_v27 = vld [vmem:[#allocation123_spill] sm:$0xff] }
 0x296   : > { %12371 = vst [vmem:[#allocation135_spill] sm:$0xff] %v8613_v31  ;;  %v1526_v25 = vrot.slane %v12372_v60, 2  ;;  %12376 = vst [vmem:[#allocation139_spill] sm:$0xff] %v8636_v6  ;;  %v12379_v53 = vrot.slane %v8042_v5, 7  ;;  %v12526_v31 = vrot.slane %v12525_v16, 7 }
 0x297   : > { %12375 = vst [vmem:[#allocation138_spill] sm:$0xff] %v8627_v22  ;;  %v8642_v11 = vsel %vm7691_vm11, %v1477_v10, %v12377_v29  ;;  %1636 = vrot.lane.b32.xlu1 %v8101_v46, %s7436_s29  ;;  %v8665_v10 = vrot.slane %v3570_v12, %v8091_v13  ;;  %v12513_v22 = vld [vmem:[#allocation87_spill] sm:$0xff] }
 0x298   : > { %v8650_v14 = vsel %vm7691_vm11, %v1526_v25, %v12042_v48  ;;  %v8656_v60 = vsel %vm7691_vm11, %v1407_v52, %v12379_v53  ;;  %v8670_v25 = vpop.permute.xlu0 %975  ;;  %v12389_v48 = vrot.slane %v8045_v47, 7 }
 0x299   : > { %12378 = vst [vmem:[#allocation140_spill] sm:$0xff] %v8650_v14  ;;  %v3579_v6 = vcombine.low %v8642_v11, %v8650_v14  ;;  %1642 = vrot.lane.b32.xlu0 %v8656_v60, %s7436_s29  ;;  %12380 = vst [vmem:[#allocation141_spill] sm:$0xff] %v8665_v10  ;;  %v8672_v18 = vpop.permute.xlu1 %1161  ;;  %v12409_v14 = vrot.slane %v8165_v37, 7 }
 0x29a   : > { %12382 = vst [vmem:[#allocation143_spill] sm:$0xff] %v8670_v25  ;;  %12383 = vst [vmem:[#allocation144_spill] sm:$0xff] %v8672_v18  ;;  %v12391_v25 = vrot.slane %v8073_v2, 7 }
 0x29b   : > { %v8668_v29 = vrot.slane %v3579_v6, %v8091_v13  ;;  %1828 = vrot.lane.b32.xlu1 %v8101_v46, %s7440_s6 }
 0x29c   : > { %v8682_v12 = vpop.permute.xlu0 %1167 }
 0x29d   : > { %12381 = vst [vmem:[#allocation142_spill] sm:$0xff] %v8668_v29  ;;  %1832 = vrot.lane.b32.xlu0 %v7994_v0, %s7440_s6  ;;  %v8680_v53 = vpop.permute.xlu1 %1612  ;;  %12385 = vst [vmem:[#allocation146_spill] sm:$0xff] %v8682_v12  ;;  %v1413_v12 = vrot.slane %v12389_v48, 2 }
 0x29e   : > { %12384 = vst [vmem:[#allocation145_spill] sm:$0xff] %v8680_v53 }
 0x29f   : > { %997 = vrot.lane.b32.xlu1 %v8073_v2, %s7436_s29  ;;  %v8710_v53 = vsel %vm7691_vm11, %v1413_v12, %v12391_v25 }
 0x2a0   : > { %v8694_v46 = vpop.permute.xlu0 %1618 }
 0x2a1   : > { %1834 = vrot.lane.b32.xlu0 %v8656_v60, %s7440_s6  ;;  %v8688_v6 = vpop.permute.xlu1 %1804  ;;  %12387 = vst [vmem:[#allocation148_spill] sm:$0xff] %v8694_v46 }
 0x2a2   : > { %12386 = vst [vmem:[#allocation147_spill] sm:$0xff] %v8688_v6 }
 0x2a3   : > { %1189 = vrot.lane.b32.xlu1 %v8073_v2, %s7440_s6 }
 0x2a4   : > { %v8712_v46 = vpop.permute.xlu0 %1810 }
 0x2a5   : > { %1003 = vrot.lane.b32.xlu0 %v8105_v57, %s7436_s29  ;;  %v8696_v52 = vpop.permute.xlu1 %973  ;;  %12392 = vst [vmem:[#allocation151_spill] sm:$0xff] %v8712_v46 }
 0x2a6   : > { %12388 = vst [vmem:[#allocation149_spill] sm:$0xff] %v8696_v52  ;;  %v12401_v52 = vrot.slane %v8130_v55, 7 }
 0x2a7   : > { %1640 = vrot.lane.b32.xlu1 %v7994_v0, %s7436_s29 }
 0x2a8   : > { %v8724_v48 = vpop.permute.xlu0 %1622 }
 0x2a9   : > { %1195 = vrot.lane.b32.xlu0 %v8105_v57, %s7440_s6  ;;  %v8704_v6 = vpop.permute.xlu1 %1165  ;;  %12394 = vst [vmem:[#allocation153_spill] sm:$0xff] %v8724_v48 }
 0x2aa   : > { %12390 = vst [vmem:[#allocation150_spill] sm:$0xff] %v8704_v6 }
 0x2ab   : > { %1001 = vrot.lane.b32.xlu1 %v8130_v55, %s7436_s29 }
 0x2ad   : > { %1646 = vrot.lane.b32.xlu0 %v8710_v53, %s7436_s29  ;;  %v8718_v0 = vpop.permute.xlu1 %1616 }
 0x2ae   : > { %12393 = vst [vmem:[#allocation152_spill] sm:$0xff] %v8718_v0  ;;  %v12398_v0 = vrot.slane %v8086_v23, 7 }
 0x2af   : > { %1193 = vrot.lane.b32.xlu1 %v8130_v55, %s7440_s6 }
 0x2b0   : > { %v1419_v6 = vrot.slane %v12398_v0, 2 }
 0x2b1   : > { %1838 = vrot.lane.b32.xlu0 %v8710_v53, %s7440_s6  ;;  %v8726_v25 = vpop.permute.xlu1 %1808 }
 0x2b2   : > { %12395 = vst [vmem:[#allocation154_spill] sm:$0xff] %v8726_v25 }
 0x2b3   : > { %1644 = vrot.lane.b32.xlu1 %v8136_v1, %s7436_s29 }
 0x2b5   : > { %1007 = vrot.lane.b32.xlu0 %v8179_v58, %s7436_s29  ;;  %v8732_v12 = vpop.permute.xlu1 %1806  ;;  %v8734_v46 = vpop.permute.xlu0 %979 }
 0x2b6   : > { %12396 = vst [vmem:[#allocation155_spill] sm:$0xff] %v8732_v12  ;;  %12397 = vst [vmem:[#allocation156_spill] sm:$0xff] %v8734_v46  ;;  %v8750_v12 = vsel %vm7691_vm11, %v1419_v6, %v12401_v52  ;;  %v12406_v6 = vrot.slane %v8105_v57, 7 }
 0x2b7   : > { %1836 = vrot.lane.b32.xlu1 %v8136_v1, %s7440_s6 }
 0x2b8   : > { %v1425_v18 = vrot.slane %v12406_v6, 2 }
 0x2b9   : > { %1199 = vrot.lane.b32.xlu0 %v8179_v58, %s7440_s6  ;;  %v8742_v48 = vpop.permute.xlu1 %1620  ;;  %v8744_v25 = vpop.permute.xlu0 %1171 }
 0x2ba   : > { %12399 = vst [vmem:[#allocation157_spill] sm:$0xff] %v8742_v48  ;;  %12400 = vst [vmem:[#allocation158_spill] sm:$0xff] %v8744_v25  ;;  %v12459_v25 = vrot.slane %v8267_v35, 7 }
 0x2bb   : > { %1005 = vrot.lane.b32.xlu1 %v8165_v37, %s7436_s29 }
 0x2bd   : > { %1650 = vrot.lane.b32.xlu0 %v8750_v12, %s7436_s29  ;;  %v8756_v1 = vpop.permute.xlu1 %1812  ;;  %v8758_v0 = vpop.permute.xlu0 %1626 }
 0x2be   : > { %12402 = vst [vmem:[#allocation159_spill] sm:$0xff] %v8756_v1  ;;  %12403 = vst [vmem:[#allocation160_spill] sm:$0xff] %v8758_v0 }
 0x2bf   : > { %1197 = vrot.lane.b32.xlu1 %v8165_v37, %s7440_s6  ;;  %v12605_v37 = vrot.slane %v8554_v39, 7 }
 0x2c1   : > { %1840 = vrot.lane.b32.xlu0 %v8213_v4, %s7440_s6  ;;  %v8764_v48 = vpop.permute.xlu1 %1624  ;;  %v8766_v52 = vpop.permute.xlu0 %1818 }
 0x2c2   : > { %12404 = vst [vmem:[#allocation161_spill] sm:$0xff] %v8764_v48  ;;  %12405 = vst [vmem:[#allocation162_spill] sm:$0xff] %v8766_v52  ;;  %v8782_v48 = vsel %vm7691_vm11, %v1425_v18, %v12409_v14  ;;  %v8794_v52 = vcombine.high %v8179_v58, %v8179_v58 }
 0x2c3   : > { %1648 = vrot.lane.b32.xlu1 %v8213_v4, %s7436_s29 }
 0x2c4   : > { %12412 = vst [vmem:[#allocation167_spill] sm:$0xff] %v8794_v52 }
 0x2c5   : > { %1842 = vrot.lane.b32.xlu0 %v8750_v12, %s7440_s6  ;;  %v8774_v0 = vpop.permute.xlu1 %1816  ;;  %v8776_v1 = vpop.permute.xlu0 %983 }
 0x2c6   : > { %12407 = vst [vmem:[#allocation163_spill] sm:$0xff] %v8774_v0  ;;  %12408 = vst [vmem:[#allocation164_spill] sm:$0xff] %v8776_v1 }
 0x2c7   : > { %1009 = vrot.lane.b32.xlu1 %v8113_v30, %s7436_s29 }
 0x2c9   : > { %1654 = vrot.lane.b32.xlu0 %v8782_v48, %s7436_s29  ;;  %v8788_v4 = vpop.permute.xlu1 %1814  ;;  %v8790_v6 = vpop.permute.xlu0 %1175 }
 0x2ca   : > { %12410 = vst [vmem:[#allocation165_spill] sm:$0xff] %v8788_v4  ;;  %12411 = vst [vmem:[#allocation166_spill] sm:$0xff] %v8790_v6  ;;  %v1432_v6 = vrot.slane %v8794_v52, 7 }
 0x2cb   : > { %1201 = vrot.lane.b32.xlu1 %v8113_v30, %s7440_s6 }
 0x2cd   : > { %1982 = vrot.lane.b32.xlu0 %v8794_v52, %s7436_s29  ;;  %v8800_v14 = vpop.permute.xlu1 %1980  ;;  %v8802_v18 = vpop.permute.xlu0 %1820 }
 0x2ce   : > { %12413 = vst [vmem:[#allocation168_spill] sm:$0xff] %v8800_v14  ;;  %12414 = vst [vmem:[#allocation169_spill] sm:$0xff] %v8802_v18 }
 0x2cf   : > { %1652 = vrot.lane.b32.xlu1 %v8337_v9, %s7436_s29 }
 0x2d1   : > { %1846 = vrot.lane.b32.xlu0 %v8782_v48, %s7440_s6  ;;  %v8808_v0 = vpop.permute.xlu1 %1992  ;;  %v8810_v4 = vpop.permute.xlu0 %987 }
 0x2d2   : > { %12415 = vst [vmem:[#allocation170_spill] sm:$0xff] %v8808_v0  ;;  %12416 = vst [vmem:[#allocation171_spill] sm:$0xff] %v8810_v4 }
 0x2d3   : > { %1844 = vrot.lane.b32.xlu1 %v8337_v9, %s7440_s6 }
 0x2d5   : > { %1994 = vrot.lane.b32.xlu0 %v8794_v52, %s7440_s6  ;;  %v8816_v30 = vpop.permute.xlu1 %977  ;;  %v8818_v14 = vpop.permute.xlu0 %1179 }
 0x2d6   : > { %12417 = vst [vmem:[#allocation172_spill] sm:$0xff] %v8816_v30  ;;  %12418 = vst [vmem:[#allocation173_spill] sm:$0xff] %v8818_v14  ;;  %v12423_v14 = vrot.slane %v8179_v58, 7  ;;  %v12616_v58 = vld [vmem:[#allocation116_spill] sm:$0xff] }
 0x2d7   : > { %1013 = vrot.lane.b32.xlu1 %v8154_v3, %s7436_s29 }
 0x2d8   : > { %v1431_v4 = vrot.slane %v12423_v14, 2 }
 0x2d9   : > { %1011 = vrot.lane.b32.xlu0 %v8175_v8, %s7436_s29  ;;  %v8824_v18 = vpop.permute.xlu1 %1169  ;;  %v8826_v0 = vpop.permute.xlu0 %1630 }
 0x2da   : > { %12419 = vst [vmem:[#allocation174_spill] sm:$0xff] %v8824_v18  ;;  %12420 = vst [vmem:[#allocation175_spill] sm:$0xff] %v8826_v0 }
 0x2db   : > { %1205 = vrot.lane.b32.xlu1 %v8154_v3, %s7440_s6 }
 0x2dd   : > { %1203 = vrot.lane.b32.xlu0 %v8175_v8, %s7440_s6  ;;  %v8832_v9 = vpop.permute.xlu1 %981  ;;  %v8834_v30 = vpop.permute.xlu0 %1822 }
 0x2de   : > { %12421 = vst [vmem:[#allocation176_spill] sm:$0xff] %v8832_v9  ;;  %12422 = vst [vmem:[#allocation177_spill] sm:$0xff] %v8834_v30  ;;  %v8849_v9 = vsel %vm7691_vm11, %v1431_v4, %v1432_v6  ;;  %v12430_v6 = vld [vmem:[#allocation83_spill] sm:$0xff] }
 0x2df   : > { %1656 = vrot.lane.b32.xlu1 %v8578_v20, %s7436_s29 }
 0x2e1   : > { %1848 = vrot.lane.b32.xlu0 %v8578_v20, %s7440_s6  ;;  %v8843_v0 = vpop.permute.xlu1 %1173  ;;  %v8845_v18 = vpop.permute.xlu0 %991 }
 0x2e2   : > { %12424 = vst [vmem:[#allocation178_spill] sm:$0xff] %v8843_v0  ;;  %12425 = vst [vmem:[#allocation179_spill] sm:$0xff] %v8845_v18 }
 0x2e3   : > { %1017 = vrot.lane.b32.xlu1 %v8223_v61, %s7436_s29 }
 0x2e5   : > { %1658 = vrot.lane.b32.xlu0 %v8849_v9, %s7436_s29  ;;  %v8855_v14 = vpop.permute.xlu1 %1628  ;;  %v8857_v30 = vpop.permute.xlu0 %1183 }
 0x2e6   : > { %12426 = vst [vmem:[#allocation180_spill] sm:$0xff] %v8855_v14  ;;  %12427 = vst [vmem:[#allocation181_spill] sm:$0xff] %v8857_v30 }
 0x2e7   : > { %1209 = vrot.lane.b32.xlu1 %v8223_v61, %s7440_s6 }
 0x2e9   : > { %1850 = vrot.lane.b32.xlu0 %v8849_v9, %s7440_s6  ;;  %v8863_v20 = vpop.permute.xlu1 %985  ;;  %v8865_v4 = vpop.permute.xlu0 %1634 }
 0x2ea   : > { %12428 = vst [vmem:[#allocation182_spill] sm:$0xff] %v8863_v20  ;;  %12429 = vst [vmem:[#allocation183_spill] sm:$0xff] %v8865_v4 }
 0x2eb   : > { %1660 = vrot.lane.b32.xlu1 %v8279_v33, %s7436_s29 }
 0x2ed   : > { %1015 = vrot.lane.b32.xlu0 %v12430_v6, %s7436_s29  ;;  %v8871_v18 = vpop.permute.xlu1 %1177  ;;  %v8873_v14 = vpop.permute.xlu0 %1824 }
 0x2ee   : > { %12431 = vst [vmem:[#allocation83_spill] sm:$0xff] %v8871_v18  ;;  %12432 = vst [vmem:[#allocation184_spill] sm:$0xff] %v8873_v14  ;;  %v12437_v14 = vld [vmem:[#allocation96_spill] sm:$0xff] }
 0x2ef   : > { %1021 = vrot.lane.b32.xlu1 %v8267_v35, %s7436_s29 }
 0x2f1   : > { %1207 = vrot.lane.b32.xlu0 %v12430_v6, %s7440_s6  ;;  %v8879_v30 = vpop.permute.xlu1 %989  ;;  %v8881_v20 = vpop.permute.xlu0 %995 }
 0x2f2   : > { %12433 = vst [vmem:[#allocation185_spill] sm:$0xff] %v8879_v30  ;;  %12434 = vst [vmem:[#allocation186_spill] sm:$0xff] %v8881_v20  ;;  %v12440_v20 = vrot.slane %v8175_v8, 7 }
 0x2f3   : > { %1213 = vrot.lane.b32.xlu1 %v8267_v35, %s7440_s6 }
 0x2f4   : > { %v1438_v1 = vrot.slane %v12440_v20, 2 }
 0x2f5   : > { %1852 = vrot.lane.b32.xlu0 %v8279_v33, %s7440_s6  ;;  %v8887_v4 = vpop.permute.xlu1 %1181  ;;  %v8889_v18 = vpop.permute.xlu0 %1187 }
 0x2f6   : > { %12435 = vst [vmem:[#allocation187_spill] sm:$0xff] %v8887_v4  ;;  %12436 = vst [vmem:[#allocation188_spill] sm:$0xff] %v8889_v18  ;;  %v12443_v4 = vrot.slane %v8154_v3, 7 }
 0x2f7   : > { %1664 = vrot.lane.b32.xlu1 %v12437_v14, %s7436_s29 }
 0x2f9   : > { %1019 = vrot.lane.b32.xlu0 %v8308_v42, %s7436_s29  ;;  %v8895_v0 = vpop.permute.xlu1 %1632  ;;  %v8897_v30 = vpop.permute.xlu0 %1638 }
 0x2fa   : > { %12438 = vst [vmem:[#allocation96_spill] sm:$0xff] %v8895_v0  ;;  %12439 = vst [vmem:[#allocation189_spill] sm:$0xff] %v8897_v30  ;;  %v8913_v0 = vsel %vm7691_vm11, %v1438_v1, %v12443_v4  ;;  %v12448_v4 = vrot.slane %v12430_v6, 7  ;;  %v12451_v30 = vrot.slane %v8223_v61, 7 }
 0x2fb   : > { %1856 = vrot.lane.b32.xlu1 %v12437_v14, %s7440_s6 }
 0x2fd   : > { %1211 = vrot.lane.b32.xlu0 %v8308_v42, %s7440_s6  ;;  %v8905_v33 = vpop.permute.xlu1 %1826  ;;  %v8907_v18 = vpop.permute.xlu0 %1830 }
 0x2fe   : > { %12441 = vst [vmem:[#allocation190_spill] sm:$0xff] %v8905_v33  ;;  %12442 = vst [vmem:[#allocation191_spill] sm:$0xff] %v8907_v18  ;;  %v1444_v33 = vrot.slane %v12448_v4, 2 }
 0x2ff   : > { %1854 = vrot.lane.b32.xlu1 %v8913_v0, %s7440_s6 }
 0x301   : > { %1662 = vrot.lane.b32.xlu0 %v8913_v0, %s7436_s29  ;;  %v8919_v14 = vpop.permute.xlu1 %993  ;;  %v8921_v20 = vpop.permute.xlu0 %999 }
 0x302   : > { %12444 = vst [vmem:[#allocation192_spill] sm:$0xff] %v8919_v14  ;;  %12445 = vst [vmem:[#allocation193_spill] sm:$0xff] %v8921_v20 }
 0x303   : > { %1025 = vrot.lane.b32.xlu1 %v8298_v45, %s7436_s29 }
 0x305   : > { %1023 = vrot.lane.b32.xlu0 %v8351_v32, %s7436_s29  ;;  %v8927_v18 = vpop.permute.xlu1 %1185  ;;  %v8929_v1 = vpop.permute.xlu0 %1191 }
 0x306   : > { %12446 = vst [vmem:[#allocation194_spill] sm:$0xff] %v8927_v18  ;;  %12447 = vst [vmem:[#allocation195_spill] sm:$0xff] %v8929_v1  ;;  %v8945_v18 = vsel %vm7691_vm11, %v1444_v33, %v12451_v30  ;;  %v12456_v33 = vrot.slane %v8308_v42, 7 }
 0x307   : > { %1217 = vrot.lane.b32.xlu1 %v8298_v45, %s7440_s6 }
 0x309   : > { %1215 = vrot.lane.b32.xlu0 %v8351_v32, %s7440_s6  ;;  %v8937_v20 = vpop.permute.xlu1 %1636 }
 0x30a   : > { %12449 = vst [vmem:[#allocation196_spill] sm:$0xff] %v8937_v20  ;;  %v1450_v20 = vrot.slane %v12456_v33, 2 }
 0x30b   : > { %v8939_v14 = vpop.permute.xlu0 %1642  ;;  %1668 = vrot.lane.b32.xlu1 %v8412_v43, %s7436_s29 }
 0x30c   : > { %12450 = vst [vmem:[#allocation197_spill] sm:$0xff] %v8939_v14 }
 0x30d   : > { %1666 = vrot.lane.b32.xlu0 %v8945_v18, %s7436_s29  ;;  %v8951_v4 = vpop.permute.xlu1 %1828 }
 0x30e   : > { %12452 = vst [vmem:[#allocation198_spill] sm:$0xff] %v8951_v4 }
 0x30f   : > { %v8953_v1 = vpop.permute.xlu0 %1832  ;;  %1858 = vrot.lane.b32.xlu1 %v8945_v18, %s7440_s6 }
 0x310   : > { %12453 = vst [vmem:[#allocation199_spill] sm:$0xff] %v8953_v1 }
 0x311   : > { %1027 = vrot.lane.b32.xlu0 %v8387_v19, %s7436_s29  ;;  %v8959_v14 = vpop.permute.xlu1 %997 }
 0x312   : > { %12454 = vst [vmem:[#allocation200_spill] sm:$0xff] %v8959_v14  ;;  %v8977_v14 = vsel %vm7691_vm11, %v1450_v20, %v12459_v25  ;;  %v12464_v20 = vrot.slane %v8351_v32, 7 }
 0x313   : > { %v8961_v30 = vpop.permute.xlu0 %1834  ;;  %1860 = vrot.lane.b32.xlu1 %v8412_v43, %s7440_s6 }
 0x314   : > { %12455 = vst [vmem:[#allocation201_spill] sm:$0xff] %v8961_v30  ;;  %v12467_v30 = vrot.slane %v8298_v45, 7  ;;  %v12566_v45 = vld [vmem:[#allocation12_spill] sm:$0xff] }
 0x315   : > { %1219 = vrot.lane.b32.xlu0 %v8387_v19, %s7440_s6  ;;  %v8969_v1 = vpop.permute.xlu1 %1189 }
 0x316   : > { %12457 = vst [vmem:[#allocation202_spill] sm:$0xff] %v8969_v1  ;;  %v1456_v1 = vrot.slane %v12464_v20, 2 }
 0x317   : > { %v8971_v4 = vpop.permute.xlu0 %1003  ;;  %1029 = vrot.lane.b32.xlu1 %v8347_v24, %s7436_s29 }
 0x318   : > { %12458 = vst [vmem:[#allocation203_spill] sm:$0xff] %v8971_v4 }
 0x319   : > { %1670 = vrot.lane.b32.xlu0 %v8977_v14, %s7436_s29  ;;  %v8983_v43 = vpop.permute.xlu1 %1640 }
 0x31a   : > { %12460 = vst [vmem:[#allocation204_spill] sm:$0xff] %v8983_v43 }
 0x31b   : > { %v8985_v33 = vpop.permute.xlu0 %1195  ;;  %1221 = vrot.lane.b32.xlu1 %v8347_v24, %s7440_s6 }
 0x31c   : > { %12461 = vst [vmem:[#allocation205_spill] sm:$0xff] %v8985_v33 }
 0x31d   : > { %1031 = vrot.lane.b32.xlu0 %v8422_v21, %s7436_s29  ;;  %v8991_v4 = vpop.permute.xlu1 %1001 }
 0x31e   : > { %12462 = vst [vmem:[#allocation206_spill] sm:$0xff] %v8991_v4  ;;  %v9009_v4 = vsel %vm7691_vm11, %v1456_v1, %v12467_v30 }
 0x31f   : > { %v8993_v25 = vpop.permute.xlu0 %1646  ;;  %1672 = vrot.lane.b32.xlu1 %v8448_v40, %s7436_s29 }
 0x320   : > { %12463 = vst [vmem:[#allocation207_spill] sm:$0xff] %v8993_v25 }
 0x321   : > { %1223 = vrot.lane.b32.xlu0 %v8422_v21, %s7440_s6  ;;  %v9001_v33 = vpop.permute.xlu1 %1193 }
 0x322   : > { %12465 = vst [vmem:[#allocation208_spill] sm:$0xff] %v9001_v33  ;;  %v12477_v33 = vrot.slane %v8347_v24, 7 }
 0x323   : > { %v9003_v43 = vpop.permute.xlu0 %1838  ;;  %1864 = vrot.lane.b32.xlu1 %v8448_v40, %s7440_s6 }
 0x324   : > { %12466 = vst [vmem:[#allocation209_spill] sm:$0xff] %v9003_v43 }
 0x325   : > { %1674 = vrot.lane.b32.xlu0 %v9009_v4, %s7436_s29  ;;  %v9015_v20 = vpop.permute.xlu1 %1644 }
 0x326   : > { %12468 = vst [vmem:[#allocation210_spill] sm:$0xff] %v9015_v20 }
 0x327   : > { %v9017_v25 = vpop.permute.xlu0 %1007  ;;  %1862 = vrot.lane.b32.xlu1 %v8977_v14, %s7440_s6 }
 0x328   : > { %12469 = vst [vmem:[#allocation211_spill] sm:$0xff] %v9017_v25  ;;  %v12474_v25 = vrot.slane %v8387_v19, 7  ;;  %v12640_v19 = vld [vmem:[#allocation80_spill] sm:$0xff] }
 0x329   : > { %1866 = vrot.lane.b32.xlu0 %v9009_v4, %s7440_s6  ;;  %v9023_v43 = vpop.permute.xlu1 %1836 }
 0x32a   : > { %12470 = vst [vmem:[#allocation212_spill] sm:$0xff] %v9023_v43  ;;  %v1462_v20 = vrot.slane %v12474_v25, 2 }
 0x32b   : > { %v9025_v1 = vpop.permute.xlu0 %1199  ;;  %1033 = vrot.lane.b32.xlu1 %v8372_v38, %s7436_s29 }
 0x32c   : > { %12471 = vst [vmem:[#allocation213_spill] sm:$0xff] %v9025_v1 }
 0x32d   : > { %1035 = vrot.lane.b32.xlu0 %v8452_v26, %s7436_s29  ;;  %v9031_v40 = vpop.permute.xlu1 %1005 }
 0x32e   : > { %12472 = vst [vmem:[#allocation214_spill] sm:$0xff] %v9031_v40  ;;  %v9049_v40 = vsel %vm7691_vm11, %v1462_v20, %v12477_v33  ;;  %v12484_v20 = vrot.slane %v8422_v21, 7  ;;  %v12606_v21 = vld [vmem:[#allocation105_spill] sm:$0xff] }
 0x32f   : > { %v9033_v30 = vpop.permute.xlu0 %1650  ;;  %1225 = vrot.lane.b32.xlu1 %v8372_v38, %s7440_s6  ;;  %12478 = vst [vmem:[#allocation218_spill] sm:$0xff] %v9049_v40 }
 0x330   : > { %12473 = vst [vmem:[#allocation215_spill] sm:$0xff] %v9033_v30  ;;  %v12479_v30 = vld [vmem:[#allocation120_spill] sm:$0xff] }
 0x331   : > { %1227 = vrot.lane.b32.xlu0 %v8452_v26, %s7440_s6  ;;  %v9041_v1 = vpop.permute.xlu1 %1197 }
 0x332   : > { %12475 = vst [vmem:[#allocation216_spill] sm:$0xff] %v9041_v1  ;;  %v1468_v1 = vrot.slane %v12484_v20, 2 }
 0x333   : > { %v9043_v43 = vpop.permute.xlu0 %1840  ;;  %1676 = vrot.lane.b32.xlu1 %v12479_v30, %s7436_s29 }
 0x334   : > { %12476 = vst [vmem:[#allocation217_spill] sm:$0xff] %v9043_v43 }
 0x335   : > { %1678 = vrot.lane.b32.xlu0 %v9049_v40, %s7436_s29  ;;  %v9055_v25 = vpop.permute.xlu1 %1648 }
 0x336   : > { %12480 = vst [vmem:[#allocation120_spill] sm:$0xff] %v9055_v25 }
 0x337   : > { %v9057_v46 = vpop.permute.xlu0 %1842  ;;  %1868 = vrot.lane.b32.xlu1 %v12479_v30, %s7440_s6  ;;  %v12487_v30 = vrot.slane %v8372_v38, 7 }
 0x338   : > { %12481 = vst [vmem:[#allocation219_spill] sm:$0xff] %v9057_v46 }
 0x339   : > { %1039 = vrot.lane.b32.xlu0 %v8502_v49, %s7436_s29  ;;  %v9063_v43 = vpop.permute.xlu1 %1009 }
 0x33a   : > { %12482 = vst [vmem:[#allocation220_spill] sm:$0xff] %v9063_v43  ;;  %v9081_v43 = vsel %vm7691_vm11, %v1468_v1, %v12487_v30  ;;  %v12493_v30 = vld [vmem:[#allocation69_spill] sm:$0xff] }
 0x33b   : > { %v9065_v33 = vpop.permute.xlu0 %1654  ;;  %1037 = vrot.lane.b32.xlu1 %v8442_v59, %s7436_s29  ;;  %12488 = vst [vmem:[#allocation224_spill] sm:$0xff] %v9081_v43 }
 0x33c   : > { %12483 = vst [vmem:[#allocation221_spill] sm:$0xff] %v9065_v33 }
 0x33d   : > { %1231 = vrot.lane.b32.xlu0 %v8502_v49, %s7440_s6  ;;  %v9073_v46 = vpop.permute.xlu1 %1201 }
 0x33e   : > { %12485 = vst [vmem:[#allocation222_spill] sm:$0xff] %v9073_v46 }
 0x33f   : > { %v9075_v25 = vpop.permute.xlu0 %1982  ;;  %1229 = vrot.lane.b32.xlu1 %v8442_v59, %s7440_s6 }
 0x340   : > { %12486 = vst [vmem:[#allocation223_spill] sm:$0xff] %v9075_v25 }
 0x341   : > { %1682 = vrot.lane.b32.xlu0 %v9081_v43, %s7436_s29  ;;  %v9087_v20 = vpop.permute.xlu1 %1652 }
 0x342   : > { %12489 = vst [vmem:[#allocation225_spill] sm:$0xff] %v9087_v20 }
 0x343   : > { %v9089_v33 = vpop.permute.xlu0 %1846  ;;  %1680 = vrot.lane.b32.xlu1 %v8548_v36, %s7436_s29 }
 0x344   : > { %12490 = vst [vmem:[#allocation226_spill] sm:$0xff] %v9089_v33  ;;  %v12496_v33 = vrot.slane %v8452_v26, 7 }
 0x345   : > { %1874 = vrot.lane.b32.xlu0 %v9081_v43, %s7440_s6  ;;  %v9095_v25 = vpop.permute.xlu1 %1844  ;;  %v12568_v43 = vld [vmem:[#allocation24_spill] sm:$0xff] }
 0x346   : > { %12491 = vst [vmem:[#allocation227_spill] sm:$0xff] %v9095_v25  ;;  %v1474_v10 = vrot.slane %v12496_v33, 2 }
 0x347   : > { %v9097_v1 = vpop.permute.xlu0 %1994  ;;  %1872 = vrot.lane.b32.xlu1 %v8548_v36, %s7440_s6  ;;  %v12499_v36 = vrot.slane %v8442_v59, 7  ;;  %v12563_v59 = vld [vmem:[#allocation106_spill] sm:$0xff] }
 0x348   : > { %12492 = vst [vmem:[#allocation228_spill] sm:$0xff] %v9097_v1 }
 0x349   : > { %1043 = vrot.lane.b32.xlu0 %v12493_v30, %s7436_s29  ;;  %v9103_v46 = vpop.permute.xlu1 %1013 }
 0x34a   : > { %12494 = vst [vmem:[#allocation69_spill] sm:$0xff] %v9103_v46  ;;  %v9121_v46 = vsel %vm7691_vm11, %v1474_v10, %v12499_v36  ;;  %v12507_v36 = vrot.slane %v8502_v49, 7 }
 0x34b   : > { %v9105_v20 = vpop.permute.xlu0 %1011  ;;  %1870 = vrot.lane.b32.xlu1 %v9049_v40, %s7440_s6  ;;  %12500 = vst [vmem:[#allocation232_spill] sm:$0xff] %v9121_v46 }
 0x34c   : > { %12495 = vst [vmem:[#allocation229_spill] sm:$0xff] %v9105_v20  ;;  %v12501_v20 = vld [vmem:[#allocation77_spill] sm:$0xff]  ;;  %v1480_v3 = vrot.slane %v12507_v36, 2 }
 0x34d   : > { %1235 = vrot.lane.b32.xlu0 %v12493_v30, %s7440_s6  ;;  %v9113_v1 = vpop.permute.xlu1 %1205 }
 0x34e   : > { %12497 = vst [vmem:[#allocation230_spill] sm:$0xff] %v9113_v1  ;;  %v12504_v1 = vld [vmem:[#allocation84_spill] sm:$0xff] }
 0x34f   : > { %v9115_v25 = vpop.permute.xlu0 %1203  ;;  %1984 = vrot.lane.b32.xlu1 %v12501_v20, %s7436_s29 }
 0x350   : > { %12498 = vst [vmem:[#allocation231_spill] sm:$0xff] %v9115_v25 }
 0x351   : > { %1686 = vrot.lane.b32.xlu0 %v9121_v46, %s7436_s29  ;;  %v9127_v33 = vpop.permute.xlu1 %1656 }
 0x352   : > { %12502 = vst [vmem:[#allocation233_spill] sm:$0xff] %v9127_v33 }
 0x353   : > { %v9129_v29 = vpop.permute.xlu0 %1848  ;;  %1996 = vrot.lane.b32.xlu1 %v12501_v20, %s7440_s6 }
 0x354   : > { %12503 = vst [vmem:[#allocation234_spill] sm:$0xff] %v9129_v29  ;;  %v1481_v29 = vrot.slane %v12501_v20, 7 }
 0x355   : > { %1047 = vrot.lane.b32.xlu0 %v12504_v1, %s7436_s29  ;;  %v9135_v25 = vpop.permute.xlu1 %1017 }
 0x356   : > { %12505 = vst [vmem:[#allocation84_spill] sm:$0xff] %v9135_v25  ;;  %v9152_v25 = vsel %vm7691_vm11, %v1480_v3, %v1481_v29 }
 0x357   : > { %v9137_v10 = vpop.permute.xlu0 %1658  ;;  %1684 = vrot.lane.b32.xlu1 %v8584_v56, %s7436_s29  ;;  %12510 = vst [vmem:[#allocation238_spill] sm:$0xff] %v9152_v25 }
 0x358   : > { %12506 = vst [vmem:[#allocation235_spill] sm:$0xff] %v9137_v10 }
 0x359   : > { %1239 = vrot.lane.b32.xlu0 %v12504_v1, %s7440_s6  ;;  %v9146_v33 = vpop.permute.xlu1 %1209 }
 0x35a   : > { %12508 = vst [vmem:[#allocation236_spill] sm:$0xff] %v9146_v33  ;;  %v12514_v33 = vld [vmem:[#allocation93_spill] sm:$0xff] }
 0x35b   : > { %v9148_v44 = vpop.permute.xlu0 %1850  ;;  %1876 = vrot.lane.b32.xlu1 %v8584_v56, %s7440_s6 }
 0x35c   : > { %12509 = vst [vmem:[#allocation237_spill] sm:$0xff] %v9148_v44 }
 0x35d   : > { %1690 = vrot.lane.b32.xlu0 %v9152_v25, %s7436_s29  ;;  %v9158_v36 = vpop.permute.xlu1 %1660 }
 0x35e   : > { %12511 = vst [vmem:[#allocation239_spill] sm:$0xff] %v9158_v36  ;;  %v12519_v36 = vld [vmem:[#allocation89_spill] sm:$0xff] }
 0x35f   : > { %v9160_v10 = vpop.permute.xlu0 %1015  ;;  %1041 = vrot.lane.b32.xlu1 %v12513_v22, %s7436_s29 }
 0x360   : > { %12512 = vst [vmem:[#allocation240_spill] sm:$0xff] %v9160_v10 }
 0x361   : > { %1884 = vrot.lane.b32.xlu0 %v12514_v33, %s7440_s6  ;;  %v9166_v44 = vpop.permute.xlu1 %1021 }
 0x362   : > { %12515 = vst [vmem:[#allocation87_spill] sm:$0xff] %v9166_v44 }
 0x363   : > { %v9168_v3 = vpop.permute.xlu0 %1207  ;;  %1233 = vrot.lane.b32.xlu1 %v12513_v22, %s7440_s6 }
 0x364   : > { %12516 = vst [vmem:[#allocation93_spill] sm:$0xff] %v9168_v3  ;;  %v12522_v3 = vrot.slane %v12493_v30, 7 }
 0x365   : > { %1882 = vrot.lane.b32.xlu0 %v9152_v25, %s7440_s6  ;;  %v9174_v56 = vpop.permute.xlu1 %1213 }
 0x366   : > { %12517 = vst [vmem:[#allocation241_spill] sm:$0xff] %v9174_v56  ;;  %v1487_v22 = vrot.slane %v12522_v3, 2 }
 0x367   : > { %v9176_v29 = vpop.permute.xlu0 %1852  ;;  %1688 = vrot.lane.b32.xlu1 %v8642_v11, %s7436_s29 }
 0x368   : > { %12518 = vst [vmem:[#allocation242_spill] sm:$0xff] %v9176_v29 }
 0x369   : > { %1051 = vrot.lane.b32.xlu0 %v12519_v36, %s7436_s29  ;;  %v9182_v10 = vpop.permute.xlu1 %1664 }
 0x36a   : > { %12520 = vst [vmem:[#allocation89_spill] sm:$0xff] %v9182_v10  ;;  %v9200_v10 = vsel %vm7691_vm11, %v1487_v22, %v12526_v31  ;;  %v12531_v22 = vld [vmem:[#allocation92_spill] sm:$0xff] }
 0x36b   : > { %v9184_v44 = vpop.permute.xlu0 %1019  ;;  %1880 = vrot.lane.b32.xlu1 %v8642_v11, %s7440_s6  ;;  %v2175_v57 = vcombine.low %v8913_v0, %v9200_v10 }
 0x36c   : > { %12521 = vst [vmem:[#allocation243_spill] sm:$0xff] %v9184_v44 }
 0x36d   : > { %1243 = vrot.lane.b32.xlu0 %v12519_v36, %s7440_s6  ;;  %v9192_v56 = vpop.permute.xlu1 %1856 }
 0x36e   : > { %12523 = vst [vmem:[#allocation244_spill] sm:$0xff] %v9192_v56 }
 0x36f   : > { %v9194_v29 = vpop.permute.xlu0 %1211  ;;  %1878 = vrot.lane.b32.xlu1 %v9121_v46, %s7440_s6 }
 0x370   : > { %12524 = vst [vmem:[#allocation245_spill] sm:$0xff] %v9194_v29 }
 0x371   : > { %1694 = vrot.lane.b32.xlu0 %v9200_v10, %s7436_s29  ;;  %v9206_v11 = vpop.permute.xlu1 %1854 }
 0x372   : > { %12527 = vst [vmem:[#allocation246_spill] sm:$0xff] %v9206_v11 }
 0x373   : > { %v9208_v3 = vpop.permute.xlu0 %1662  ;;  %1045 = vrot.lane.b32.xlu1 %v12525_v16, %s7436_s29 }
 0x374   : > { %12528 = vst [vmem:[#allocation247_spill] sm:$0xff] %v9208_v3  ;;  %v12534_v3 = vrot.slane %v12504_v1, 7 }
 0x375   : > { %1886 = vrot.lane.b32.xlu0 %v9200_v10, %s7440_s6  ;;  %v9214_v56 = vpop.permute.xlu1 %1025  ;;  %v12589_v10 = vrot.slane %v8399_v28, 7 }
 0x376   : > { %12529 = vst [vmem:[#allocation248_spill] sm:$0xff] %v9214_v56  ;;  %v1493_v44 = vrot.slane %v12534_v3, 2  ;;  %v12540_v3 = vld [vmem:[#allocation6_spill] sm:$0xff] }
 0x377   : > { %v9216_v31 = vpop.permute.xlu0 %1023  ;;  %1237 = vrot.lane.b32.xlu1 %v12525_v16, %s7440_s6  ;;  %v12537_v16 = vld [vmem:[#allocation91_spill] sm:$0xff] }
 0x378   : > { %12530 = vst [vmem:[#allocation249_spill] sm:$0xff] %v9216_v31  ;;  %v12538_v20 = vrot.slane %v12537_v16, 7 }
 0x379   : > { %1055 = vrot.lane.b32.xlu0 %v12531_v22, %s7436_s29  ;;  %v9222_v29 = vpop.permute.xlu1 %1217 }
 0x37a   : > { %12532 = vst [vmem:[#allocation92_spill] sm:$0xff] %v9222_v29  ;;  %v9240_v29 = vsel %vm7691_vm11, %v1493_v44, %v12538_v20  ;;  %v12545_v44 = vld [vmem:[#allocation97_spill] sm:$0xff]  ;;  %v12546_v20 = vld [vmem:[#allocation72_spill] sm:$0xff] }
 0x37b   : > { %v9224_v11 = vpop.permute.xlu0 %1215  ;;  %1692 = vrot.lane.b32.xlu1 %v12514_v33, %s7436_s29  ;;  %v12539_v33 = vld [vmem:[#allocation30_spill] sm:$0xff]  ;;  %v2382_v50 = vcombine.low %v12547_v7, %v12546_v20  ;;  %v12567_v20 = vld [vmem:[#allocation20_spill] sm:$0xff]  ;;  %v3030_v7 = vcombine.low %v12568_v43, %v8710_v53  ;;  %v12576_v43 = vld [vmem:[#allocation27_spill] sm:$0xff] }
 0x37c   : > { %12533 = vst [vmem:[#allocation250_spill] sm:$0xff] %v9224_v11  ;;  %v2112_v11 = vcombine.low %v12540_v3, %v12539_v33  ;;  %v2814_v17 = vcombine.low %v12567_v20, %v8656_v60  ;;  %v12573_v3 = vrot.slane %v12519_v36, 7  ;;  %v1529_v20 = vrot.slane %v12605_v37, 2  ;;  %v12612_v37 = vld [vmem:[#allocation101_spill] sm:$0xff] }
 0x37d   : > { %1247 = vrot.lane.b32.xlu0 %v12531_v22, %s7440_s6  ;;  %v9232_v56 = vpop.permute.xlu1 %1668 }
 0x37e   : > { %12535 = vst [vmem:[#allocation251_spill] sm:$0xff] %v9232_v56  ;;  %v9265_v33 = vrot.slane %v2112_v11, %v8091_v13  ;;  %v12560_v11 = vld [vmem:[#allocation78_spill] sm:$0xff]  ;;  %v1499_v47 = vrot.slane %v12573_v3, 2 }
 0x37f   : > { %v9234_v31 = vpop.permute.xlu0 %1666  ;;  %1049 = vrot.lane.b32.xlu1 %v12537_v16, %s7436_s29 }
 0x380   : > { %12536 = vst [vmem:[#allocation252_spill] sm:$0xff] %v9234_v31  ;;  %v12543_v31 = vld [vmem:[#allocation60_spill] sm:$0xff]  ;;  %12550 = vst [vmem:[#allocation11_spill] sm:$0xff] %v9265_v33  ;;  %v12561_v33 = vld [vmem:[#allocation18_spill] sm:$0xff] }
 0x381   : > { %1698 = vrot.lane.b32.xlu0 %v9240_v29, %s7436_s29  ;;  %v9248_v62 = vpop.permute.xlu1 %1858  ;;  %v2166_v25 = vcombine.low %v12544_v41, %v12543_v31  ;;  %v2598_v40 = vcombine.low %v12561_v33, %v12560_v11  ;;  %v12565_v31 = vld [vmem:[#allocation41_spill] sm:$0xff]  ;;  %v9295_v33 = vrot.slane %v2382_v50, %v8091_v13  ;;  %v9334_v50 = vrot.slane %v3030_v7, %v8091_v13 }
 0x382   : > { %12541 = vst [vmem:[#allocation91_spill] sm:$0xff] %v9248_v62  ;;  %v12587_v7 = vrot.slane %v12563_v59, 7 }
 0x383   : > { %v9250_v56 = vpop.permute.xlu0 %1027  ;;  %1241 = vrot.lane.b32.xlu1 %v12537_v16, %s7440_s6  ;;  %v9272_v38 = vrot.slane %v2166_v25, %v8091_v13  ;;  %v3462_v25 = vcombine.low %v12576_v43, %v8782_v48  ;;  %v12580_v48 = vrot.slane %v12531_v22, 7  ;;  %12582 = vst [vmem:[#allocation15_spill] sm:$0xff] %v9334_v50  ;;  %v12637_v50 = vld [vmem:[#allocation134_spill] sm:$0xff] }
 0x384   : > { %12542 = vst [vmem:[#allocation30_spill] sm:$0xff] %v9250_v56  ;;  %v12562_v56 = vld [vmem:[#allocation98_spill] sm:$0xff]  ;;  %v1511_v23 = vrot.slane %v12587_v7, 2  ;;  %v12596_v7 = vrot.slane %v8475_v15, 7 }
 0x385   : > { %1888 = vrot.lane.b32.xlu0 %v12545_v44, %s7440_s6  ;;  %v9260_v51 = vpop.permute.xlu1 %1860  ;;  %v1505_v43 = vrot.slane %v12580_v48, 2 }
 0x386   : > { %12548 = vst [vmem:[#allocation6_spill] sm:$0xff] %v9260_v51  ;;  %v12577_v51 = vld [vmem:[#allocation40_spill] sm:$0xff] }
 0x387   : > { %v9262_v46 = vpop.permute.xlu0 %1219  ;;  %1053 = vrot.lane.b32.xlu1 %v12562_v56, %s7436_s29  ;;  %v3678_v5 = vcombine.low %v12577_v51, %v8849_v9  ;;  %v12586_v9 = vrot.slane %v12562_v56, 7 }
 0x388   : > { %12549 = vst [vmem:[#allocation60_spill] sm:$0xff] %v9262_v46  ;;  %v12570_v46 = vld [vmem:[#allocation26_spill] sm:$0xff] }
 0x389   : > { %1059 = vrot.lane.b32.xlu0 %v12563_v59, %s7436_s29  ;;  %v3246_v62 = vcombine.low %v12570_v46, %v8750_v12  ;;  %v9301_v24 = vpop.permute.xlu1 %1029  ;;  %v9316_v46 = vrot.slane %v2598_v40, %v8091_v13  ;;  %v12578_v12 = vld [vmem:[#allocation17_spill] sm:$0xff]  ;;  %v9331_v40 = vrot.slane %v2814_v17, %v8091_v13  ;;  %v1501_v17 = vsel %vm7691_vm11, %v1499_v47, %v12586_v9 }
 0x38a   : > { %12571 = vst [vmem:[#allocation97_spill] sm:$0xff] %v9301_v24  ;;  %v9359_v0 = vrot.slane %v3678_v5, %v8091_v13  ;;  %v2391_v47 = vcombine.low %v8945_v18, %v9240_v29  ;;  %v9400_v18 = vcombine.high %v8554_v39, %v8554_v39  ;;  %v12617_v39 = vld [vmem:[#allocation79_spill] sm:$0xff] }
 0x38b   : > { %v9303_v41 = vpop.permute.xlu0 %1670  ;;  %1245 = vrot.lane.b32.xlu1 %v12562_v56, %s7440_s6  ;;  %v9339_v24 = vrot.slane %v3246_v62, %v8091_v13 }
 0x38c   : > { %12572 = vst [vmem:[#allocation72_spill] sm:$0xff] %v9303_v41  ;;  %v9354_v41 = vrot.slane %v3462_v25, %v8091_v13  ;;  %v12590_v25 = vld [vmem:[#allocation102_spill] sm:$0xff] }
 0x38d   : > { %1251 = vrot.lane.b32.xlu0 %v12563_v59, %s7440_s6  ;;  %v9343_v53 = vpop.permute.xlu1 %1221  ;;  %v12591_v9 = vrot.slane %v12590_v25, 7 }
 0x38e   : > { %12584 = vst [vmem:[#allocation7_spill] sm:$0xff] %v9343_v53  ;;  %v2121_v53 = vcombine.low %v8175_v8, %v12493_v30  ;;  %v2607_v30 = vcombine.low %v8977_v14, %v1501_v17  ;;  %v9419_v14 = vrot.slane %v2391_v47, %v8091_v13  ;;  %v12601_v47 = vld [vmem:[#allocation218_spill] sm:$0xff] }
 0x38f   : > { %v9345_v48 = vpop.permute.xlu0 %1031  ;;  %1696 = vrot.lane.b32.xlu1 %v12545_v44, %s7436_s29  ;;  %v9374_v5 = vsel %vm7691_vm11, %v1505_v43, %v12591_v9  ;;  %v12594_v9 = vrot.slane %v8436_v34, 7 }
 0x390   : > { %12585 = vst [vmem:[#allocation78_spill] sm:$0xff] %v9345_v48  ;;  %v1517_v48 = vrot.slane %v12589_v10, 2  ;;  %v9386_v10 = vrot.slane %v2175_v57, %v8091_v13  ;;  %v2823_v44 = vcombine.low %v9009_v4, %v9374_v5  ;;  %v12598_v4 = vrot.slane %v8459_v63, 7 }
 0x391   : > { %1702 = vrot.lane.b32.xlu0 %v1501_v17, %s7436_s29  ;;  %v9388_v60 = vpop.permute.xlu1 %1672  ;;  %v9396_v8 = vsel %vm7691_vm11, %v1511_v23, %v12594_v9  ;;  %v9431_v26 = vrot.slane %v2607_v30, %v8091_v13  ;;  %v1530_v23 = vrot.slane %v9400_v18, 7  ;;  %v2128_v11 = vrot.slane %v2121_v53, %v8091_v13  ;;  %v12641_v53 = vld [vmem:[#allocation71_spill] sm:$0xff] }
 0x392   : > { %12592 = vst [vmem:[#allocation18_spill] sm:$0xff] %v9388_v60  ;;  %12595 = vst [vmem:[#allocation41_spill] sm:$0xff] %v9396_v8  ;;  %v9412_v60 = vsel %vm7691_vm11, %v1517_v48, %v12596_v7  ;;  %v1523_v57 = vrot.slane %v12598_v4, 2  ;;  %v12600_v48 = vld [vmem:[#allocation66_spill] sm:$0xff]  ;;  %v3039_v9 = vcombine.low %v12601_v47, %v9396_v8  ;;  %v12604_v4 = vld [vmem:[#allocation224_spill] sm:$0xff]  ;;  %v6833_v30 = vcombine.high %v9272_v38, %v9386_v10 }
 0x393   : > { %v9390_v43 = vpop.permute.xlu0 %1223  ;;  %12597 = vst [vmem:[#allocation12_spill] sm:$0xff] %v9412_v60  ;;  %1890 = vrot.lane.b32.xlu1 %v9240_v29, %s7440_s6  ;;  %v4006_v29 = vcombine.low %v9272_v38, %v9386_v10  ;;  %v3255_v62 = vcombine.low %v12604_v4, %v9412_v60  ;;  %v12607_v47 = vld [vmem:[#allocation73_spill] sm:$0xff]  ;;  %v12609_v38 = vld [vmem:[#allocation124_spill] sm:$0xff]  ;;  %v9491_v4 = vsel %vm7691_vm11, %v1529_v20, %v1530_v23  ;;  %v12624_v20 = vld [vmem:[#allocation82_spill] sm:$0xff] }
 0x394   : > { %12593 = vst [vmem:[#allocation98_spill] sm:$0xff] %v9390_v43  ;;  %v12599_v43 = vld [vmem:[#allocation100_spill] sm:$0xff]  ;;  %v12610_v10 = vrot.slane %v12609_v38, 7  ;;  %12620 = vst [vmem:[#allocation66_spill] sm:$0xff] %v9491_v4  ;;  %v12642_v23 = vld [vmem:[#allocation111_spill] sm:$0xff] }
 0x395   : > { %1894 = vrot.lane.b32.xlu0 %v1501_v17, %s7440_s6  ;;  %v6827_v7 = vcombine.high %v12600_v48, %v12599_v43  ;;  %v9437_v52 = vpop.permute.xlu1 %1864 }
 0x396   : > { %12602 = vst [vmem:[#allocation20_spill] sm:$0xff] %v9437_v52  ;;  %v9453_v52 = vrot.slane %v2823_v44, %v8091_v13  ;;  %v9467_v51 = vsel %vm7691_vm11, %v1523_v57, %v12610_v10  ;;  %v12618_v10 = vld [vmem:[#allocation104_spill] sm:$0xff]  ;;  %v9487_v44 = vrot.slane %v3255_v62, %v8091_v13 }
 0x397   : > { %v9439_v17 = vpop.permute.xlu0 %1674  ;;  %1057 = vrot.lane.b32.xlu1 %v12590_v25, %s7436_s29  ;;  %12611 = vst [vmem:[#allocation26_spill] sm:$0xff] %v9467_v51  ;;  %v12622_v57 = vld [vmem:[#allocation232_spill] sm:$0xff] }
 0x398   : > { %12603 = vst [vmem:[#allocation24_spill] sm:$0xff] %v9439_v17  ;;  %v9476_v17 = vrot.slane %v3039_v9, %v8091_v13  ;;  %12619 = vst [vmem:[#allocation100_spill] sm:$0xff] %v9487_v44  ;;  %v3471_v55 = vcombine.low %v12622_v57, %v9467_v51  ;;  %v12627_v51 = vld [vmem:[#allocation238_spill] sm:$0xff]  ;;  %v12633_v57 = vld [vmem:[#allocation5_spill] sm:$0xff]  ;;  %v2229_v44 = vcombine.low %v12641_v53, %v12640_v19 }
 0x399   : > { %1063 = vrot.lane.b32.xlu0 %v8399_v28, %s7436_s29  ;;  %v9478_v60 = vpop.permute.xlu1 %1862  ;;  %v3687_v38 = vcombine.low %v12627_v51, %v9491_v4  ;;  %v12634_v51 = vcombine.low %v12600_v48, %v12599_v43  ;;  %v12638_v9 = vld [vmem:[#allocation138_spill] sm:$0xff]  ;;  %v9562_v53 = vrot.slane %v6827_v7, %v12633_v57 }
 0x39a   : > { %12613 = vst [vmem:[#allocation27_spill] sm:$0xff] %v9476_v17  ;;  %12614 = vst [vmem:[#allocation40_spill] sm:$0xff] %v9478_v60  ;;  %v12632_v60 = vld [vmem:[#allocation77_spill] sm:$0xff]  ;;  %v12636_v17 = vld [vmem:[#allocation135_spill] sm:$0xff]  ;;  %v9539_v49 = vrot.slane %v3471_v55, %v8091_v13 }
 0x39b   : > { %v9480_v8 = vpop.permute.xlu0 %1866  ;;  %1249 = vrot.lane.b32.xlu1 %v12590_v25, %s7440_s6  ;;  %v12629_v25 = vld [vmem:[#allocation131_spill] sm:$0xff]  ;;  %v9532_v4 = vrot.slane %v12634_v51, %v12633_v57  ;;  %12647 = vst [vmem:[#allocation116_spill] sm:$0xff] %v9562_v53  ;;  %v12656_v53 = vld [vmem:[#allocation142_spill] sm:$0xff] }
 0x39c   : > { %12615 = vst [vmem:[#allocation17_spill] sm:$0xff] %v9480_v8  ;;  %v12628_v8 = vld [vmem:[#allocation133_spill] sm:$0xff]  ;;  %v12645_v51 = vld [vmem:[#allocation11_spill] sm:$0xff] }
 0x39d   : > { %1255 = vrot.lane.b32.xlu0 %v8399_v28, %s7440_s6  ;;  %v6824_v28 = vcombine.high %v12629_v25, %v12628_v8  ;;  %v9518_v3 = vpop.permute.xlu1 %1033  ;;  %12635 = vst [vmem:[#allocation105_spill] sm:$0xff] %v9532_v4  ;;  %v12643_v43 = vcombine.low %v12629_v25, %v12628_v8  ;;  %v3855_v59 = vcombine.low %v12645_v51, %v2128_v11 }
 0x39e   : > { %12630 = vst [vmem:[#allocation218_spill] sm:$0xff] %v9518_v3  ;;  %v6830_v55 = vcombine.high %v12645_v51, %v2128_v11  ;;  %v9556_v3 = vrot.slane %v3687_v38, %v8091_v13  ;;  %v12648_v4 = vcombine.low %v12607_v47, %v12606_v21  ;;  %v9575_v11 = vrot.slane %v4006_v29, %v12633_v57 }
 0x39f   : > { %v9520_v62 = vpop.permute.xlu0 %1035  ;;  %1700 = vrot.lane.b32.xlu1 %v12642_v23, %s7436_s29  ;;  %v9551_v48 = vrot.slane %v12643_v43, %v12633_v57  ;;  %v9559_v19 = vrot.slane %v6824_v28, %v12633_v57  ;;  %v9578_v38 = vrot.slane %v6833_v30, %v12633_v57  ;;  %v12653_v28 = vld [vmem:[#allocation34_spill] sm:$0xff] }
 0x3a0   : > { %12631 = vst [vmem:[#allocation224_spill] sm:$0xff] %v9520_v62  ;;  %v12639_v62 = vld [vmem:[#allocation137_spill] sm:$0xff]  ;;  %v9568_v25 = vrot.slane %v12648_v4, %v12633_v57  ;;  %12652 = vst [vmem:[#allocation123_spill] sm:$0xff] %v9575_v11  ;;  %v12654_v7 = vcombine.low %v12556_v54, %v12653_v28  ;;  %v12655_v4 = vcombine.low %v12430_v6, %v12504_v1  ;;  %v12658_v54 = vld [vmem:[#allocation118_spill] sm:$0xff] }
 0x3a1   : > { %1706 = vrot.lane.b32.xlu0 %v9374_v5, %s7436_s29  ;;  %12644 = vst [vmem:[#allocation73_spill] sm:$0xff] %v9551_v48  ;;  %12646 = vst [vmem:[#allocation101_spill] sm:$0xff] %v9559_v19  ;;  %v9570_v8 = vpop.permute.xlu1 %1225  ;;  %v9600_v6 = vrot.slane %v3855_v59, %v12633_v57  ;;  %v9603_v1 = vrot.slane %v6830_v55, %v12633_v57  ;;  %v12660_v28 = vld [vmem:[#allocation8_spill] sm:$0xff]  ;;  %v12665_v59 = vcombine.low %v8223_v61, %v12537_v16 }
 0x3a2   : > { %12649 = vst [vmem:[#allocation79_spill] sm:$0xff] %v9568_v25  ;;  %12650 = vst [vmem:[#allocation104_spill] sm:$0xff] %v9570_v8  ;;  %v2227_v51 = vrot.slane %v12654_v7, %v8091_v13  ;;  %v2344_v25 = vrot.slane %v12655_v4, %v8091_v13  ;;  %v12657_v8 = vld [vmem:[#allocation141_spill] sm:$0xff]  ;;  %v12661_v7 = vld [vmem:[#allocation36_spill] sm:$0xff] }
 0x3a3   : > { %v9572_v43 = vpop.permute.xlu0 %1227  ;;  %1892 = vrot.lane.b32.xlu1 %v12642_v23, %s7440_s6  ;;  %12659 = vst [vmem:[#allocation82_spill] sm:$0xff] %v9600_v6  ;;  %v12662_v4 = vcombine.low %v12660_v28, %v12661_v7  ;;  %v12663_v23 = vcombine.high %v12607_v47, %v12606_v21  ;;  %v9621_v55 = vrot.slane %v12665_v59, %v8091_v13  ;;  %v12916_v48 = vld [vmem:[#allocation196_spill] sm:$0xff] }
 0x3a4   : > { %12651 = vst [vmem:[#allocation232_spill] sm:$0xff] %v9572_v43  ;;  %v2236_v43 = vrot.slane %v2229_v44, %v8091_v13  ;;  %v12666_v28 = vcombine.low %v8308_v42, %v12519_v36  ;;  %v12670_v44 = vld [vmem:[#allocation9_spill] sm:$0xff]  ;;  %v12671_v42 = vld [vmem:[#allocation54_spill] sm:$0xff]  ;;  %v12676_v6 = vcombine.low %v12612_v37, %v8436_v34  ;;  %v12680_v37 = vcombine.high %v12617_v39, %v12616_v58 }
 0x3a5   : > { %1896 = vrot.lane.b32.xlu0 %v12658_v54, %s7440_s6  ;;  %v2335_v29 = vrot.slane %v12662_v4, %v8091_v13  ;;  %v9615_v30 = vrot.slane %v12663_v23, %v12633_v57  ;;  %v9627_v4 = vpop.permute.xlu1 %1676  ;;  %v12669_v23 = vcombine.low %v9295_v33, %v9419_v14  ;;  %v12672_v36 = vcombine.low %v12670_v44, %v12671_v42 }
 0x3a6   : > { %v2560_v7 = vrot.slane %v12666_v28, %v8091_v13  ;;  %12667 = vst [vmem:[#allocation133_spill] sm:$0xff] %v9627_v4  ;;  %v6836_v59 = vcombine.high %v2227_v51, %v2236_v43  ;;  %v12674_v4 = vld [vmem:[#allocation38_spill] sm:$0xff]  ;;  %v3100_v11 = vrot.slane %v12676_v6, %v8091_v13  ;;  %v9673_v6 = vrot.slane %v12680_v37, %v12633_v57 }
 0x3a7   : > { %12664 = vst [vmem:[#allocation238_spill] sm:$0xff] %v9615_v30  ;;  %v9629_v19 = vpop.permute.xlu0 %1678  ;;  %v4188_v47 = vcombine.low %v2335_v29, %v2344_v25  ;;  %v9637_v61 = vrot.slane %v12669_v23, %v12633_v57  ;;  %v6842_v16 = vcombine.high %v2335_v29, %v2344_v25  ;;  %v9643_v28 = vrot.slane %v12672_v36, %v8091_v13 }
 0x3a8   : > { %12668 = vst [vmem:[#allocation131_spill] sm:$0xff] %v9629_v19  ;;  %v12673_v19 = vld [vmem:[#allocation10_spill] sm:$0xff]  ;;  %1061 = vrot.lane.b32.xlu1 %v8436_v34, %s7436_s29  ;;  %v12677_v25 = vcombine.high %v9295_v33, %v9419_v14  ;;  %12681 = vst [vmem:[#allocation5_spill] sm:$0xff] %v9673_v6  ;;  %v12682_v33 = vcombine.low %v12578_v12, %v8073_v2  ;;  %v9698_v2 = vrot.slane %v6836_v59, %v12633_v57 }
 0x3a9   : > { %v12675_v30 = vcombine.low %v12673_v19, %v12674_v4  ;;  %1898 = vrot.lane.b32.xlu0 %v9374_v5, %s7440_s6  ;;  %v12678_v19 = vcombine.low %v12617_v39, %v12616_v58  ;;  %v6848_v5 = vcombine.high %v9643_v28, %v9621_v55  ;;  %v4032_v4 = vcombine.low %v2227_v51, %v2236_v43  ;;  %v9681_v23 = vpop.permute.xlu1 %1868 }
 0x3aa   : > { %v9661_v29 = vrot.slane %v12677_v25, %v12633_v57  ;;  %v3091_v14 = vrot.slane %v12682_v33, %v8091_v13  ;;  %12683 = vst [vmem:[#allocation135_spill] sm:$0xff] %v9681_v23  ;;  %v9686_v36 = vrot.slane %v4188_v47, %v12633_v57  ;;  %v9689_v58 = vrot.slane %v6842_v16, %v12633_v57  ;;  %v12699_v33 = vld [vmem:[#allocation44_spill] sm:$0xff] }
 0x3ab   : > { %v2551_v21 = vrot.slane %v12675_v30, %v8091_v13  ;;  %v9667_v30 = vrot.slane %v12678_v19, %v12633_v57  ;;  %v9683_v42 = vpop.permute.xlu0 %1039  ;;  %v12685_v43 = vcombine.low %v8267_v35, %v12562_v56  ;;  %v12686_v12 = vcombine.low %v9316_v46, %v9431_v26 }
 0x3ac   : > { %12684 = vst [vmem:[#allocation134_spill] sm:$0xff] %v9683_v42  ;;  %v5240_v47 = vcombine.low %v3091_v14, %v3100_v11  ;;  %v6884_v19 = vcombine.high %v3091_v14, %v3100_v11  ;;  %1253 = vrot.lane.b32.xlu1 %v8436_v34, %s7440_s6  ;;  %v12687_v35 = vcombine.high %v9316_v46, %v9431_v26 }
 0x3ad   : > { %12679 = vst [vmem:[#allocation77_spill] sm:$0xff] %v9667_v30  ;;  %v4490_v44 = vcombine.low %v2551_v21, %v2560_v7  ;;  %v6854_v39 = vcombine.high %v2551_v21, %v2560_v7  ;;  %v9695_v51 = vrot.slane %v12685_v43, %v8091_v13  ;;  %v9704_v25 = vrot.slane %v12686_v12, %v12633_v57  ;;  %v9741_v46 = vpop.permute.xlu1 %1037 }
 0x3ae   : > { %1067 = vrot.lane.b32.xlu0 %v8459_v63, %s7436_s29  ;;  %v9714_v56 = vrot.slane %v12687_v35, %v12633_v57  ;;  %v12688_v7 = vcombine.low %v12566_v45, %v12565_v31  ;;  %v12689_v11 = vcombine.low %v8351_v32, %v12531_v22  ;;  %v9727_v16 = vrot.slane %v6848_v5, %v12633_v57 }
 0x3af   : > { %v9730_v59 = vrot.slane %v4490_v44, %v12633_v57  ;;  %v9733_v26 = vrot.slane %v4032_v4, %v12633_v57  ;;  %v12692_v45 = vcombine.low %v12624_v20, %v12623_v27  ;;  %12694 = vst [vmem:[#allocation71_spill] sm:$0xff] %v9741_v46  ;;  %v9743_v37 = vpop.permute.xlu0 %1231  ;;  %v9746_v32 = vrot.slane %v6854_v39, %v12633_v57  ;;  %v12698_v4 = vld [vmem:[#allocation13_spill] sm:$0xff] }
 0x3b0   : > { %v9720_v21 = vrot.slane %v12688_v7, %v8091_v13  ;;  %v2776_v34 = vrot.slane %v12689_v11, %v8091_v13  ;;  %12690 = vst [vmem:[#allocation138_spill] sm:$0xff] %v9727_v16  ;;  %12695 = vst [vmem:[#allocation111_spill] sm:$0xff] %v9743_v37  ;;  %v12696_v5 = vcombine.high %v12624_v20, %v12623_v27  ;;  %1704 = vrot.lane.b32.xlu1 %v12658_v54, %s7436_s29  ;;  %v12910_v16 = vld [vmem:[#allocation243_spill] sm:$0xff] }
 0x3b1   : > { %12691 = vst [vmem:[#allocation137_spill] sm:$0xff] %v9733_v26  ;;  %v9739_v31 = vrot.slane %v12692_v45, %v12633_v57  ;;  %v12700_v14 = vcombine.low %v12698_v4, %v12699_v33  ;;  %v9761_v12 = vrot.slane %v5240_v47, %v12633_v57  ;;  %v9764_v39 = vrot.slane %v6884_v19, %v12633_v57  ;;  %v12708_v45 = vld [vmem:[#allocation108_spill] sm:$0xff]  ;;  %v9802_v42 = vpop.permute.xlu1 %1229  ;;  %v12882_v26 = vld [vmem:[#allocation55_spill] sm:$0xff] }
 0x3b2   : > { %v6860_v22 = vcombine.high %v9720_v21, %v9695_v51  ;;  %v9754_v44 = vrot.slane %v12696_v5, %v12633_v57  ;;  %v12703_v35 = vcombine.high %v9331_v40, %v9453_v52  ;;  %v12705_v27 = vcombine.low %v12618_v10, %v8475_v15  ;;  %1259 = vrot.lane.b32.xlu0 %v8459_v63, %s7440_s6  ;;  %v12709_v5 = vld [vmem:[#allocation106_spill] sm:$0xff] }
 0x3b3   : > { %12693 = vst [vmem:[#allocation80_spill] sm:$0xff] %v9739_v31  ;;  %v2767_v43 = vrot.slane %v12700_v14, %v8091_v13  ;;  %12701 = vst [vmem:[#allocation34_spill] sm:$0xff] %v9761_v12  ;;  %v12706_v19 = vcombine.low %v12637_v50, %v12636_v17  ;;  %v12710_v4 = vcombine.low %v12708_v45, %v12709_v5 }
 0x3b4   : > { %12697 = vst [vmem:[#allocation11_spill] sm:$0xff] %v9754_v44  ;;  %12702 = vst [vmem:[#allocation142_spill] sm:$0xff] %v9764_v39  ;;  %v9770_v7 = vrot.slane %v12703_v35, %v12633_v57  ;;  %v3316_v20 = vrot.slane %v12705_v27, %v8091_v13  ;;  %v12711_v10 = vcombine.high %v12637_v50, %v12636_v17  ;;  %v12713_v35 = vld [vmem:[#allocation21_spill] sm:$0xff]  ;;  %v12714_v27 = vld [vmem:[#allocation68_spill] sm:$0xff]  ;;  %v9804_v39 = vpop.permute.xlu0 %1682  ;;  %1065 = vrot.lane.b32.xlu1 %v8475_v15, %s7436_s29 }
 0x3b5   : > { %v6866_v47 = vcombine.high %v2767_v43, %v2776_v34  ;;  %v9784_v11 = vrot.slane %v12706_v19, %v12633_v57  ;;  %v2992_v33 = vrot.slane %v12710_v4, %v8091_v13  ;;  %v4792_v14 = vcombine.low %v2767_v43, %v2776_v34  ;;  %12716 = vst [vmem:[#allocation36_spill] sm:$0xff] %v9802_v42  ;;  %v12719_v50 = vld [vmem:[#allocation86_spill] sm:$0xff]  ;;  %v12720_v17 = vld [vmem:[#allocation125_spill] sm:$0xff]  ;;  %v12723_v43 = vld [vmem:[#allocation16_spill] sm:$0xff] }
 0x3b6   : > { %12704 = vst [vmem:[#allocation141_spill] sm:$0xff] %v9770_v7  ;;  %v9794_v54 = vrot.slane %v12711_v10, %v12633_v57  ;;  %v12715_v46 = vcombine.low %v12713_v35, %v12714_v27  ;;  %v4334_v19 = vcombine.low %v9643_v28, %v9621_v55  ;;  %12717 = vst [vmem:[#allocation9_spill] sm:$0xff] %v9804_v39  ;;  %v12724_v4 = vld [vmem:[#allocation57_spill] sm:$0xff]  ;;  %v12726_v55 = vld [vmem:[#allocation122_spill] sm:$0xff] }
 0x3b7   : > { %12707 = vst [vmem:[#allocation118_spill] sm:$0xff] %v9784_v11  ;;  %v9807_v45 = vrot.slane %v6860_v22, %v12633_v57  ;;  %v12721_v5 = vcombine.low %v12719_v50, %v12720_v17  ;;  %v12727_v28 = vld [vmem:[#allocation128_spill] sm:$0xff]  ;;  %v12729_v22 = vcombine.low %v9331_v40, %v9453_v52  ;;  %v12736_v40 = vld [vmem:[#allocation25_spill] sm:$0xff] }
 0x3b8   : > { %12712 = vst [vmem:[#allocation8_spill] sm:$0xff] %v9794_v54  ;;  %v3307_v37 = vrot.slane %v12715_v46, %v8091_v13  ;;  %v12725_v46 = vcombine.low %v12723_v43, %v12724_v4  ;;  %v12728_v35 = vcombine.low %v12726_v55, %v12727_v28  ;;  %v12732_v54 = vld [vmem:[#allocation102_spill] sm:$0xff]  ;;  %v12734_v43 = vld [vmem:[#allocation41_spill] sm:$0xff]  ;;  %v9840_v4 = vrot.slane %v6866_v47, %v12633_v57  ;;  %v12926_v44 = vld [vmem:[#allocation200_spill] sm:$0xff] }
 0x3b9   : > { %12718 = vst [vmem:[#allocation54_spill] sm:$0xff] %v9807_v45  ;;  %v9813_v34 = vrot.slane %v12721_v5, %v12633_v57  ;;  %v9827_v39 = vrot.slane %v12729_v22, %v12633_v57  ;;  %v12731_v5 = vld [vmem:[#allocation94_spill] sm:$0xff]  ;;  %1710 = vrot.lane.b32.xlu0 %v12734_v43, %s7436_s29  ;;  %v9847_v55 = vrot.slane %v4792_v14, %v12633_v57  ;;  %v12744_v22 = vld [vmem:[#allocation56_spill] sm:$0xff]  ;;  %v12927_v45 = vld [vmem:[#allocation107_spill] sm:$0xff] }
 0x3ba   : > { %v2983_v10 = vrot.slane %v12725_v46, %v8091_v13  ;;  %v3640_v27 = vrot.slane %v12728_v35, %v8091_v13  ;;  %v5542_v42 = vcombine.low %v3307_v37, %v3316_v20  ;;  %v6896_v12 = vcombine.high %v3307_v37, %v3316_v20  ;;  %12735 = vst [vmem:[#allocation13_spill] sm:$0xff] %v9840_v4  ;;  %v12737_v46 = vld [vmem:[#allocation76_spill] sm:$0xff]  ;;  %v12743_v47 = vld [vmem:[#allocation14_spill] sm:$0xff] }
 0x3bb   : > { %12722 = vst [vmem:[#allocation10_spill] sm:$0xff] %v9813_v34  ;;  %12730 = vst [vmem:[#allocation38_spill] sm:$0xff] %v9827_v39  ;;  %v12733_v23 = vcombine.low %v12731_v5, %v12732_v54  ;;  %v12738_v37 = vcombine.low %v12736_v40, %v12737_v46  ;;  %v12741_v54 = vcombine.low %v12639_v62, %v12638_v9  ;;  %v9864_v40 = vpop.permute.xlu1 %1680  ;;  %v9866_v46 = vpop.permute.xlu0 %1874  ;;  %1257 = vrot.lane.b32.xlu1 %v8475_v15, %s7440_s6  ;;  %v12762_v15 = vld [vmem:[#allocation29_spill] sm:$0xff]  ;;  %v12876_v34 = vld [vmem:[#allocation220_spill] sm:$0xff] }
 0x3bc   : > { %v5094_v52 = vcombine.low %v2983_v10, %v2992_v33  ;;  %12739 = vst [vmem:[#allocation44_spill] sm:$0xff] %v9847_v55  ;;  %v12745_v5 = vcombine.low %v12743_v47, %v12744_v22  ;;  %12746 = vst [vmem:[#allocation21_spill] sm:$0xff] %v9864_v40  ;;  %v12748_v14 = vcombine.high %v12639_v62, %v12638_v9  ;;  %v12752_v22 = vld [vmem:[#allocation15_spill] sm:$0xff]  ;;  %v12874_v55 = vld [vmem:[#allocation185_spill] sm:$0xff] }
 0x3bd   : > { %v9833_v11 = vrot.slane %v12733_v23, %v8091_v13  ;;  %v3631_v20 = vrot.slane %v12738_v37, %v8091_v13  ;;  %v9850_v23 = vrot.slane %v4334_v19, %v12633_v57  ;;  %v9856_v35 = vrot.slane %v12741_v54, %v12633_v57  ;;  %12747 = vst [vmem:[#allocation68_spill] sm:$0xff] %v9866_v46 }
 0x3be   : > { %v9862_v39 = vrot.slane %v12745_v5, %v8091_v13  ;;  %v9872_v19 = vrot.slane %v12748_v14, %v12633_v57  ;;  %v6878_v54 = vcombine.high %v2983_v10, %v2992_v33  ;;  %v9878_v47 = vrot.slane %v6896_v12, %v12633_v57  ;;  %v12753_v5 = vld [vmem:[#allocation27_spill] sm:$0xff]  ;;  %1902 = vrot.lane.b32.xlu0 %v12734_v43, %s7440_s6  ;;  %v12768_v14 = vld [vmem:[#allocation124_spill] sm:$0xff] }
 0x3bf   : > { %12740 = vst [vmem:[#allocation108_spill] sm:$0xff] %v9850_v23  ;;  %12742 = vst [vmem:[#allocation106_spill] sm:$0xff] %v9856_v35  ;;  %v6000_v37 = vcombine.low %v3631_v20, %v3640_v27  ;;  %v6914_v23 = vcombine.high %v3631_v20, %v3640_v27  ;;  %v9875_v35 = vrot.slane %v5542_v42, %v12633_v57  ;;  %v12761_v27 = vld [vmem:[#allocation156_spill] sm:$0xff] }
 0x3c0   : > { %12749 = vst [vmem:[#allocation86_spill] sm:$0xff] %v9872_v19  ;;  %12751 = vst [vmem:[#allocation16_spill] sm:$0xff] %v9878_v47  ;;  %v12754_v40 = vcombine.low %v12752_v22, %v12753_v5  ;;  %v6872_v9 = vcombine.high %v9862_v39, %v9833_v11  ;;  %v9893_v62 = vrot.slane %v5094_v52, %v12633_v57 }
 0x3c1   : > { %12750 = vst [vmem:[#allocation125_spill] sm:$0xff] %v9875_v35  ;;  %v12757_v42 = vcombine.high %v12719_v50, %v12720_v17  ;;  %v12759_v33 = vcombine.high %v12752_v22, %v12753_v5  ;;  %v2130_v20 = vcombine.low %v12762_v15, %v12761_v27  ;;  %v12763_v43 = vcombine.low %v9359_v0, %v9556_v3  ;;  %v12777_v35 = vld [vmem:[#allocation229_spill] sm:$0xff] }
 0x3c2   : > { %v9884_v46 = vrot.slane %v12754_v40, %v12633_v57  ;;  %12756 = vst [vmem:[#allocation122_spill] sm:$0xff] %v9893_v62  ;;  %v12765_v50 = vcombine.high %v9359_v0, %v9556_v3  ;;  %v12767_v40 = vld [vmem:[#allocation114_spill] sm:$0xff]  ;;  %v9928_v27 = vrot.slane %v6000_v37, %v12633_v57  ;;  %v9931_v15 = vrot.slane %v6914_v23, %v12633_v57  ;;  %v12774_v3 = vld [vmem:[#allocation112_spill] sm:$0xff]  ;;  %v12775_v0 = vld [vmem:[#allocation109_spill] sm:$0xff] }
 0x3c3   : > { %v9899_v12 = vrot.slane %v12757_v42, %v12633_v57  ;;  %v9905_v10 = vrot.slane %v12759_v33, %v12633_v57  ;;  %v9913_v52 = vrot.slane %v12763_v43, %v12633_v57  ;;  %v12769_v22 = vcombine.low %v12767_v40, %v12768_v14  ;;  %v9925_v42 = vpop.permute.xlu1 %1872  ;;  %v1044_v33 = vpop.permute.xlu0 %1043  ;;  %v12780_v37 = vld [vmem:[#allocation74_spill] sm:$0xff]  ;;  %1071 = vrot.lane.b32.xlu0 %v12727_v28, %s7436_s29  ;;  %v12861_v62 = vld [vmem:[#allocation183_spill] sm:$0xff] }
 0x3c4   : > { %12755 = vst [vmem:[#allocation57_spill] sm:$0xff] %v9884_v46  ;;  %v9919_v17 = vrot.slane %v12765_v50, %v12633_v57  ;;  %12770 = vst [vmem:[#allocation25_spill] sm:$0xff] %v9925_v42  ;;  %v9934_v43 = vrot.slane %v6878_v54, %v12633_v57  ;;  %v12776_v50 = vcombine.low %v12774_v3, %v12775_v0  ;;  %v12782_v54 = vld [vmem:[#allocation121_spill] sm:$0xff]  ;;  %v12786_v3 = vld [vmem:[#allocation63_spill] sm:$0xff] }
 0x3c5   : > { %12758 = vst [vmem:[#allocation128_spill] sm:$0xff] %v9899_v12  ;;  %12760 = vst [vmem:[#allocation94_spill] sm:$0xff] %v9905_v10  ;;  %v3532_v5 = vrot.slane %v12769_v22, %v8091_v13  ;;  %v2139_v40 = vcombine.low %v12777_v35, %v1044_v33  ;;  %v9942_v22 = vrot.slane %v6872_v9, %v12633_v57  ;;  %1708 = vrot.lane.b32.xlu1 %v12782_v54, %s7436_s29  ;;  %v12785_v33 = vld [vmem:[#allocation19_spill] sm:$0xff] }
 0x3c6   : > { %12764 = vst [vmem:[#allocation102_spill] sm:$0xff] %v9913_v52  ;;  %12766 = vst [vmem:[#allocation41_spill] sm:$0xff] %v9919_v17  ;;  %v3208_v52 = vrot.slane %v12776_v50, %v8091_v13  ;;  %v12779_v17 = vld [vmem:[#allocation23_spill] sm:$0xff]  ;;  %v4636_v23 = vcombine.low %v9720_v21, %v9695_v51  ;;  %v12783_v35 = vcombine.low %v12657_v8, %v12656_v53  ;;  %v12789_v50 = vld [vmem:[#allocation158_spill] sm:$0xff] }
 0x3c7   : > { %12771 = vst [vmem:[#allocation76_spill] sm:$0xff] %v9928_v27  ;;  %12772 = vst [vmem:[#allocation14_spill] sm:$0xff] %v9931_v15  ;;  %v12781_v27 = vcombine.low %v12779_v17, %v12780_v37  ;;  %v12787_v17 = vcombine.low %v12785_v33, %v12786_v3  ;;  %v12788_v51 = vcombine.low %v12632_v60, %v9400_v18  ;;  %v12790_v37 = vld [vmem:[#allocation33_spill] sm:$0xff]  ;;  %v1236_v42 = vpop.permute.xlu0 %1235  ;;  %1263 = vrot.lane.b32.xlu0 %v12727_v28, %s7440_s6 }
 0x3c8   : > { %12773 = vst [vmem:[#allocation56_spill] sm:$0xff] %v9934_v43  ;;  %12778 = vst [vmem:[#allocation15_spill] sm:$0xff] %v9942_v22  ;;  %v9958_v9 = vrot.slane %v12783_v35, %v12633_v57  ;;  %v9969_v0 = vrot.slane %v2130_v20, %v8091_v13  ;;  %v2148_v15 = vcombine.low %v12790_v37, %v12789_v50  ;;  %v12794_v20 = vld [vmem:[#allocation32_spill] sm:$0xff]  ;;  %v12797_v37 = vld [vmem:[#allocation231_spill] sm:$0xff] }
 0x3c9   : > { %v3523_v19 = vrot.slane %v12781_v27, %v8091_v13  ;;  %v3199_v27 = vrot.slane %v12787_v17, %v8091_v13  ;;  %v3748_v21 = vrot.slane %v12788_v51, %v8091_v13  ;;  %v9974_v47 = vrot.slane %v2139_v40, %v8091_v13  ;;  %v12795_v51 = vld [vmem:[#allocation167_spill] sm:$0xff]  ;;  %1900 = vrot.lane.b32.xlu1 %v12782_v54, %s7440_s6 }
 0x3ca   : > { %12784 = vst [vmem:[#allocation27_spill] sm:$0xff] %v9958_v9  ;;  %v9976_v9 = vpop.permute.xlu1 %1870  ;;  %v12792_v3 = vcombine.high %v12657_v8, %v12656_v53  ;;  %v12796_v22 = vcombine.low %v12794_v20, %v12795_v51  ;;  %v2157_v12 = vcombine.low %v12797_v37, %v1236_v42  ;;  %v12799_v53 = vld [vmem:[#allocation100_spill] sm:$0xff] }
 0x3cb   : > { %v5844_v35 = vcombine.low %v3523_v19, %v3532_v5  ;;  %12791 = vst [vmem:[#allocation156_spill] sm:$0xff] %v9976_v9  ;;  %v6908_v33 = vcombine.high %v3523_v19, %v3532_v5  ;;  %v6890_v17 = vcombine.high %v3199_v27, %v3208_v52  ;;  %v6831_v40 = vcombine.high %v9969_v0, %v9974_v47  ;;  %v10019_v51 = vpop.permute.xlu0 %1686 }
 0x3cc   : > { %v9982_v60 = vrot.slane %v12792_v3, %v12633_v57  ;;  %v3739_v50 = vrot.slane %v12796_v22, %v8091_v13  ;;  %v9992_v9 = vrot.slane %v4636_v23, %v12633_v57  ;;  %v5396_v19 = vcombine.low %v3199_v27, %v3208_v52  ;;  %v12802_v3 = vld [vmem:[#allocation115_spill] sm:$0xff]  ;;  %12806 = vst [vmem:[#allocation229_spill] sm:$0xff] %v10019_v51  ;;  %v12823_v51 = vld [vmem:[#allocation50_spill] sm:$0xff] }
 0x3cd   : > { %v12800_v8 = vcombine.high %v9339_v24, %v12799_v53  ;;  %v12803_v42 = vcombine.low %v12802_v3, %v8459_v63  ;;  %v10009_v52 = vrot.slane %v2148_v15, %v8091_v13  ;;  %v10012_v54 = vrot.slane %v2157_v12, %v8091_v13  ;;  %v12809_v12 = vld [vmem:[#allocation22_spill] sm:$0xff]  ;;  %1069 = vrot.lane.b32.xlu1 %v12768_v14, %s7436_s29 }
 0x3ce   : > { %12793 = vst [vmem:[#allocation29_spill] sm:$0xff] %v9982_v60  ;;  %12798 = vst [vmem:[#allocation114_spill] sm:$0xff] %v9992_v9  ;;  %v6146_v22 = vcombine.low %v3739_v50, %v3748_v21  ;;  %v10015_v28 = vrot.slane %v5844_v35, %v12633_v57  ;;  %v6920_v27 = vcombine.high %v3739_v50, %v3748_v21  ;;  %v10017_v20 = vpop.permute.xlu1 %1984 }
 0x3cf   : > { %v10002_v5 = vrot.slane %v12800_v8, %v12633_v57  ;;  %v3424_v23 = vrot.slane %v12803_v42, %v8091_v13  ;;  %12805 = vst [vmem:[#allocation109_spill] sm:$0xff] %v10017_v20  ;;  %v10022_v37 = vrot.slane %v6908_v33, %v12633_v57  ;;  %v10025_v63 = vrot.slane %v6890_v17, %v12633_v57  ;;  %v12810_v8 = vld [vmem:[#allocation65_spill] sm:$0xff] }
 0x3d0   : > { %12804 = vst [vmem:[#allocation112_spill] sm:$0xff] %v10015_v28  ;;  %v4938_v15 = vcombine.low %v9862_v39, %v9833_v11  ;;  %v12811_v3 = vcombine.low %v12809_v12, %v12810_v8  ;;  %v3969_v21 = vrot.slane %v6831_v40, %v12633_v57  ;;  %v6832_v50 = vcombine.high %v10009_v52, %v10012_v54  ;;  %v12815_v39 = vld [vmem:[#allocation12_spill] sm:$0xff]  ;;  %v12819_v28 = vld [vmem:[#allocation166_spill] sm:$0xff] }
 0x3d1   : > { %12801 = vst [vmem:[#allocation124_spill] sm:$0xff] %v10002_v5  ;;  %12807 = vst [vmem:[#allocation23_spill] sm:$0xff] %v10022_v37  ;;  %v10037_v42 = vrot.slane %v5396_v19, %v12633_v57  ;;  %v12813_v33 = vcombine.low %v9339_v24, %v12799_v53  ;;  %1714 = vrot.lane.b32.xlu0 %v12815_v39, %s7436_s29  ;;  %v10050_v11 = vrot.slane %v6146_v22, %v12633_v57  ;;  %v12817_v8 = vld [vmem:[#allocation164_spill] sm:$0xff]  ;;  %v12818_v19 = vld [vmem:[#allocation37_spill] sm:$0xff] }
 0x3d2   : > { %12808 = vst [vmem:[#allocation74_spill] sm:$0xff] %v10025_v63  ;;  %v3415_v35 = vrot.slane %v12811_v3, %v8091_v13  ;;  %v2346_v3 = vcombine.low %v12818_v19, %v12817_v8  ;;  %v12820_v37 = vld [vmem:[#allocation42_spill] sm:$0xff]  ;;  %v10057_v24 = vrot.slane %v6832_v50, %v12633_v57  ;;  %v10060_v53 = vrot.slane %v6920_v27, %v12633_v57  ;;  %v12825_v22 = vld [vmem:[#allocation45_spill] sm:$0xff]  ;;  %v12830_v27 = vld [vmem:[#allocation240_spill] sm:$0xff] }
 0x3d3   : > { %12812 = vst [vmem:[#allocation121_spill] sm:$0xff] %v10037_v42  ;;  %v10043_v17 = vrot.slane %v12813_v33, %v12633_v57  ;;  %12816 = vst [vmem:[#allocation63_spill] sm:$0xff] %v10050_v11  ;;  %v2364_v60 = vcombine.low %v12820_v37, %v12819_v28  ;;  %v12822_v33 = vld [vmem:[#allocation169_spill] sm:$0xff]  ;;  %v12824_v42 = vld [vmem:[#allocation171_spill] sm:$0xff]  ;;  %v12828_v28 = vcombine.low %v9354_v41, %v9539_v49  ;;  %1261 = vrot.lane.b32.xlu1 %v12768_v14, %s7440_s6 }
 0x3d4   : > { %v5698_v40 = vcombine.low %v3415_v35, %v3424_v23  ;;  %v6902_v12 = vcombine.high %v3415_v35, %v3424_v23  ;;  %12821 = vst [vmem:[#allocation158_spill] sm:$0xff] %v10060_v53  ;;  %v2094_v20 = vcombine.low %v12823_v51, %v12822_v33  ;;  %v2562_v11 = vcombine.low %v12825_v22, %v12824_v42  ;;  %v1048_v23 = vpop.permute.xlu0 %1047  ;;  %v12834_v19 = vld [vmem:[#allocation172_spill] sm:$0xff]  ;;  %v12858_v5 = vld [vmem:[#allocation58_spill] sm:$0xff] }
 0x3d5   : > { %12814 = vst [vmem:[#allocation19_spill] sm:$0xff] %v10043_v17  ;;  %v10066_v17 = vpop.permute.xlu1 %1996  ;;  %v10069_v35 = vrot.slane %v4938_v15, %v12633_v57  ;;  %v10075_v37 = vrot.slane %v12828_v28, %v12633_v57  ;;  %v2355_v50 = vcombine.low %v12830_v27, %v1048_v23  ;;  %v10079_v8 = vcombine.low %v9603_v1, %v3969_v21  ;;  %v12835_v33 = vld [vmem:[#allocation28_spill] sm:$0xff]  ;;  %v12836_v23 = vld [vmem:[#allocation129_spill] sm:$0xff]  ;;  %v12840_v27 = vld [vmem:[#allocation47_spill] sm:$0xff] }
 0x3d6   : > { %12826 = vst [vmem:[#allocation33_spill] sm:$0xff] %v10066_v17  ;;  %v4092_v51 = vcombine.low %v10057_v24, %v9578_v38  ;;  %v12832_v42 = vcombine.high %v9354_v41, %v9539_v49  ;;  %v2022_v22 = vcombine.low %v12835_v33, %v12834_v19  ;;  %1904 = vrot.lane.b32.xlu0 %v12836_v23, %s7440_s6  ;;  %v12842_v19 = vld [vmem:[#allocation31_spill] sm:$0xff]  ;;  %v12845_v17 = vld [vmem:[#allocation49_spill] sm:$0xff] }
 0x3d7   : > { %12827 = vst [vmem:[#allocation32_spill] sm:$0xff] %v10069_v35  ;;  %12829 = vst [vmem:[#allocation167_spill] sm:$0xff] %v10075_v37  ;;  %v10096_v1 = vrot.slane %v5698_v40, %v12633_v57  ;;  %v10099_v38 = vrot.slane %v6902_v12, %v12633_v57  ;;  %v10102_v21 = vrot.slane %v2346_v3, %v8091_v13  ;;  %v12839_v12 = vld [vmem:[#allocation173_spill] sm:$0xff]  ;;  %v12841_v3 = vld [vmem:[#allocation174_spill] sm:$0xff]  ;;  %1712 = vrot.lane.b32.xlu1 %v12836_v23, %s7436_s29 }
 0x3d8   : > { %12831 = vst [vmem:[#allocation231_spill] sm:$0xff] %v10079_v8  ;;  %v10087_v15 = vrot.slane %v12832_v42, %v12633_v57  ;;  %v10105_v49 = vrot.slane %v2364_v60, %v8091_v13  ;;  %v10108_v41 = vrot.slane %v2355_v50, %v8091_v13  ;;  %v10111_v14 = vpack.i.bf16 %v4092_v51, %v10079_v8  ;;  %v1240_v53 = vpop.permute.xlu0 %1239  ;;  %v12844_v50 = vld [vmem:[#allocation175_spill] sm:$0xff]  ;;  %v12846_v51 = vld [vmem:[#allocation176_spill] sm:$0xff]  ;;  %v12933_v8 = vld [vmem:[#allocation201_spill] sm:$0xff] }
 0x3d9   : > { %12837 = vst [vmem:[#allocation115_spill] sm:$0xff] %v10096_v1  ;;  %12838 = vst [vmem:[#allocation22_spill] sm:$0xff] %v10099_v38  ;;  %v10114_v28 = vrot.slane %v2094_v20, %v8091_v13  ;;  %v10117_v40 = vrot.slane %v2562_v11, %v8091_v13  ;;  %v2580_v42 = vcombine.low %v12840_v27, %v12839_v12  ;;  %v10123_v60 = vpop.permute.xlu1 %1684  ;;  %v12848_v11 = vld [vmem:[#allocation93_spill] sm:$0xff]  ;;  %v12850_v27 = vld [vmem:[#allocation51_spill] sm:$0xff] }
 0x3da   : > { %12833 = vst [vmem:[#allocation100_spill] sm:$0xff] %v10087_v15  ;;  %v2040_v33 = vcombine.low %v12842_v19, %v12841_v3  ;;  %12843 = vst [vmem:[#allocation65_spill] sm:$0xff] %v10123_v60  ;;  %v2184_v38 = vcombine.low %v12845_v17, %v12844_v50  ;;  %v12847_v15 = vld [vmem:[#allocation35_spill] sm:$0xff]  ;;  %v6843_v20 = vcombine.high %v10102_v21, %v10108_v41  ;;  %v12849_v12 = vld [vmem:[#allocation177_spill] sm:$0xff]  ;;  %1906 = vrot.lane.b32.xlu0 %v12815_v39, %s7440_s6 }
 0x3db   : > { %v2238_v1 = vcombine.low %v12847_v15, %v12846_v51  ;;  %v2373_v37 = vcombine.low %v12848_v11, %v1240_v53  ;;  %v10133_v35 = vrot.slane %v2022_v22, %v8091_v13  ;;  %v2202_v3 = vcombine.low %v12850_v27, %v12849_v12  ;;  %v12851_v19 = vld [vmem:[#allocation178_spill] sm:$0xff]  ;;  %v12852_v60 = vld [vmem:[#allocation39_spill] sm:$0xff]  ;;  %v12854_v15 = vld [vmem:[#allocation53_spill] sm:$0xff] }
 0x3dc   : > { %v2256_v63 = vcombine.low %v12852_v60, %v12851_v19  ;;  %v12853_v17 = vld [vmem:[#allocation179_spill] sm:$0xff]  ;;  %v12855_v51 = vld [vmem:[#allocation180_spill] sm:$0xff]  ;;  %v12857_v22 = vld [vmem:[#allocation181_spill] sm:$0xff]  ;;  %v10153_v60 = vrot.slane %v2580_v42, %v8091_v13  ;;  %v10156_v23 = vrot.slane %v2040_v33, %v8091_v13  ;;  %v4271_v42 = vrot.slane %v6843_v20, %v12633_v57 }
 0x3dd   : > { %v2778_v50 = vcombine.low %v12854_v15, %v12853_v17  ;;  %v12856_v53 = vld [vmem:[#allocation48_spill] sm:$0xff]  ;;  %v2796_v9 = vcombine.low %v12858_v5, %v12857_v22  ;;  %v10150_v12 = vrot.slane %v2373_v37, %v8091_v13  ;;  %v12859_v27 = vld [vmem:[#allocation182_spill] sm:$0xff]  ;;  %v12860_v39 = vld [vmem:[#allocation43_spill] sm:$0xff]  ;;  %v10162_v46 = vpop.permute.xlu1 %1876  ;;  %v10167_v5 = vrot.slane %v2184_v38, %v8091_v13 }
 0x3de   : > { %v2076_v11 = vcombine.low %v12856_v53, %v12855_v51  ;;  %v2454_v19 = vcombine.low %v12860_v39, %v12859_v27  ;;  %v12862_v17 = vld [vmem:[#allocation61_spill] sm:$0xff]  ;;  %12863 = vst [vmem:[#allocation12_spill] sm:$0xff] %v10162_v46  ;;  %v10164_v51 = vpop.permute.xlu0 %1690  ;;  %v10170_v37 = vrot.slane %v2238_v1, %v8091_v13  ;;  %v10176_v53 = vrot.slane %v2202_v3, %v8091_v13  ;;  %v12866_v22 = vld [vmem:[#allocation83_spill] sm:$0xff]  ;;  %v12867_v27 = vld [vmem:[#allocation46_spill] sm:$0xff] }
 0x3df   : > { %v2400_v15 = vcombine.low %v12862_v17, %v12861_v62  ;;  %12864 = vst [vmem:[#allocation164_spill] sm:$0xff] %v10164_v51  ;;  %v6844_v33 = vcombine.high %v10105_v49, %v10150_v12  ;;  %v10179_v62 = vrot.slane %v2256_v63, %v8091_v13  ;;  %v2472_v39 = vcombine.low %v12867_v27, %v12866_v22  ;;  %v12868_v38 = vld [vmem:[#allocation130_spill] sm:$0xff]  ;;  %v12872_v27 = vld [vmem:[#allocation184_spill] sm:$0xff] }
 0x3e0   : > { %12865 = vst [vmem:[#allocation37_spill] sm:$0xff] %v10176_v53  ;;  %1716 = vrot.lane.b32.xlu1 %v12868_v38, %s7436_s29  ;;  %1986 = vrot.lane.b32.xlu0 %v9400_v18, %s7436_s29  ;;  %v10188_v1 = vrot.slane %v2778_v50, %v8091_v13  ;;  %v10191_v20 = vrot.slane %v2076_v11, %v8091_v13  ;;  %v12873_v51 = vld [vmem:[#allocation62_spill] sm:$0xff]  ;;  %v12875_v50 = vld [vmem:[#allocation52_spill] sm:$0xff] }
 0x3e1   : > { %v10194_v3 = vrot.slane %v2796_v9, %v8091_v13  ;;  %v4280_v63 = vrot.slane %v6844_v33, %v12633_v57  ;;  %v10198_v17 = vrot.slane %v2454_v19, %v8091_v13  ;;  %v10201_v22 = vrot.slane %v2400_v15, %v8091_v13  ;;  %v1042_v43 = vpop.permute.xlu1 %1041  ;;  %v12877_v9 = vld [vmem:[#allocation242_spill] sm:$0xff] }
 0x3e2   : > { %12869 = vst [vmem:[#allocation166_spill] sm:$0xff] %v10188_v1  ;;  %v2310_v46 = vcombine.low %v12873_v51, %v12872_v27  ;;  %v2670_v4 = vcombine.low %v12875_v50, %v12874_v55  ;;  %v1885_v11 = vpop.permute.xlu0 %1884  ;;  %v2031_v10 = vcombine.low %v12876_v34, %v1042_v43  ;;  %v10210_v33 = vcombine.low %v9689_v58, %v4271_v42  ;;  %v12880_v1 = vld [vmem:[#allocation64_spill] sm:$0xff]  ;;  %v12881_v27 = vld [vmem:[#allocation187_spill] sm:$0xff]  ;;  %v12884_v58 = vld [vmem:[#allocation70_spill] sm:$0xff] }
 0x3e3   : > { %12870 = vst [vmem:[#allocation42_spill] sm:$0xff] %v10194_v3  ;;  %12871 = vst [vmem:[#allocation169_spill] sm:$0xff] %v10201_v22  ;;  %v2103_v7 = vcombine.low %v12877_v9, %v1885_v11  ;;  %v4394_v19 = vcombine.low %v4280_v63, %v9661_v29  ;;  %v10214_v15 = vrot.slane %v2472_v39, %v8091_v13  ;;  %v12879_v22 = vld [vmem:[#allocation186_spill] sm:$0xff]  ;;  %v12883_v34 = vld [vmem:[#allocation188_spill] sm:$0xff] }
 0x3e4   : > { %12878 = vst [vmem:[#allocation50_spill] sm:$0xff] %v10210_v33  ;;  %v2994_v51 = vcombine.low %v12880_v1, %v12879_v22  ;;  %v2688_v55 = vcombine.low %v12882_v26, %v12881_v27  ;;  %1908 = vrot.lane.b32.xlu1 %v12868_v38, %s7440_s6  ;;  %1998 = vrot.lane.b32.xlu0 %v9400_v18, %s7440_s6  ;;  %v12886_v26 = vld [vmem:[#allocation96_spill] sm:$0xff]  ;;  %v12887_v22 = vld [vmem:[#allocation59_spill] sm:$0xff]  ;;  %v12888_v50 = vld [vmem:[#allocation189_spill] sm:$0xff] }
 0x3e5   : > { %v3012_v43 = vcombine.low %v12884_v58, %v12883_v34  ;;  %v2038_v29 = vrot.slane %v2031_v10, %v8091_v13  ;;  %v10228_v42 = vrot.slane %v2103_v7, %v8091_v13  ;;  %v10231_v39 = vpack.i.bf16 %v4394_v19, %v10210_v33  ;;  %v12889_v11 = vld [vmem:[#allocation81_spill] sm:$0xff]  ;;  %v12890_v9 = vld [vmem:[#allocation190_spill] sm:$0xff]  ;;  %v1234_v58 = vpop.permute.xlu1 %1233  ;;  %v12893_v19 = vld [vmem:[#allocation191_spill] sm:$0xff] }
 0x3e6   : > { %v10234_v1 = vrot.slane %v2310_v46, %v8091_v13  ;;  %v2292_v38 = vcombine.low %v12887_v22, %v12886_v26  ;;  %v2616_v18 = vcombine.low %v12889_v11, %v12888_v50  ;;  %v12891_v27 = vld [vmem:[#allocation90_spill] sm:$0xff]  ;;  %v10242_v10 = vpop.permute.xlu0 %1882  ;;  %v10245_v7 = vrot.slane %v2670_v4, %v8091_v13  ;;  %v12894_v33 = vld [vmem:[#allocation132_spill] sm:$0xff] }
 0x3e7   : > { %12885 = vst [vmem:[#allocation171_spill] sm:$0xff] %v10231_v39  ;;  %v2418_v34 = vcombine.low %v12891_v27, %v12890_v9  ;;  %12892 = vst [vmem:[#allocation45_spill] sm:$0xff] %v10242_v10  ;;  %v2634_v3 = vcombine.low %v12894_v33, %v12893_v19  ;;  %v3805_v46 = vcombine.low %v10133_v35, %v2038_v29  ;;  %v12896_v11 = vld [vmem:[#allocation222_spill] sm:$0xff]  ;;  %v12897_v27 = vld [vmem:[#allocation140_spill] sm:$0xff] }
 0x3e8   : > { %v10253_v22 = vrot.slane %v2994_v51, %v8091_v13  ;;  %v6825_v50 = vcombine.high %v10133_v35, %v2038_v29  ;;  %v2049_v9 = vcombine.low %v12896_v11, %v1234_v58  ;;  %1720 = vrot.lane.b32.xlu1 %v12897_v27, %s7436_s29  ;;  %v12898_v4 = vld [vmem:[#allocation26_spill] sm:$0xff]  ;;  %v10262_v33 = vrot.slane %v2688_v55, %v8091_v13  ;;  %v12900_v26 = vld [vmem:[#allocation192_spill] sm:$0xff]  ;;  %v12901_v10 = vld [vmem:[#allocation67_spill] sm:$0xff] }
 0x3e9   : > { %1718 = vrot.lane.b32.xlu0 %v12898_v4, %s7436_s29  ;;  %v10265_v19 = vrot.slane %v3012_v43, %v8091_v13  ;;  %v2886_v51 = vcombine.low %v12901_v10, %v12900_v26  ;;  %v10273_v35 = vrot.slane %v2292_v38, %v8091_v13  ;;  %v10276_v29 = vrot.slane %v2616_v18, %v8091_v13  ;;  %v10282_v11 = vpop.permute.xlu1 %1688  ;;  %v12908_v10 = vld [vmem:[#allocation193_spill] sm:$0xff]  ;;  %v12935_v39 = vld [vmem:[#allocation202_spill] sm:$0xff] }
 0x3ea   : > { %12895 = vst [vmem:[#allocation240_spill] sm:$0xff] %v10253_v22  ;;  %v10270_v22 = vrot.slane %v3805_v46, %v12633_v57  ;;  %v10279_v58 = vrot.slane %v2418_v34, %v8091_v13  ;;  %v2056_v55 = vrot.slane %v2049_v9, %v8091_v13  ;;  %12906 = vst [vmem:[#allocation174_spill] sm:$0xff] %v10282_v11  ;;  %v1052_v43 = vpop.permute.xlu0 %1051  ;;  %v12909_v46 = vld [vmem:[#allocation88_spill] sm:$0xff]  ;;  %v12918_v11 = vld [vmem:[#allocation197_spill] sm:$0xff] }
 0x3eb   : > { %12899 = vst [vmem:[#allocation172_spill] sm:$0xff] %v10265_v19  ;;  %12903 = vst [vmem:[#allocation129_spill] sm:$0xff] %v10273_v35  ;;  %v10285_v19 = vrot.slane %v2634_v3, %v8091_v13  ;;  %v3210_v26 = vcombine.low %v12909_v46, %v12908_v10  ;;  %v2571_v18 = vcombine.low %v12910_v16, %v1052_v43  ;;  %v12912_v10 = vld [vmem:[#allocation194_spill] sm:$0xff]  ;;  %v12913_v46 = vld [vmem:[#allocation75_spill] sm:$0xff] }
 0x3ec   : > { %12902 = vst [vmem:[#allocation28_spill] sm:$0xff] %v10270_v22  ;;  %12904 = vst [vmem:[#allocation173_spill] sm:$0xff] %v10276_v29  ;;  %v3918_v29 = vrot.slane %v6825_v50, %v12633_v57  ;;  %v3821_v34 = vcombine.low %v10156_v23, %v2056_v55  ;;  %v6826_v9 = vcombine.high %v10156_v23, %v2056_v55  ;;  %4289 = vrot.lane.b32.xlu1 %v4280_v63, %s7442_s7  ;;  %v12914_v22 = vld [vmem:[#allocation195_spill] sm:$0xff]  ;;  %v12917_v23 = vld [vmem:[#allocation85_spill] sm:$0xff] }
 0x3ed   : > { %12905 = vst [vmem:[#allocation47_spill] sm:$0xff] %v10279_v58  ;;  %12907 = vst [vmem:[#allocation31_spill] sm:$0xff] %v10285_v19  ;;  %1910 = vrot.lane.b32.xlu0 %v12898_v4, %s7440_s6  ;;  %v10299_v3 = vrot.slane %v2886_v51, %v8091_v13  ;;  %v2904_v38 = vcombine.low %v12913_v46, %v12912_v10  ;;  %v12915_v16 = vld [vmem:[#allocation95_spill] sm:$0xff]  ;;  %v10306_v50 = vrot.slane %v2571_v18, %v8091_v13  ;;  %v12922_v46 = vld [vmem:[#allocation198_spill] sm:$0xff] }
 0x3ee   : > { %v3228_v43 = vcombine.low %v12915_v16, %v12914_v22  ;;  %v2508_v55 = vcombine.low %v12917_v23, %v12916_v48  ;;  %v12919_v4 = vld [vmem:[#allocation103_spill] sm:$0xff]  ;;  %v10313_v63 = vrot.slane %v3821_v34, %v12633_v57  ;;  %v3928_v51 = vrot.slane %v6826_v9, %v12633_v57  ;;  %v1244_v10 = vpop.permute.xlu0 %1243  ;;  %v12928_v23 = vld [vmem:[#allocation245_spill] sm:$0xff] }
 0x3ef   : > { %12911 = vst [vmem:[#allocation175_spill] sm:$0xff] %v10299_v3  ;;  %v2832_v19 = vcombine.low %v12919_v4, %v12918_v11  ;;  %v10316_v3 = vpop.permute.xlu1 %1880  ;;  %v12923_v58 = vld [vmem:[#allocation99_spill] sm:$0xff]  ;;  %v3102_v48 = vcombine.low %v12927_v45, %v12926_v44  ;;  %v2589_v31 = vcombine.low %v12928_v23, %v1244_v10  ;;  %v6855_v9 = vcombine.high %v10117_v40, %v10306_v50  ;;  %v12930_v4 = vld [vmem:[#allocation66_spill] sm:$0xff]  ;;  %v12936_v44 = vld [vmem:[#allocation113_spill] sm:$0xff] }
 0x3f0   : > { %12920 = vst [vmem:[#allocation49_spill] sm:$0xff] %v10313_v63  ;;  %12921 = vst [vmem:[#allocation176_spill] sm:$0xff] %v10316_v3  ;;  %v2526_v22 = vcombine.low %v12923_v58, %v12922_v46  ;;  %v12924_v16 = vld [vmem:[#allocation199_spill] sm:$0xff]  ;;  %v12931_v3 = vld [vmem:[#allocation101_spill] sm:$0xff]  ;;  %v3120_v45 = vcombine.low %v12936_v44, %v12935_v39  ;;  %v10343_v11 = vrot.slane %v3210_v26, %v8091_v13 }
 0x3f1   : > { %v12925_v18 = vld [vmem:[#allocation127_spill] sm:$0xff]  ;;  %1722 = vrot.lane.b32.xlu0 %v12930_v4, %s7436_s29  ;;  %v3919_v6 = vcombine.low %v12931_v3, %v3918_v29  ;;  %v12932_v58 = vld [vmem:[#allocation116_spill] sm:$0xff]  ;;  %v12938_v23 = vld [vmem:[#allocation117_spill] sm:$0xff]  ;;  %v10340_v34 = vrot.slane %v2589_v31, %v8091_v13  ;;  %v10346_v63 = vrot.slane %v2904_v38, %v8091_v13  ;;  %v10360_v31 = vrot.slane %v2508_v55, %v8091_v13 }
 0x3f2   : > { %v2742_v35 = vcombine.low %v12925_v18, %v12924_v16  ;;  %v3936_v46 = vcombine.low %v3928_v51, %v12932_v58  ;;  %v12934_v16 = vld [vmem:[#allocation110_spill] sm:$0xff]  ;;  %v12937_v10 = vld [vmem:[#allocation203_spill] sm:$0xff]  ;;  %12939 = vst [vmem:[#allocation35_spill] sm:$0xff] %v10343_v11  ;;  %v12940_v29 = vld [vmem:[#allocation204_spill] sm:$0xff]  ;;  %v10363_v26 = vrot.slane %v2832_v19, %v8091_v13  ;;  %v10368_v44 = vrot.slane %v2526_v22, %v8091_v13 }
 0x3f3   : > { %v2850_v18 = vcombine.low %v12934_v16, %v12933_v8  ;;  %v3426_v53 = vcombine.low %v12938_v23, %v12937_v10  ;;  %v12941_v3 = vld [vmem:[#allocation119_spill] sm:$0xff]  ;;  %v10350_v58 = vpop.permute.xlu1 %1878  ;;  %v10352_v8 = vpop.permute.xlu0 %1694  ;;  %v10357_v16 = vrot.slane %v3228_v43, %v8091_v13  ;;  %v6856_v38 = vcombine.high %v10153_v60, %v10340_v34 }
 0x3f4   : > { %v2724_v51 = vcombine.low %v12941_v3, %v12940_v29  ;;  %12942 = vst [vmem:[#allocation93_spill] sm:$0xff] %v10350_v58  ;;  %v10354_v39 = vpack.i.bf16 %v3936_v46, %v3919_v6  ;;  %12944 = vst [vmem:[#allocation51_spill] sm:$0xff] %v10363_v26  ;;  %v10371_v10 = vrot.slane %v2742_v35, %v8091_v13  ;;  %v12952_v46 = vld [vmem:[#allocation205_spill] sm:$0xff]  ;;  %v12954_v29 = vld [vmem:[#allocation206_spill] sm:$0xff] }
 0x3f5   : > { %12943 = vst [vmem:[#allocation177_spill] sm:$0xff] %v10357_v16  ;;  %12945 = vst [vmem:[#allocation178_spill] sm:$0xff] %v10368_v44  ;;  %v10374_v6 = vrot.slane %v3102_v48, %v8091_v13  ;;  %v4573_v43 = vrot.slane %v6855_v9, %v12633_v57  ;;  %1912 = vrot.lane.b32.xlu0 %v12897_v27, %s7440_s6  ;;  %v10380_v19 = vrot.slane %v2850_v18, %v8091_v13  ;;  %v12953_v9 = vld [vmem:[#allocation126_spill] sm:$0xff]  ;;  %v12955_v27 = vld [vmem:[#allocation139_spill] sm:$0xff] }
 0x3f6   : > { %12946 = vst [vmem:[#allocation39_spill] sm:$0xff] %v10371_v10  ;;  %v10383_v55 = vrot.slane %v3120_v45, %v8091_v13  ;;  %v10386_v22 = vrot.slane %v3426_v53, %v8091_v13  ;;  %v10389_v35 = vrot.slane %v6856_v38, %v12633_v57  ;;  %v10392_v48 = vrot.slane %v2724_v51, %v8091_v13  ;;  %v12956_v53 = vld [vmem:[#allocation207_spill] sm:$0xff]  ;;  %v12958_v38 = vld [vmem:[#allocation208_spill] sm:$0xff]  ;;  %v12960_v51 = vld [vmem:[#allocation209_spill] sm:$0xff] }
 0x3f7   : > { %12947 = vst [vmem:[#allocation179_spill] sm:$0xff] %v10374_v6  ;;  %12948 = vst [vmem:[#allocation53_spill] sm:$0xff] %v10380_v19  ;;  %v3444_v23 = vcombine.low %v12953_v9, %v12952_v46  ;;  %v3318_v3 = vcombine.low %v12955_v27, %v12954_v29  ;;  %v3872_v18 = vcombine.low %v10009_v52, %v10012_v54  ;;  %v1046_v45 = vpop.permute.xlu1 %1045  ;;  %v10400_v58 = vpop.permute.xlu0 %1886  ;;  %v12959_v6 = vld [vmem:[#allocation144_spill] sm:$0xff]  ;;  %v12961_v16 = vld [vmem:[#allocation155_spill] sm:$0xff] }
 0x3f8   : > { %12949 = vst [vmem:[#allocation180_spill] sm:$0xff] %v10383_v55  ;;  %12950 = vst [vmem:[#allocation48_spill] sm:$0xff] %v10386_v22  ;;  %v12957_v22 = vld [vmem:[#allocation136_spill] sm:$0xff]  ;;  %v3336_v26 = vcombine.low %v12959_v6, %v12958_v38  ;;  %v3066_v11 = vcombine.low %v12961_v16, %v12960_v51  ;;  %v12963_v9 = vld [vmem:[#allocation210_spill] sm:$0xff]  ;;  %v3856_v52 = vcombine.low %v9969_v0, %v9974_v47 }
 0x3f9   : > { %12951 = vst [vmem:[#allocation181_spill] sm:$0xff] %v10392_v48  ;;  %v3048_v19 = vcombine.low %v12957_v22, %v12956_v53  ;;  %v12962_v48 = vld [vmem:[#allocation69_spill] sm:$0xff]  ;;  %1914 = vrot.lane.b32.xlu0 %v12930_v4, %s7440_s6  ;;  %v10416_v54 = vcombine.low %v9746_v32, %v4573_v43  ;;  %v4696_v6 = vcombine.low %v10389_v35, %v9714_v56  ;;  %v12965_v22 = vld [vmem:[#allocation211_spill] sm:$0xff]  ;;  %v12967_v53 = vld [vmem:[#allocation212_spill] sm:$0xff] }
 0x3fa   : > { %v2247_v46 = vcombine.low %v12962_v48, %v1046_v45  ;;  %v12964_v55 = vld [vmem:[#allocation145_spill] sm:$0xff]  ;;  %v12966_v27 = vld [vmem:[#allocation143_spill] sm:$0xff]  ;;  %v12971_v0 = vld [vmem:[#allocation214_spill] sm:$0xff]  ;;  %v10434_v56 = vrot.slane %v3872_v18, %v12633_v57  ;;  %v10454_v18 = vrot.slane %v3066_v11, %v8091_v13 }
 0x3fb   : > { %v2940_v29 = vcombine.low %v12964_v55, %v12963_v9  ;;  %v3642_v16 = vcombine.low %v12966_v27, %v12965_v22  ;;  %v12968_v48 = vld [vmem:[#allocation147_spill] sm:$0xff]  ;;  %v12969_v38 = vld [vmem:[#allocation213_spill] sm:$0xff]  ;;  %v12970_v55 = vld [vmem:[#allocation146_spill] sm:$0xff]  ;;  %v1238_v44 = vpop.permute.xlu1 %1237  ;;  %v10436_v22 = vpop.permute.xlu0 %1055  ;;  %v10439_v27 = vpack.i.bf16 %v4696_v6, %v10416_v54  ;;  %v3870_v6 = vrot.slane %v3856_v52, %v12633_v57 }
 0x3fc   : > { %v2958_v45 = vcombine.low %v12968_v48, %v12967_v53  ;;  %v3660_v51 = vcombine.low %v12970_v55, %v12969_v38  ;;  %v10427_v47 = vrot.slane %v2247_v46, %v8091_v13  ;;  %v12972_v4 = vld [vmem:[#allocation149_spill] sm:$0xff]  ;;  %v12973_v32 = vld [vmem:[#allocation215_spill] sm:$0xff]  ;;  %v12974_v43 = vld [vmem:[#allocation148_spill] sm:$0xff]  ;;  %12975 = vst [vmem:[#allocation58_spill] sm:$0xff] %v10434_v56  ;;  %v10442_v53 = vrot.slane %v3444_v23, %v8091_v13 }
 0x3fd   : > { %v3534_v9 = vcombine.low %v12972_v4, %v12971_v0  ;;  %v3264_v10 = vcombine.low %v12974_v43, %v12973_v32  ;;  %v10445_v46 = vrot.slane %v3318_v3, %v8091_v13  ;;  %v10448_v48 = vrot.slane %v3048_v19, %v8091_v13  ;;  %12978 = vst [vmem:[#allocation183_spill] sm:$0xff] %v10454_v18  ;;  %v12979_v0 = vld [vmem:[#allocation230_spill] sm:$0xff]  ;;  %v12984_v4 = vld [vmem:[#allocation123_spill] sm:$0xff]  ;;  %v12985_v32 = vld [vmem:[#allocation216_spill] sm:$0xff] }
 0x3fe   : > { %v10451_v38 = vrot.slane %v3336_v26, %v8091_v13  ;;  %v10457_v55 = vrot.slane %v2940_v29, %v8091_v13  ;;  %v2265_v23 = vcombine.low %v12979_v0, %v1238_v44  ;;  %3987 = vrot.lane.b32.xlu0 %v10057_v24, %s7442_s7  ;;  %v10464_v3 = vrot.slane %v3642_v16, %v8091_v13  ;;  %v12987_v0 = vld [vmem:[#allocation217_spill] sm:$0xff]  ;;  %v12989_v18 = vld [vmem:[#allocation120_spill] sm:$0xff] }
 0x3ff   : > { %12976 = vst [vmem:[#allocation182_spill] sm:$0xff] %v10445_v46  ;;  %12977 = vst [vmem:[#allocation43_spill] sm:$0xff] %v10448_v48  ;;  %v10467_v19 = vrot.slane %v2958_v45, %v8091_v13  ;;  %v10470_v26 = vrot.slane %v3660_v51, %v8091_v13  ;;  %v6837_v11 = vcombine.high %v10170_v37, %v10427_v47  ;;  %v1693_v52 = vpop.permute.xlu1 %1692  ;;  %v10481_v16 = vpop.permute.xlu0 %1247  ;;  %v12986_v51 = vld [vmem:[#allocation150_spill] sm:$0xff]  ;;  %v12991_v48 = vld [vmem:[#allocation239_spill] sm:$0xff] }
 0x400   : > { %12980 = vst [vmem:[#allocation61_spill] sm:$0xff] %v10464_v3  ;;  %v10475_v29 = vrot.slane %v3534_v9, %v8091_v13  ;;  %v10478_v44 = vrot.slane %v3264_v10, %v8091_v13  ;;  %v2272_v24 = vrot.slane %v2265_v23, %v8091_v13  ;;  %v4014_v45 = vcombine.low %v10434_v56, %v12984_v4  ;;  %v12990_v9 = vld [vmem:[#allocation152_spill] sm:$0xff]  ;;  %v12992_v4 = vld [vmem:[#allocation82_spill] sm:$0xff]  ;;  %v12996_v56 = vld [vmem:[#allocation221_spill] sm:$0xff] }
 0x401   : > { %12981 = vst [vmem:[#allocation83_spill] sm:$0xff] %v10470_v26  ;;  %v3552_v43 = vcombine.low %v12986_v51, %v12985_v32  ;;  %v12988_v26 = vld [vmem:[#allocation154_spill] sm:$0xff]  ;;  %v2085_v10 = vcombine.low %v12991_v48, %v1693_v52  ;;  %v4205_v23 = vcombine.low %v10105_v49, %v10150_v12  ;;  %v10499_v32 = vcombine.low %v12992_v4, %v3870_v6  ;;  %v12994_v51 = vld [vmem:[#allocation219_spill] sm:$0xff] }
 0x402   : > { %12982 = vst [vmem:[#allocation46_spill] sm:$0xff] %v10475_v29  ;;  %12983 = vst [vmem:[#allocation130_spill] sm:$0xff] %v10478_v44  ;;  %v3174_v3 = vcombine.low %v12988_v26, %v12987_v0  ;;  %v3156_v29 = vcombine.low %v12990_v9, %v12989_v18  ;;  %v4049_v44 = vcombine.low %v10179_v62, %v2272_v24  ;;  %7130 = vrot.lane.b32.xlu0 %v10354_v39, %s7442_s7  ;;  %v12995_v26 = vld [vmem:[#allocation151_spill] sm:$0xff]  ;;  %v12997_v18 = vld [vmem:[#allocation153_spill] sm:$0xff] }
 0x403   : > { %v6838_v46 = vcombine.high %v10179_v62, %v2272_v24  ;;  %12993 = vst [vmem:[#allocation184_spill] sm:$0xff] %v10499_v32  ;;  %v3282_v0 = vcombine.low %v12995_v26, %v12994_v51  ;;  %v3480_v9 = vcombine.low %v12997_v18, %v12996_v56  ;;  %v4125_v48 = vrot.slane %v6837_v11, %v12633_v57  ;;  %v1050_v62 = vpop.permute.xlu1 %1049  ;;  %v10509_v24 = vpop.permute.xlu0 %1698  ;;  %v13000_v11 = vld [vmem:[#allocation223_spill] sm:$0xff]  ;;  %v13003_v26 = vld [vmem:[#allocation157_spill] sm:$0xff] }
 0x404   : > { %v2092_v49 = vrot.slane %v2085_v10, %v8091_v13  ;;  %v4189_v12 = vcombine.low %v10102_v21, %v10108_v41  ;;  %v10512_v39 = vrot.slane %v4049_v44, %v12633_v57  ;;  %v7134_v6 = vpack.i.bf16 %v4014_v45, %v10499_v32  ;;  %v13001_v10 = vld [vmem:[#allocation168_spill] sm:$0xff]  ;;  %v13002_v41 = vld [vmem:[#allocation225_spill] sm:$0xff] }
 0x405   : > { %v4134_v52 = vrot.slane %v6838_v46, %v12633_v57  ;;  %v10517_v4 = vrot.slane %v3552_v43, %v8091_v13  ;;  %v10520_v56 = vrot.slane %v3174_v3, %v8091_v13  ;;  %v3750_v51 = vcombine.low %v13001_v10, %v13000_v11  ;;  %v13009_v10 = vld [vmem:[#allocation238_spill] sm:$0xff] }
 0x406   : > { %12998 = vst [vmem:[#allocation62_spill] sm:$0xff] %v10512_v39  ;;  %v3838_v21 = vcombine.low %v10191_v20, %v2092_v49  ;;  %v3372_v18 = vcombine.low %v13003_v26, %v13002_v41  ;;  %v10528_v44 = vrot.slane %v4205_v23, %v12633_v57  ;;  %4065 = vrot.lane.b32.xlu1 %v10512_v39, %s7440_s6  ;;  %v13014_v39 = vld [vmem:[#allocation244_spill] sm:$0xff] }
 0x407   : > { %12999 = vst [vmem:[#allocation185_spill] sm:$0xff] %v10520_v56  ;;  %7135 = vrot.lane.b32.xlu0 %v7134_v6, %s7440_s6  ;;  %v13006_v3 = vcombine.low %v10114_v28, %v10228_v42  ;;  %v10545_v23 = vcombine.low %v9698_v2, %v4125_v48  ;;  %v4238_v41 = vcombine.low %v4134_v52, %v13009_v10  ;;  %v1242_v32 = vpop.permute.xlu1 %1241  ;;  %v1889_v45 = vpop.permute.xlu0 %1888  ;;  %v13013_v2 = vld [vmem:[#allocation236_spill] sm:$0xff] }
 0x408   : > { %13004 = vst [vmem:[#allocation52_spill] sm:$0xff] %v10528_v44  ;;  %v10542_v11 = vrot.slane %v3838_v21, %v12633_v57  ;;  %v10549_v26 = vrot.slane %v3156_v29, %v8091_v13  ;;  %v10552_v46 = vrot.slane %v3282_v0, %v8091_v13  ;;  %v10555_v6 = vrot.slane %v3480_v9, %v8091_v13  ;;  %v13016_v9 = vld [vmem:[#allocation226_spill] sm:$0xff] }
 0x409   : > { %v10539_v43 = vrot.slane %v13006_v3, %v12633_v57  ;;  %v4203_v3 = vrot.slane %v4189_v12, %v12633_v57  ;;  %v2481_v48 = vcombine.low %v13013_v2, %v1242_v32  ;;  %v2319_v10 = vcombine.low %v13014_v39, %v1889_v45 }
 0x40a   : > { %13008 = vst [vmem:[#allocation242_spill] sm:$0xff] %v10542_v11  ;;  %13010 = vst [vmem:[#allocation186_spill] sm:$0xff] %v10549_v26  ;;  %v7144_v29 = vpack.i.bf16 %v4238_v41, %v10545_v23  ;;  %v10564_v26 = vrot.slane %v3750_v51, %v8091_v13  ;;  %v10567_v0 = vrot.slane %v3372_v18, %v8091_v13  ;;  %4143 = vrot.lane.b32.xlu1 %v4134_v52, %s7436_s29  ;;  %v13019_v52 = vld [vmem:[#allocation247_spill] sm:$0xff] }
 0x40b   : > { %13007 = vst [vmem:[#allocation220_spill] sm:$0xff] %v10539_v43  ;;  %13011 = vst [vmem:[#allocation64_spill] sm:$0xff] %v10552_v46  ;;  %v13018_v46 = vld [vmem:[#allocation84_spill] sm:$0xff]  ;;  %v6828_v21 = vcombine.high %v10191_v20, %v2092_v49  ;;  %v2488_v32 = vrot.slane %v2481_v48, %v8091_v13  ;;  %v10576_v39 = vrot.slane %v2319_v10, %v8091_v13  ;;  %7140 = vrot.lane.b32.xlu0 %v10111_v14, %s7436_s29  ;;  %v1054_v49 = vpop.permute.xlu1 %1053  ;;  %v10588_v45 = vpop.permute.xlu0 %1059  ;;  %v13055_v11 = vld [vmem:[#allocation163_spill] sm:$0xff] }
 0x40c   : > { %13012 = vst [vmem:[#allocation187_spill] sm:$0xff] %v10555_v6  ;;  %13015 = vst [vmem:[#allocation55_spill] sm:$0xff] %v10564_v26  ;;  %v13017_v6 = vld [vmem:[#allocation165_spill] sm:$0xff]  ;;  %v2463_v56 = vcombine.low %v13018_v46, %v1050_v62  ;;  %v4316_v51 = vcombine.low %v10528_v44, %v9637_v61  ;;  %v4491_v18 = vcombine.low %v10117_v40, %v10306_v50  ;;  %v13022_v50 = vld [vmem:[#allocation159_spill] sm:$0xff] }
 0x40d   : > { %v3498_v12 = vcombine.low %v13017_v6, %v13016_v9  ;;  %v4507_v62 = vcombine.low %v10153_v60, %v10340_v34  ;;  %v2193_v20 = vcombine.low %v13019_v52, %v10352_v8  ;;  %v10591_v46 = vcombine.low %v9686_v36, %v4203_v3  ;;  %v13021_v60 = vld [vmem:[#allocation227_spill] sm:$0xff]  ;;  %v13023_v8 = vld [vmem:[#allocation246_spill] sm:$0xff]  ;;  %v13028_v52 = vld [vmem:[#allocation241_spill] sm:$0xff] }
 0x40e   : > { %v6829_v14 = vcombine.high %v10114_v28, %v10228_v42  ;;  %v4351_v61 = vcombine.low %v10214_v15, %v2488_v32  ;;  %v6850_v41 = vcombine.high %v10214_v15, %v2488_v32  ;;  %v3390_v34 = vcombine.low %v13022_v50, %v13021_v60  ;;  %v13024_v36 = vld [vmem:[#allocation87_spill] sm:$0xff]  ;;  %7145 = vrot.lane.b32.xlu1 %v7144_v29, %s7442_s7  ;;  %v13031_v50 = vld [vmem:[#allocation250_spill] sm:$0xff]  ;;  %v13039_v40 = vld [vmem:[#allocation60_spill] sm:$0xff] }
 0x40f   : > { %13020 = vst [vmem:[#allocation188_spill] sm:$0xff] %v10591_v46  ;;  %v2211_v6 = vcombine.low %v13023_v8, %v10400_v58  ;;  %v10604_v2 = vrot.slane %v2463_v56, %v8091_v13  ;;  %v2679_v3 = vcombine.low %v13024_v36, %v1054_v49  ;;  %v3945_v28 = vrot.slane %v6828_v21, %v12633_v57  ;;  %v1246_v21 = vpop.permute.xlu1 %1245  ;;  %v1252_v9 = vpop.permute.xlu0 %1251 }
 0x410   : > { %v10610_v15 = vrot.slane %v6850_v41, %v12633_v57  ;;  %v7149_v42 = vpack.i.bf16 %v4316_v51, %v10591_v46  ;;  %v10614_v48 = vrot.slane %v4351_v61, %v12633_v57  ;;  %v4505_v10 = vrot.slane %v4491_v18, %v12633_v57 }
 0x411   : > { %v10618_v58 = vrot.slane %v4507_v62, %v12633_v57  ;;  %v10621_v56 = vrot.slane %v2193_v20, %v8091_v13  ;;  %v10624_v29 = vrot.slane %v2679_v3, %v8091_v13  ;;  %v10627_v32 = vrot.slane %v3498_v12, %v8091_v13  ;;  %v13057_v62 = vld [vmem:[#allocation160_spill] sm:$0xff] }
 0x412   : > { %13025 = vst [vmem:[#allocation70_spill] sm:$0xff] %v10614_v48  ;;  %v3952_v51 = vrot.slane %v6829_v14, %v12633_v57  ;;  %v2697_v49 = vcombine.low %v13028_v52, %v1246_v21  ;;  %4445 = vrot.lane.b32.xlu0 %v10610_v15, %s7436_s29  ;;  %v2218_v41 = vrot.slane %v2211_v6, %v8091_v13 }
 0x413   : > { %13026 = vst [vmem:[#allocation96_spill] sm:$0xff] %v10618_v58  ;;  %13027 = vst [vmem:[#allocation59_spill] sm:$0xff] %v10627_v32  ;;  %v6849_v60 = vcombine.high %v10198_v17, %v10604_v2  ;;  %v6861_v12 = vcombine.high %v10245_v7, %v10624_v29  ;;  %7150 = vrot.lane.b32.xlu1 %v7149_v42, %s7440_s6  ;;  %v10644_v14 = vrot.slane %v3390_v34, %v8091_v13  ;;  %v1697_v52 = vpop.permute.xlu1 %1696  ;;  %v10653_v18 = vpop.permute.xlu0 %1702 }
 0x414   : > { %v2805_v8 = vcombine.low %v13031_v50, %v10481_v16  ;;  %v2704_v36 = vrot.slane %v2697_v49, %v8091_v13  ;;  %v3953_v3 = vcombine.low %v3945_v28, %v3952_v51  ;;  %v4015_v6 = vcombine.low %v10167_v5, %v10621_v56 }
 0x415   : > { %v6834_v21 = vcombine.high %v10167_v5, %v10621_v56  ;;  %v10656_v42 = vcombine.low %v9730_v59, %v4505_v10  ;;  %v4618_v34 = vcombine.low %v10618_v58, %v9704_v25  ;;  %v4033_v16 = vcombine.low %v10170_v37, %v10427_v47  ;;  %v13033_v5 = vld [vmem:[#allocation37_spill] sm:$0xff]  ;;  %v13036_v37 = vld [vmem:[#allocation171_spill] sm:$0xff] }
 0x416   : > { %v4729_v28 = vrot.slane %v6861_v12, %v12633_v57  ;;  %v4653_v51 = vcombine.low %v10262_v33, %v2704_v36  ;;  %v6862_v49 = vcombine.high %v10262_v33, %v2704_v36  ;;  %4591 = vrot.lane.b32.xlu0 %v10389_v35, %s7442_s7  ;;  %v4016_v56 = vcombine.low %v13033_v5, %v2218_v41  ;;  %v13034_v59 = vld [vmem:[#allocation249_spill] sm:$0xff]  ;;  %v13037_v12 = vld [vmem:[#allocation231_spill] sm:$0xff] }
 0x417   : > { %13032 = vst [vmem:[#allocation189_spill] sm:$0xff] %v10656_v42  ;;  %v2787_v10 = vcombine.low %v13034_v59, %v10436_v22  ;;  %v4427_v50 = vrot.slane %v6849_v60, %v12633_v57  ;;  %v13035_v25 = vld [vmem:[#allocation89_spill] sm:$0xff]  ;;  %7155 = vrot.lane.b32.xlu1 %v13036_v37, %s7436_s29  ;;  %v10675_v47 = vrot.slane %v2805_v8, %v8091_v13  ;;  %v10690_v59 = vpop.permute.xlu0 %1894  ;;  %v13056_v58 = vld [vmem:[#allocation235_spill] sm:$0xff] }
 0x418   : > { %v2301_v61 = vcombine.low %v13035_v25, %v1697_v52  ;;  %v7159_v33 = vpack.i.bf16 %v13037_v12, %v3953_v3  ;;  %v10679_v36 = vrot.slane %v4653_v51, %v12633_v57  ;;  %v10682_v35 = vrot.slane %v6862_v49, %v12633_v57  ;;  %v10688_v52 = vpop.permute.xlu1 %1890  ;;  %v13040_v25 = vld [vmem:[#allocation5_spill] sm:$0xff]  ;;  %v13041_v51 = vld [vmem:[#allocation30_spill] sm:$0xff]  ;;  %v13044_v12 = vld [vmem:[#allocation11_spill] sm:$0xff] }
 0x419   : > { %v3021_v22 = vcombine.low %v13039_v40, %v1252_v9  ;;  %v4540_v8 = vcombine.low %v10610_v15, %v13040_v25  ;;  %v7169_v3 = vpack.i.bf16 %v4618_v34, %v10656_v42  ;;  %v3003_v37 = vcombine.low %v13041_v51, %v10588_v45  ;;  %v13043_v9 = vld [vmem:[#allocation54_spill] sm:$0xff]  ;;  %v13045_v34 = vld [vmem:[#allocation129_spill] sm:$0xff] }
 0x41a   : > { %13038 = vst [vmem:[#allocation81_spill] sm:$0xff] %v10679_v36  ;;  %v10686_v60 = vrot.slane %v2301_v61, %v8091_v13  ;;  %7160 = vrot.lane.b32.xlu0 %v7159_v33, %s7442_s7  ;;  %v10701_v61 = vcombine.low %v13043_v9, %v4729_v28  ;;  %v4842_v46 = vcombine.low %v10682_v35, %v13044_v12  ;;  %v13046_v45 = vld [vmem:[#allocation138_spill] sm:$0xff]  ;;  %v13052_v42 = vld [vmem:[#allocation161_spill] sm:$0xff] }
 0x41b   : > { %v4047_v30 = vrot.slane %v4033_v16, %v12633_v57  ;;  %v6835_v15 = vcombine.high %v13033_v5, %v2218_v41  ;;  %4367 = vrot.lane.b32.xlu1 %v10614_v48, %s7440_s6  ;;  %v10712_v33 = vcombine.low %v13046_v45, %v4427_v50  ;;  %v4030_v51 = vrot.slane %v4016_v56, %v12633_v57  ;;  %v13047_v9 = vld [vmem:[#allocation42_spill] sm:$0xff] }
 0x41c   : > { %v4171_v25 = vcombine.low %v13045_v34, %v10686_v60  ;;  %v2794_v28 = vrot.slane %v2787_v10, %v8091_v13  ;;  %v6868_v12 = vcombine.high %v13047_v9, %v10675_v47  ;;  %v10719_v16 = vpack.i.bf16 %v4842_v46, %v10701_v61  ;;  %v10733_v56 = vpop.permute.xlu1 %1057  ;;  %v10735_v10 = vpop.permute.xlu0 %1063  ;;  %v13051_v46 = vld [vmem:[#allocation233_spill] sm:$0xff] }
 0x41d   : > { %v13048_v41 = vcombine.low %v10234_v1, %v10576_v39  ;;  %v10728_v40 = vrot.slane %v3021_v22, %v8091_v13  ;;  %v7164_v45 = vpack.i.bf16 %v4540_v8, %v10712_v33  ;;  %v3588_v49 = vcombine.low %v13052_v42, %v13051_v46 }
 0x41e   : > { %v10731_v50 = vrot.slane %v4171_v25, %v12633_v57  ;;  %v4023_v48 = vrot.slane %v4015_v6, %v12633_v57  ;;  %v10744_v22 = vrot.slane %v3003_v37, %v8091_v13  ;;  %7170 = vrot.lane.b32.xlu0 %v7169_v3, %s7440_s6  ;;  %v13054_v25 = vld [vmem:[#allocation234_spill] sm:$0xff]  ;;  %v3696_v20 = vcombine.low %v13057_v62, %v13056_v58  ;;  %v13058_v6 = vld [vmem:[#allocation237_spill] sm:$0xff]  ;;  %v13063_v62 = vld [vmem:[#allocation172_spill] sm:$0xff] }
 0x41f   : > { %v10725_v5 = vrot.slane %v13048_v41, %v12633_v57  ;;  %v13053_v41 = vld [vmem:[#allocation252_spill] sm:$0xff]  ;;  %v3606_v44 = vcombine.low %v13055_v11, %v13054_v25  ;;  %v4108_v8 = vrot.slane %v6835_v15, %v12633_v57  ;;  %7165 = vrot.lane.b32.xlu1 %v7164_v45, %s7442_s7  ;;  %v4101_v37 = vrot.slane %v6834_v21, %v12633_v57  ;;  %v13060_v3 = vld [vmem:[#allocation137_spill] sm:$0xff]  ;;  %v13062_v11 = vld [vmem:[#allocation166_spill] sm:$0xff] }
 0x420   : > { %13050 = vst [vmem:[#allocation90_spill] sm:$0xff] %v10731_v50  ;;  %v2409_v43 = vcombine.low %v13053_v41, %v10509_v24  ;;  %v13059_v24 = vld [vmem:[#allocation162_spill] sm:$0xff]  ;;  %v4031_v41 = vcombine.low %v4023_v48, %v4030_v51  ;;  %v10759_v26 = vcombine.low %v13060_v3, %v4047_v30  ;;  %v4793_v25 = vcombine.low %v13062_v11, %v2794_v28  ;;  %v1250_v32 = vpop.permute.xlu1 %1249  ;;  %v10765_v42 = vpop.permute.xlu0 %1255  ;;  %v13064_v30 = vld [vmem:[#allocation240_spill] sm:$0xff] }
 0x421   : > { %13049 = vst [vmem:[#allocation190_spill] sm:$0xff] %v10725_v5  ;;  %v3714_v46 = vcombine.low %v13059_v24, %v13058_v6  ;;  %v6867_v58 = vcombine.high %v13062_v11, %v2794_v28  ;;  %v6880_v15 = vcombine.high %v13063_v62, %v10728_v40  ;;  %v4884_v45 = vrot.slane %v6868_v12, %v12633_v57  ;;  %v13065_v51 = vld [vmem:[#allocation92_spill] sm:$0xff] }
 0x422   : > { %13061 = vst [vmem:[#allocation191_spill] sm:$0xff] %v10759_v26  ;;  %v4809_v6 = vcombine.low %v13047_v9, %v10675_v47  ;;  %v10771_v48 = vrot.slane %v2409_v43, %v8091_v13  ;;  %v6879_v21 = vcombine.high %v13064_v30, %v10744_v22  ;;  %v2913_v24 = vcombine.low %v13065_v51, %v1250_v32 }
 0x423   : > { %7175 = vrot.lane.b32.xlu0 %v10439_v27, %s7436_s29  ;;  %v10779_v28 = vrot.slane %v3588_v49, %v8091_v13  ;;  %v10782_v3 = vrot.slane %v3606_v44, %v8091_v13  ;;  %v4335_v47 = vcombine.low %v10198_v17, %v10604_v2  ;;  %4893 = vrot.lane.b32.xlu1 %v4884_v45, %s7442_s7  ;;  %v13067_v17 = vld [vmem:[#allocation91_spill] sm:$0xff] }
 0x424   : > { %v4109_v43 = vcombine.low %v4101_v37, %v4108_v8  ;;  %v10788_v9 = vrot.slane %v3696_v20, %v8091_v13  ;;  %v10791_v32 = vrot.slane %v3714_v46, %v8091_v13  ;;  %v10794_v27 = vrot.slane %v2913_v24, %v8091_v13  ;;  %v1701_v11 = vpop.permute.xlu1 %1700  ;;  %v10801_v8 = vpop.permute.xlu0 %1706  ;;  %v13069_v37 = vld [vmem:[#allocation169_spill] sm:$0xff] }
 0x425   : > { %v7179_v49 = vpack.i.bf16 %v10759_v26, %v4031_v41  ;;  %v4807_v44 = vrot.slane %v4793_v25, %v12633_v57  ;;  %v4875_v12 = vrot.slane %v6867_v58, %v12633_v57  ;;  %v2427_v2 = vcombine.low %v13067_v17, %v10688_v52  ;;  %v13071_v17 = vld [vmem:[#allocation72_spill] sm:$0xff] }
 0x426   : > { %13066 = vst [vmem:[#allocation132_spill] sm:$0xff] %v10788_v9  ;;  %v10804_v20 = vrot.slane %v6880_v15, %v12633_v57  ;;  %v10807_v46 = vrot.slane %v4809_v6, %v12633_v57  ;;  %v4317_v51 = vcombine.low %v13069_v37, %v10771_v48  ;;  %v5177_v41 = vrot.slane %v6879_v21, %v12633_v57  ;;  %v13070_v15 = vld [vmem:[#allocation251_spill] sm:$0xff] }
 0x427   : > { %v4955_v25 = vcombine.low %v10346_v63, %v10794_v27  ;;  %7180 = vrot.lane.b32.xlu0 %v7179_v49, %s7440_s6  ;;  %v10816_v52 = vrot.slane %v4335_v47, %v12633_v57  ;;  %v6846_v58 = vcombine.high %v13069_v37, %v10771_v48  ;;  %v2517_v24 = vcombine.low %v13070_v15, %v1701_v11  ;;  %v13072_v49 = vld [vmem:[#allocation141_spill] sm:$0xff]  ;;  %v13074_v15 = vld [vmem:[#allocation94_spill] sm:$0xff] }
 0x428   : > { %13068 = vst [vmem:[#allocation222_spill] sm:$0xff] %v10807_v46  ;;  %4669 = vrot.lane.b32.xlu1 %v10679_v36, %s7440_s6  ;;  %v7184_v6 = vpack.i.bf16 %v10545_v23, %v4109_v43  ;;  %v6841_v21 = vcombine.high %v10234_v1, %v10576_v39  ;;  %v2625_v5 = vcombine.low %v13071_v17, %v10653_v18  ;;  %v1893_v23 = vpop.permute.xlu1 %1892  ;;  %v1897_v43 = vpop.permute.xlu0 %1896  ;;  %v13075_v39 = vld [vmem:[#allocation6_spill] sm:$0xff]  ;;  %v13076_v17 = vld [vmem:[#allocation20_spill] sm:$0xff] }
 0x429   : > { %v4998_v50 = vcombine.low %v4884_v45, %v13072_v49  ;;  %v10830_v47 = vrot.slane %v4955_v25, %v12633_v57  ;;  %v6840_v48 = vcombine.high %v13045_v34, %v10686_v60  ;;  %v2434_v11 = vrot.slane %v2427_v2, %v8091_v13  ;;  %v13078_v60 = vld [vmem:[#allocation56_spill] sm:$0xff] }
 0x42a   : > { %v10836_v37 = vrot.slane %v2517_v24, %v8091_v13  ;;  %v5300_v1 = vcombine.low %v10804_v20, %v13074_v15  ;;  %v2535_v18 = vcombine.low %v13075_v39, %v1893_v23  ;;  %v2751_v45 = vcombine.low %v13076_v17, %v1897_v43  ;;  %v13079_v23 = vld [vmem:[#allocation13_spill] sm:$0xff]  ;;  %v13080_v43 = vld [vmem:[#allocation38_spill] sm:$0xff] }
 0x42b   : > { %13073 = vst [vmem:[#allocation140_spill] sm:$0xff] %v10830_v47  ;;  %7185 = vrot.lane.b32.xlu0 %v7184_v6, %s7436_s29  ;;  %v10846_v34 = vcombine.low %v13078_v60, %v5177_v41  ;;  %v10849_v2 = vrot.slane %v4317_v51, %v12633_v57  ;;  %v10856_v15 = vcombine.low %v13079_v23, %v4875_v12 }
 0x42c   : > { %v4473_v24 = vcombine.low %v10360_v31, %v10836_v37  ;;  %4747 = vrot.lane.b32.xlu1 %v10682_v35, %s7436_s29  ;;  %v4920_v6 = vcombine.low %v10807_v46, %v13080_v43  ;;  %v4254_v39 = vrot.slane %v6841_v21, %v12633_v57  ;;  %v10862_v41 = vrot.slane %v2535_v18, %v8091_v13  ;;  %v13081_v35 = vld [vmem:[#allocation47_spill] sm:$0xff]  ;;  %v10872_v12 = vpop.permute.xlu1 %1061  ;;  %v10874_v23 = vpop.permute.xlu0 %1898  ;;  %v13082_v21 = vld [vmem:[#allocation44_spill] sm:$0xff] }
 0x42d   : > { %v10865_v51 = vrot.slane %v2751_v45, %v8091_v13  ;;  %v10868_v17 = vpack.i.bf16 %v5300_v1, %v10846_v34  ;;  %v4247_v60 = vrot.slane %v6840_v48, %v12633_v57  ;;  %v4318_v49 = vcombine.low %v13081_v35, %v2434_v11  ;;  %v13084_v45 = vld [vmem:[#allocation248_spill] sm:$0xff]  ;;  %v13085_v1 = vld [vmem:[#allocation178_spill] sm:$0xff]  ;;  %v13086_v48 = vld [vmem:[#allocation39_spill] sm:$0xff] }
 0x42e   : > { %v7199_v43 = vpack.i.bf16 %v4998_v50, %v10856_v15  ;;  %v10878_v25 = vcombine.low %v13082_v21, %v4807_v44  ;;  %v2632_v18 = vrot.slane %v2625_v5, %v8091_v13  ;;  %v2895_v46 = vcombine.low %v13084_v45, %v10733_v56  ;;  %v13087_v5 = vld [vmem:[#allocation40_spill] sm:$0xff] }
 0x42f   : > { %v4474_v36 = vcombine.low %v13085_v1, %v10862_v41  ;;  %7190 = vrot.lane.b32.xlu0 %v10719_v16, %s7442_s7  ;;  %v4637_v50 = vcombine.low %v10245_v7, %v10624_v29  ;;  %v5111_v44 = vcombine.low %v13063_v62, %v10728_v40  ;;  %v2643_v21 = vcombine.low %v13087_v5, %v10690_v59 }
 0x430   : > { %13083 = vst [vmem:[#allocation26_spill] sm:$0xff] %v10878_v25  ;;  %7200 = vrot.lane.b32.xlu1 %v7199_v43, %s7436_s29  ;;  %v7194_v56 = vpack.i.bf16 %v4920_v6, %v10878_v25  ;;  %v6847_v45 = vcombine.high %v13081_v35, %v2434_v11  ;;  %v6874_v26 = vcombine.high %v10346_v63, %v10794_v27  ;;  %v1254_v62 = vpop.permute.xlu1 %1253  ;;  %v10910_v6 = vpop.permute.xlu0 %1067  ;;  %v13090_v35 = vld [vmem:[#allocation173_spill] sm:$0xff]  ;;  %v13091_v27 = vld [vmem:[#allocation7_spill] sm:$0xff] }
 0x431   : > { %v10901_v16 = vrot.slane %v4473_v24, %v12633_v57  ;;  %v10904_v7 = vrot.slane %v4474_v36, %v12633_v57  ;;  %v4403_v29 = vrot.slane %v6846_v58, %v12633_v57  ;;  %v5095_v59 = vcombine.low %v13064_v30, %v10744_v22  ;;  %v13099_v36 = vld [vmem:[#allocation180_spill] sm:$0xff] }
 0x432   : > { %v4332_v40 = vrot.slane %v4318_v49, %v12633_v57  ;;  %v4255_v11 = vcombine.low %v4247_v60, %v4254_v39  ;;  %v4619_v43 = vcombine.low %v13090_v35, %v2632_v18  ;;  %v10914_v63 = vrot.slane %v2895_v46, %v8091_v13  ;;  %v13092_v49 = vld [vmem:[#allocation78_spill] sm:$0xff] }
 0x433   : > { %13088 = vst [vmem:[#allocation192_spill] sm:$0xff] %v10901_v16  ;;  %13089 = vst [vmem:[#allocation67_spill] sm:$0xff] %v10904_v7  ;;  %v3129_v24 = vcombine.low %v13091_v27, %v1254_v62  ;;  %7195 = vrot.lane.b32.xlu0 %v7194_v56, %s7440_s6  ;;  %v10921_v22 = vrot.slane %v4637_v50, %v12633_v57  ;;  %v6858_v30 = vcombine.high %v13090_v35, %v2632_v18  ;;  %v13103_v7 = vld [vmem:[#allocation57_spill] sm:$0xff] }
 0x434   : > { %v10925_v58 = vrot.slane %v2643_v21, %v8091_v13  ;;  %v3219_v39 = vcombine.low %v13092_v49, %v10735_v10  ;;  %4971 = vrot.lane.b32.xlu1 %v10830_v47, %s7440_s6  ;;  %v10932_v46 = vrot.slane %v5111_v44, %v12633_v57  ;;  %v4410_v60 = vrot.slane %v6847_v45, %v12633_v57  ;;  %v1705_v21 = vpop.permute.xlu1 %1704  ;;  %v10942_v56 = vpop.permute.xlu0 %1259  ;;  %v13094_v10 = vld [vmem:[#allocation50_spill] sm:$0xff]  ;;  %v13095_v44 = vld [vmem:[#allocation108_spill] sm:$0xff] }
 0x435   : > { %v10936_v5 = vrot.slane %v3129_v24, %v8091_v13  ;;  %v10939_v50 = vrot.slane %v6874_v26, %v12633_v57  ;;  %v5109_v18 = vrot.slane %v5095_v59, %v12633_v57  ;;  %v7204_v62 = vpack.i.bf16 %v13094_v10, %v4255_v11  ;;  %v13097_v24 = vld [vmem:[#allocation175_spill] sm:$0xff]  ;;  %v13098_v49 = vld [vmem:[#allocation98_spill] sm:$0xff] }
 0x436   : > { %13093 = vst [vmem:[#allocation193_spill] sm:$0xff] %v10932_v46  ;;  %v4333_v35 = vcombine.low %v10849_v2, %v4332_v40  ;;  %v10948_v27 = vcombine.low %v13095_v44, %v10816_v52  ;;  %v10951_v45 = vrot.slane %v4619_v43, %v12633_v57  ;;  %v6873_v26 = vcombine.high %v13097_v24, %v10914_v63  ;;  %v13100_v52 = vld [vmem:[#allocation31_spill] sm:$0xff]  ;;  %v13101_v43 = vld [vmem:[#allocation18_spill] sm:$0xff] }
 0x437   : > { %v3237_v59 = vcombine.low %v13098_v49, %v10765_v42  ;;  %v5257_v25 = vcombine.low %v13099_v36, %v10936_v5  ;;  %5049 = vrot.lane.b32.xlu0 %v10939_v50, %s7436_s29  ;;  %v10962_v2 = vrot.slane %v6858_v30, %v12633_v57  ;;  %v4620_v40 = vcombine.low %v13100_v52, %v10925_v58 }
 0x438   : > { %13096 = vst [vmem:[#allocation88_spill] sm:$0xff] %v10948_v27  ;;  %v3226_v11 = vrot.slane %v3219_v39, %v8091_v13  ;;  %v2733_v10 = vcombine.low %v13101_v43, %v1705_v21  ;;  %7205 = vrot.lane.b32.xlu1 %v7204_v62, %s7442_s7  ;;  %v6853_v42 = vcombine.high %v13085_v1, %v10862_v41  ;;  %v10981_v39 = vpop.permute.xlu1 %1065  ;;  %v10983_v21 = vpop.permute.xlu0 %1710  ;;  %v13104_v41 = vld [vmem:[#allocation122_spill] sm:$0xff] }
 0x439   : > { %v10972_v44 = vrot.slane %v5257_v25, %v12633_v57  ;;  %v4411_v49 = vcombine.low %v4403_v29, %v4410_v60  ;;  %v5222_v30 = vcombine.low %v10932_v46, %v13103_v7  ;;  %v6859_v16 = vcombine.high %v13100_v52, %v10925_v58 }
 0x43a   : > { %v10979_v47 = vrot.slane %v2733_v10, %v8091_v13  ;;  %v7209_v62 = vpack.i.bf16 %v10948_v27, %v4333_v35  ;;  %v10987_v1 = vcombine.low %v13104_v41, %v5109_v18  ;;  %v5031_v25 = vrot.slane %v6873_v26, %v12633_v57  ;;  %v13107_v35 = vld [vmem:[#allocation24_spill] sm:$0xff] }
 0x43b   : > { %13102 = vst [vmem:[#allocation243_spill] sm:$0xff] %v10972_v44  ;;  %v3244_v29 = vrot.slane %v3237_v59, %v8091_v13  ;;  %v6852_v7 = vcombine.high %v10360_v31, %v10836_v37  ;;  %5195 = vrot.lane.b32.xlu0 %v10804_v20, %s7442_s7  ;;  %v10998_v52 = vrot.slane %v4620_v40, %v12633_v57  ;;  %v13108_v59 = vld [vmem:[#allocation181_spill] sm:$0xff]  ;;  %v13109_v31 = vld [vmem:[#allocation35_spill] sm:$0xff] }
 0x43c   : > { %13105 = vst [vmem:[#allocation194_spill] sm:$0xff] %v10987_v1  ;;  %v4939_v18 = vcombine.low %v13097_v24, %v10914_v63  ;;  %v2841_v26 = vcombine.low %v13107_v35, %v10801_v8  ;;  %v4775_v43 = vcombine.low %v13108_v59, %v10979_v47  ;;  %7210 = vrot.lane.b32.xlu1 %v7209_v62, %s7440_s6  ;;  %v13112_v8 = vld [vmem:[#allocation97_spill] sm:$0xff]  ;;  %v1258_v62 = vpop.permute.xlu1 %1257  ;;  %v11022_v60 = vpop.permute.xlu0 %1902 }
 0x43d   : > { %v5397_v37 = vcombine.low %v13109_v31, %v3226_v11  ;;  %v4556_v10 = vrot.slane %v6853_v42, %v12633_v57  ;;  %v7214_v20 = vpack.i.bf16 %v10712_v33, %v4411_v49  ;;  %v7224_v40 = vpack.i.bf16 %v5222_v30, %v10987_v1  ;;  %v13114_v42 = vld [vmem:[#allocation128_spill] sm:$0xff]  ;;  %v13115_v30 = vld [vmem:[#allocation177_spill] sm:$0xff] }
 0x43e   : > { %v13110_v63 = vcombine.low %v13086_v48, %v10865_v51  ;;  %v3111_v41 = vcombine.low %v13112_v8, %v10872_v12  ;;  %v11020_v35 = vrot.slane %v4775_v43, %v12633_v57  ;;  %v5144_v33 = vcombine.low %v10939_v50, %v13114_v42  ;;  %v13117_v43 = vld [vmem:[#allocation17_spill] sm:$0xff]  ;;  %v13118_v50 = vld [vmem:[#allocation104_spill] sm:$0xff] }
 0x43f   : > { %v6891_v49 = vcombine.high %v13109_v31, %v3226_v11  ;;  %v5413_v1 = vcombine.low %v13115_v30, %v3244_v29  ;;  %v4549_v46 = vrot.slane %v6852_v7, %v12633_v57  ;;  %7225 = vrot.lane.b32.xlu0 %v7224_v40, %s7440_s6  ;;  %v2848_v12 = vrot.slane %v2841_v26, %v8091_v13 }
 0x440   : > { %v11015_v24 = vrot.slane %v13110_v63, %v12633_v57  ;;  %13113 = vst [vmem:[#allocation195_spill] sm:$0xff] %v11020_v35  ;;  %v13116_v63 = vld [vmem:[#allocation15_spill] sm:$0xff]  ;;  %v2859_v8 = vcombine.low %v13117_v43, %v10874_v23  ;;  %v3345_v42 = vcombine.low %v13118_v50, %v1258_v62  ;;  %7215 = vrot.lane.b32.xlu1 %v7214_v20, %s7436_s29  ;;  %v1709_v62 = vpop.permute.xlu1 %1708  ;;  %v13145_v35 = vld [vmem:[#allocation36_spill] sm:$0xff] }
 0x441   : > { %v11031_v58 = vcombine.low %v13116_v63, %v5031_v25  ;;  %v11041_v11 = vrot.slane %v6859_v16, %v12633_v57  ;;  %v11044_v7 = vrot.slane %v4939_v18, %v12633_v57  ;;  %v11047_v25 = vrot.slane %v5397_v37, %v12633_v57  ;;  %v11054_v63 = vpop.permute.xlu0 %1071 }
 0x442   : > { %13111 = vst [vmem:[#allocation75_spill] sm:$0xff] %v11015_v24  ;;  %v4557_v26 = vcombine.low %v4549_v46, %v4556_v10  ;;  %v6892_v31 = vcombine.high %v13115_v30, %v3244_v29  ;;  %v3118_v23 = vrot.slane %v3111_v41, %v8091_v13  ;;  %v11052_v40 = vrot.slane %v3345_v42, %v8091_v13  ;;  %v13120_v46 = vld [vmem:[#allocation224_spill] sm:$0xff]  ;;  %v13121_v29 = vld [vmem:[#allocation133_spill] sm:$0xff]  ;;  %v13122_v41 = vld [vmem:[#allocation51_spill] sm:$0xff] }
 0x443   : > { %v7219_v16 = vpack.i.bf16 %v5144_v33, %v11031_v58  ;;  %v11058_v20 = vrot.slane %v6891_v49, %v12633_v57  ;;  %v11061_v18 = vrot.slane %v5413_v1, %v12633_v57  ;;  %v3435_v37 = vcombine.low %v13120_v46, %v10910_v6  ;;  %7230 = vrot.lane.b32.xlu0 %v10868_v17, %s7436_s29 }
 0x444   : > { %v2949_v10 = vcombine.low %v13121_v29, %v1709_v62  ;;  %v4921_v30 = vcombine.low %v13122_v41, %v2848_v12  ;;  %v6870_v43 = vcombine.high %v13122_v41, %v2848_v12  ;;  %v2866_v33 = vrot.slane %v2859_v8, %v8091_v13  ;;  %v13123_v8 = vld [vmem:[#allocation179_spill] sm:$0xff]  ;;  %v13128_v41 = vld [vmem:[#allocation232_spill] sm:$0xff] }
 0x445   : > { %13119 = vst [vmem:[#allocation95_spill] sm:$0xff] %v11061_v18  ;;  %v5559_v49 = vcombine.low %v10451_v38, %v11052_v40  ;;  %7220 = vrot.lane.b32.xlu1 %v7219_v16, %s7442_s7  ;;  %v6886_v1 = vcombine.high %v13099_v36, %v10936_v5  ;;  %v7234_v50 = vpack.i.bf16 %v10416_v54, %v4557_v26  ;;  %v1901_v16 = vpop.permute.xlu1 %1900  ;;  %v11088_v46 = vpop.permute.xlu0 %1263  ;;  %v13126_v26 = vld [vmem:[#allocation53_spill] sm:$0xff] }
 0x446   : > { %v11077_v6 = vrot.slane %v2949_v10, %v8091_v13  ;;  %v4635_v17 = vcombine.low %v10951_v45, %v10998_v52  ;;  %v6865_v12 = vcombine.high %v13086_v48, %v10865_v51  ;;  %v5241_v42 = vcombine.low %v13123_v8, %v3118_v23  ;;  %v13124_v51 = vld [vmem:[#allocation114_spill] sm:$0xff]  ;;  %v13135_v10 = vld [vmem:[#allocation124_spill] sm:$0xff] }
 0x447   : > { %v11086_v62 = vrot.slane %v5559_v49, %v12633_v57  ;;  %v5488_v36 = vrot.slane %v6892_v31, %v12633_v57  ;;  %v6885_v5 = vcombine.high %v13123_v8, %v3118_v23  ;;  %v3442_v54 = vrot.slane %v3435_v37, %v8091_v13  ;;  %7235 = vrot.lane.b32.xlu0 %v7234_v50, %s7442_s7  ;;  %v13129_v8 = vld [vmem:[#allocation218_spill] sm:$0xff] }
 0x448   : > { %v5077_v45 = vcombine.low %v10457_v55, %v11077_v6  ;;  %v11098_v48 = vcombine.low %v13124_v51, %v10921_v22  ;;  %v11101_v52 = vrot.slane %v4921_v30, %v12633_v57  ;;  %v4922_v29 = vcombine.low %v13126_v26, %v2866_v33 }
 0x449   : > { %v6871_v31 = vcombine.high %v13126_v26, %v2866_v33  ;;  %5497 = vrot.lane.b32.xlu1 %v5488_v36, %s7442_s7  ;;  %v5342_v37 = vrot.slane %v6886_v1, %v12633_v57  ;;  %v3453_v49 = vcombine.low %v13128_v41, %v10942_v56  ;;  %v4713_v30 = vcombine.low %v10962_v2, %v11041_v11  ;;  %v13130_v26 = vld [vmem:[#allocation135_spill] sm:$0xff]  ;;  %v11121_v27 = vpop.permute.xlu1 %1069  ;;  %v11123_v1 = vpop.permute.xlu0 %1714  ;;  %v13131_v2 = vld [vmem:[#allocation48_spill] sm:$0xff] }
 0x44a   : > { %13125 = vst [vmem:[#allocation196_spill] sm:$0xff] %v11098_v48  ;;  %v7239_v22 = vpack.i.bf16 %v11098_v48, %v4635_v17  ;;  %v11115_v50 = vrot.slane %v6870_v43, %v12633_v57  ;;  %v5255_v33 = vrot.slane %v5241_v42, %v12633_v57  ;;  %v3327_v51 = vcombine.low %v13129_v8, %v10981_v39  ;;  %v13132_v43 = vld [vmem:[#allocation131_spill] sm:$0xff] }
 0x44b   : > { %v2967_v23 = vcombine.low %v13130_v26, %v1901_v16  ;;  %v11126_v56 = vrot.slane %v6865_v12, %v12633_v57  ;;  %v5333_v17 = vrot.slane %v6885_v5, %v12633_v57  ;;  %v5699_v11 = vcombine.low %v13131_v2, %v3442_v54  ;;  %v13133_v5 = vld [vmem:[#allocation8_spill] sm:$0xff] }
 0x44c   : > { %v3057_v41 = vcombine.low %v13132_v43, %v10983_v21  ;;  %7240 = vrot.lane.b32.xlu0 %v7239_v22, %s7440_s6  ;;  %v11134_v39 = vrot.slane %v4922_v29, %v12633_v57  ;;  %v11137_v42 = vrot.slane %v6871_v31, %v12633_v57  ;;  %v6864_v16 = vcombine.high %v13108_v59, %v10979_v47  ;;  %v13134_v31 = vld [vmem:[#allocation34_spill] sm:$0xff] }
 0x44d   : > { %v11142_v12 = vrot.slane %v2967_v23, %v8091_v13  ;;  %5273 = vrot.lane.b32.xlu1 %v10972_v44, %s7440_s6  ;;  %v5446_v8 = vcombine.low %v5342_v37, %v13133_v5  ;;  %v6903_v21 = vcombine.high %v13131_v2, %v3442_v54  ;;  %v11149_v22 = vrot.slane %v3453_v49, %v8091_v13  ;;  %v1262_v23 = vpop.permute.xlu1 %1261  ;;  %v1905_v43 = vpop.permute.xlu0 %1904  ;;  %v13136_v5 = vld [vmem:[#allocation142_spill] sm:$0xff] }
 0x44e   : > { %v7244_v29 = vpack.i.bf16 %v10701_v61, %v4713_v30  ;;  %v11153_v26 = vcombine.low %v13134_v31, %v5255_v33  ;;  %v3334_v47 = vrot.slane %v3327_v51, %v8091_v13  ;;  %v5602_v44 = vcombine.low %v5488_v36, %v13135_v10  ;;  %v13137_v49 = vld [vmem:[#allocation74_spill] sm:$0xff]  ;;  %v13138_v51 = vld [vmem:[#allocation156_spill] sm:$0xff] }
 0x44f   : > { %v5078_v59 = vcombine.low %v10467_v19, %v11142_v12  ;;  %v11160_v24 = vcombine.low %v13136_v5, %v5333_v17  ;;  %v11163_v54 = vrot.slane %v5699_v11, %v12633_v57  ;;  %v3064_v61 = vrot.slane %v3057_v41, %v8091_v13  ;;  %v13141_v41 = vld [vmem:[#allocation19_spill] sm:$0xff] }
 0x450   : > { %7245 = vrot.lane.b32.xlu0 %v7244_v29, %s7436_s29  ;;  %v11169_v30 = vcombine.low %v13137_v49, %v11058_v20  ;;  %v4851_v33 = vrot.slane %v6864_v16, %v12633_v57  ;;  %v3075_v2 = vcombine.low %v13138_v51, %v11022_v60  ;;  %v11175_v36 = vrot.slane %v5077_v45, %v12633_v57  ;;  %v13142_v60 = vld [vmem:[#allocation182_spill] sm:$0xff] }
 0x451   : > { %v11178_v10 = vrot.slane %v5078_v59, %v12633_v57  ;;  %5351 = vrot.lane.b32.xlu1 %v5342_v37, %s7436_s29  ;;  %v11182_v17 = vrot.slane %v6903_v21, %v12633_v57  ;;  %v5715_v20 = vcombine.low %v10442_v53, %v11149_v22  ;;  %v7249_v11 = vpack.i.bf16 %v5446_v8, %v11160_v24  ;;  %v1713_v31 = vpop.permute.xlu1 %1712  ;;  %v11192_v59 = vpop.permute.xlu0 %1906  ;;  %v13143_v21 = vld [vmem:[#allocation121_spill] sm:$0xff]  ;;  %v13144_v8 = vld [vmem:[#allocation43_spill] sm:$0xff] }
 0x452   : > { %13139 = vst [vmem:[#allocation85_spill] sm:$0xff] %v11175_v36  ;;  %v5524_v16 = vcombine.low %v11061_v18, %v13141_v41  ;;  %v5543_v29 = vcombine.low %v13142_v60, %v3334_v47  ;;  %v7259_v37 = vpack.i.bf16 %v5602_v44, %v11169_v30  ;;  %v11197_v5 = vcombine.low %v13143_v21, %v11047_v25  ;;  %v13146_v18 = vld [vmem:[#allocation25_spill] sm:$0xff] }
 0x453   : > { %13140 = vst [vmem:[#allocation197_spill] sm:$0xff] %v11178_v10  ;;  %v6897_v49 = vcombine.high %v13142_v60, %v3334_v47  ;;  %v5223_v51 = vcombine.low %v13144_v8, %v3064_v61  ;;  %v3561_v41 = vcombine.low %v13145_v35, %v1262_v23  ;;  %v3183_v48 = vcombine.low %v13146_v18, %v1905_v43  ;;  %v13147_v36 = vld [vmem:[#allocation21_spill] sm:$0xff]  ;;  %v13152_v60 = vld [vmem:[#allocation186_spill] sm:$0xff] }
 0x454   : > { %7250 = vrot.lane.b32.xlu0 %v7249_v11, %s7442_s7  ;;  %v4859_v45 = vcombine.low %v4851_v33, %v11126_v56  ;;  %v6882_v10 = vcombine.high %v13144_v8, %v3064_v61  ;;  %v3082_v44 = vrot.slane %v3075_v2, %v8091_v13  ;;  %v3165_v9 = vcombine.low %v13147_v36, %v1713_v31  ;;  %v13149_v33 = vld [vmem:[#allocation134_spill] sm:$0xff]  ;;  %v13151_v11 = vld [vmem:[#allocation183_spill] sm:$0xff] }
 0x455   : > { %7260 = vrot.lane.b32.xlu1 %v7259_v37, %s7436_s29  ;;  %v6898_v25 = vcombine.high %v10451_v38, %v11052_v40  ;;  %v11212_v47 = vrot.slane %v3561_v41, %v8091_v13  ;;  %v11215_v35 = vrot.slane %v3183_v48, %v8091_v13  ;;  %v7254_v18 = vpack.i.bf16 %v5524_v16, %v11197_v5  ;;  %v1717_v38 = vpop.permute.xlu1 %1716  ;;  %v11229_v40 = vpop.permute.xlu0 %1986 }
 0x456   : > { %v11219_v56 = vrot.slane %v5715_v20, %v12633_v57  ;;  %v6904_v23 = vcombine.high %v10442_v53, %v11149_v22  ;;  %v11224_v43 = vrot.slane %v5543_v29, %v12633_v57  ;;  %v11227_v61 = vrot.slane %v3165_v9, %v8091_v13  ;;  %v13150_v20 = vld [vmem:[#allocation185_spill] sm:$0xff] }
 0x457   : > { %v5635_v48 = vrot.slane %v6897_v49, %v12633_v57  ;;  %v3651_v2 = vcombine.low %v13149_v33, %v11054_v63  ;;  %v5861_v36 = vcombine.low %v10517_v4, %v11212_v47  ;;  %v5380_v53 = vcombine.low %v13150_v20, %v11215_v35 }
 0x458   : > { %13148 = vst [vmem:[#allocation103_spill] sm:$0xff] %v11219_v56  ;;  %7255 = vrot.lane.b32.xlu0 %v7254_v18, %s7440_s6  ;;  %v11240_v22 = vrot.slane %v5223_v51, %v12633_v57  ;;  %v11243_v9 = vrot.slane %v6882_v10, %v12633_v57  ;;  %v5224_v16 = vcombine.low %v13151_v11, %v3082_v44  ;;  %v13153_v10 = vld [vmem:[#allocation111_spill] sm:$0xff] }
 0x459   : > { %v5379_v29 = vcombine.low %v13152_v60, %v11227_v61  ;;  %5575 = vrot.lane.b32.xlu1 %v11086_v62, %s7440_s6  ;;  %v11251_v63 = vrot.slane %v6898_v25, %v12633_v57  ;;  %v6883_v31 = vcombine.high %v13151_v11, %v3082_v44  ;;  %v11255_v37 = vrot.slane %v5861_v36, %v12633_v57  ;;  %v1909_v41 = vpop.permute.xlu1 %1908  ;;  %v11266_v18 = vpop.permute.xlu0 %1998  ;;  %v13156_v25 = vld [vmem:[#allocation16_spill] sm:$0xff]  ;;  %v13158_v36 = vld [vmem:[#allocation65_spill] sm:$0xff] }
 0x45a   : > { %v7264_v21 = vpack.i.bf16 %v10856_v15, %v4859_v45  ;;  %v3669_v49 = vcombine.low %v13153_v10, %v11088_v46  ;;  %v11261_v8 = vrot.slane %v5380_v53, %v12633_v57  ;;  %v4937_v44 = vcombine.low %v11101_v52, %v11134_v39  ;;  %v13159_v39 = vld [vmem:[#allocation32_spill] sm:$0xff]  ;;  %v13167_v52 = vld [vmem:[#allocation9_spill] sm:$0xff] }
 0x45b   : > { %v11264_v51 = vrot.slane %v5379_v29, %v12633_v57  ;;  %v11271_v33 = vcombine.low %v13156_v25, %v5635_v48  ;;  %v11274_v15 = vrot.slane %v3651_v2, %v8091_v13  ;;  %v3381_v53 = vcombine.low %v13158_v36, %v1717_v38  ;;  %v13160_v10 = vld [vmem:[#allocation12_spill] sm:$0xff]  ;;  %v13161_v25 = vld [vmem:[#allocation167_spill] sm:$0xff] }
 0x45c   : > { %13154 = vst [vmem:[#allocation198_spill] sm:$0xff] %v11261_v8  ;;  %5653 = vrot.lane.b32.xlu0 %v11251_v63, %s7436_s29  ;;  %v11282_v11 = vrot.slane %v5224_v16, %v12633_v57  ;;  %v11289_v48 = vcombine.low %v13159_v39, %v11044_v7  ;;  %v5790_v2 = vrot.slane %v6904_v23, %v12633_v57  ;;  %v13169_v8 = vld [vmem:[#allocation86_spill] sm:$0xff] }
 0x45d   : > { %13155 = vst [vmem:[#allocation99_spill] sm:$0xff] %v11264_v51  ;;  %7265 = vrot.lane.b32.xlu1 %v7264_v21, %s7442_s7  ;;  %v6877_v38 = vcombine.high %v10467_v19, %v11142_v12  ;;  %v11295_v29 = vrot.slane %v3381_v53, %v8091_v13  ;;  %v3399_v16 = vcombine.low %v13160_v10, %v1909_v41  ;;  %v1721_v7 = vpop.permute.xlu1 %1720  ;;  %v11306_v39 = vpop.permute.xlu0 %1718  ;;  %v13162_v41 = vld [vmem:[#allocation71_spill] sm:$0xff] }
 0x45e   : > { %v5826_v36 = vcombine.low %v11219_v56, %v13161_v25  ;;  %v11301_v46 = vrot.slane %v6883_v31, %v12633_v57  ;;  %v11304_v21 = vrot.slane %v3669_v49, %v8091_v13  ;;  %v7269_v23 = vpack.i.bf16 %v11289_v48, %v4937_v44  ;;  %v13163_v49 = vld [vmem:[#allocation115_spill] sm:$0xff]  ;;  %v13164_v44 = vld [vmem:[#allocation61_spill] sm:$0xff] }
 0x45f   : > { %v5015_v19 = vcombine.low %v11115_v50, %v11137_v42  ;;  %v6876_v12 = vcombine.high %v10457_v55, %v11077_v6  ;;  %v3543_v53 = vcombine.low %v13162_v41, %v11121_v27  ;;  %v5681_v31 = vcombine.low %v10567_v0, %v11295_v29  ;;  %v13165_v50 = vld [vmem:[#allocation68_spill] sm:$0xff]  ;;  %v13166_v6 = vld [vmem:[#allocation174_spill] sm:$0xff] }
 0x460   : > { %5799 = vrot.lane.b32.xlu0 %v5790_v2, %s7442_s7  ;;  %v11320_v10 = vcombine.low %v13163_v49, %v11163_v54  ;;  %v6915_v25 = vcombine.high %v13164_v44, %v11274_v15  ;;  %v3291_v42 = vcombine.low %v13165_v50, %v11192_v59  ;;  %v11327_v55 = vrot.slane %v3399_v16, %v8091_v13  ;;  %v13168_v49 = vld [vmem:[#allocation100_spill] sm:$0xff]  ;;  %v13170_v59 = vld [vmem:[#allocation83_spill] sm:$0xff] }
 0x461   : > { %v3597_v27 = vcombine.low %v13166_v6, %v1721_v7  ;;  %7270 = vrot.lane.b32.xlu1 %v7269_v23, %s7440_s6  ;;  %v5160_v41 = vrot.slane %v6877_v38, %v12633_v57  ;;  %v3273_v56 = vcombine.low %v13167_v52, %v11123_v1  ;;  %v5904_v45 = vcombine.low %v5790_v2, %v13168_v49  ;;  %v11342_v50 = vpop.permute.xlu0 %1910 }
 0x462   : > { %v7284_v54 = vpack.i.bf16 %v5826_v36, %v11320_v10  ;;  %v5748_v51 = vcombine.low %v11251_v63, %v13169_v8  ;;  %v6916_v16 = vcombine.high %v13170_v59, %v11304_v21  ;;  %v5682_v7 = vcombine.low %v10644_v14, %v11327_v55  ;;  %v13171_v63 = vld [vmem:[#allocation22_spill] sm:$0xff] }
 0x463   : > { %v7274_v38 = vpack.i.bf16 %v11031_v58, %v5015_v19  ;;  %v5153_v23 = vrot.slane %v6876_v12, %v12633_v57  ;;  %v3550_v1 = vrot.slane %v3543_v53, %v8091_v13  ;;  %v11348_v52 = vrot.slane %v3597_v27, %v8091_v13 }
 0x464   : > { %7285 = vrot.lane.b32.xlu0 %v7284_v54, %s7440_s6  ;;  %v11353_v8 = vcombine.low %v13171_v63, %v11182_v17  ;;  %v6001_v2 = vcombine.low %v13164_v44, %v11274_v15  ;;  %v3298_v36 = vrot.slane %v3291_v42, %v8091_v13  ;;  %v11359_v58 = vrot.slane %v5681_v31, %v12633_v57  ;;  %v13172_v54 = vld [vmem:[#allocation46_spill] sm:$0xff] }
 0x465   : > { %v11362_v19 = vrot.slane %v5682_v7, %v12633_v57  ;;  %7275 = vrot.lane.b32.xlu1 %v7274_v38, %s7436_s29  ;;  %v5161_v12 = vcombine.low %v5153_v23, %v5160_v41  ;;  %v3280_v53 = vrot.slane %v3273_v56, %v8091_v13  ;;  %v5983_v17 = vcombine.low %v10779_v28, %v11348_v52  ;;  %v11374_v42 = vpop.permute.xlu0 %1722  ;;  %v13175_v38 = vld [vmem:[#allocation41_spill] sm:$0xff] }
 0x466   : > { %v7289_v6 = vpack.i.bf16 %v5904_v45, %v11353_v8  ;;  %v6092_v15 = vrot.slane %v6916_v16, %v12633_v57  ;;  %v6888_v44 = vcombine.high %v13152_v60, %v11227_v61  ;;  %v7279_v27 = vpack.i.bf16 %v5748_v51, %v11271_v33  ;;  %v13173_v16 = vld [vmem:[#allocation64_spill] sm:$0xff] }
 0x467   : > { %v5697_v31 = vcombine.low %v11359_v58, %v11362_v19  ;;  %v5239_v56 = vcombine.low %v11240_v22, %v11282_v11  ;;  %v6083_v41 = vrot.slane %v6915_v25, %v12633_v57  ;;  %v6017_v45 = vcombine.low %v13170_v59, %v11304_v21  ;;  %v13174_v21 = vld [vmem:[#allocation130_spill] sm:$0xff] }
 0x468   : > { %v5845_v49 = vcombine.low %v13172_v54, %v3550_v1  ;;  %7290 = vrot.lane.b32.xlu0 %v7289_v6, %s7436_s29  ;;  %v6909_v61 = vcombine.high %v13172_v54, %v3550_v1  ;;  %v6910_v60 = vcombine.high %v10517_v4, %v11212_v47  ;;  %v6889_v51 = vcombine.high %v13150_v20, %v11215_v35  ;;  %v13176_v1 = vld [vmem:[#allocation14_spill] sm:$0xff] }
 0x469   : > { %v5526_v7 = vcombine.low %v13173_v16, %v3298_v36  ;;  %7280 = vrot.lane.b32.xlu1 %v7279_v27, %s7442_s7  ;;  %v5317_v22 = vcombine.low %v11243_v9, %v11301_v46  ;;  %v11394_v11 = vrot.slane %v6001_v2, %v12633_v57  ;;  %v5525_v25 = vcombine.low %v13174_v21, %v3280_v53  ;;  %v1913_v20 = vpop.permute.xlu0 %1912  ;;  %v13177_v2 = vld [vmem:[#allocation176_spill] sm:$0xff]  ;;  %v13178_v27 = vld [vmem:[#allocation93_spill] sm:$0xff] }
 0x46a   : > { %v7294_v59 = vpack.i.bf16 %v10846_v34, %v5161_v12  ;;  %v6206_v23 = vcombine.low %v6092_v15, %v13175_v38  ;;  %v6894_v4 = vcombine.high %v13174_v21, %v3280_v53  ;;  %v5455_v47 = vrot.slane %v6888_v44, %v12633_v57  ;;  %v13180_v21 = vld [vmem:[#allocation229_spill] sm:$0xff] }
 0x46b   : > { %v6895_v35 = vcombine.high %v13173_v16, %v3298_v36  ;;  %v11403_v63 = vcombine.low %v13176_v1, %v6083_v41  ;;  %v11406_v9 = vrot.slane %v6017_v45, %v12633_v57  ;;  %v5859_v46 = vrot.slane %v5845_v49, %v12633_v57  ;;  %v13182_v38 = vld [vmem:[#allocation29_spill] sm:$0xff] }
 0x46c   : > { %v3615_v6 = vcombine.low %v13177_v2, %v1913_v20  ;;  %7295 = vrot.lane.b32.xlu0 %v7294_v59, %s7442_s7  ;;  %v5937_v34 = vrot.slane %v6909_v61, %v12633_v57  ;;  %v11413_v12 = vrot.slane %v6910_v60, %v12633_v57  ;;  %v5462_v36 = vrot.slane %v6889_v51, %v12633_v57  ;;  %v13181_v59 = vld [vmem:[#allocation45_spill] sm:$0xff] }
 0x46d   : > { %v5540_v53 = vrot.slane %v5526_v7, %v12633_v57  ;;  %6101 = vrot.lane.b32.xlu1 %v6092_v15, %s7442_s7  ;;  %v5533_v44 = vrot.slane %v5525_v25, %v12633_v57  ;;  %v3507_v41 = vcombine.low %v13178_v27, %v11342_v50  ;;  %v7299_v54 = vpack.i.bf16 %v11153_v26, %v5239_v56  ;;  %v1915_v51 = vpop.permute.xlu0 %1914  ;;  %v13179_v15 = vld [vmem:[#allocation109_spill] sm:$0xff]  ;;  %v13186_v27 = vld [vmem:[#allocation102_spill] sm:$0xff] }
 0x46e   : > { %v3622_v45 = vrot.slane %v3615_v6, %v8091_v13  ;;  %v11424_v49 = vrot.slane %v6894_v4, %v12633_v57  ;;  %v5463_v61 = vcombine.low %v5455_v47, %v5462_v36  ;;  %v11427_v60 = vrot.slane %v6895_v35, %v12633_v57  ;;  %v13184_v36 = vld [vmem:[#allocation23_spill] sm:$0xff] }
 0x46f   : > { %v7319_v16 = vpack.i.bf16 %v6206_v23, %v11403_v63  ;;  %v3759_v7 = vcombine.low %v13179_v15, %v11229_v40  ;;  %v3489_v50 = vcombine.low %v13180_v21, %v11306_v39  ;;  %v3723_v56 = vcombine.low %v13181_v59, %v1915_v51  ;;  %v13183_v23 = vld [vmem:[#allocation164_spill] sm:$0xff] }
 0x470   : > { %v5984_v25 = vcombine.low %v10782_v3, %v3622_v45  ;;  %7300 = vrot.lane.b32.xlu0 %v7299_v54, %s7440_s6  ;;  %v6050_v4 = vcombine.low %v11413_v12, %v13182_v38  ;;  %v5541_v47 = vcombine.low %v5533_v44, %v5540_v53  ;;  %v6901_v35 = vcombine.high %v10644_v14, %v11327_v55  ;;  %v13187_v54 = vld [vmem:[#allocation59_spill] sm:$0xff]  ;;  %v13188_v21 = vld [vmem:[#allocation76_spill] sm:$0xff] }
 0x471   : > { %v3705_v20 = vcombine.low %v13183_v23, %v11374_v42  ;;  %7320 = vrot.lane.b32.xlu1 %v7319_v16, %s7436_s29  ;;  %v11445_v40 = vrot.slane %v5983_v17, %v12633_v57  ;;  %v11448_v39 = vrot.slane %v3507_v41, %v8091_v13  ;;  %v7304_v2 = vpack.i.bf16 %v11160_v24, %v5317_v22  ;;  %v11460_v42 = vpop.permute.xlu0 %3987  ;;  %v11492_v16 = vpop.permute.xlu1 %4289 }
 0x472   : > { %v11451_v1 = vrot.slane %v5984_v25, %v12633_v57  ;;  %v6900_v6 = vcombine.high %v10567_v0, %v11295_v29  ;;  %v6913_v14 = vcombine.high %v10782_v3, %v3622_v45  ;;  %v11458_v55 = vrot.slane %v3723_v56, %v8091_v13  ;;  %v13185_v3 = vld [vmem:[#allocation125_spill] sm:$0xff]  ;;  %v13190_v25 = vld [vmem:[#allocation55_spill] sm:$0xff] }
 0x473   : > { %v7324_v17 = vpack.i.bf16 %v11169_v30, %v5463_v61  ;;  %v11464_v53 = vcombine.low %v13184_v36, %v5937_v34  ;;  %v11467_v44 = vrot.slane %v3759_v7, %v8091_v13  ;;  %v11470_v24 = vrot.slane %v3489_v50, %v8091_v13  ;;  %v13191_v56 = vld [vmem:[#allocation187_spill] sm:$0xff] }
 0x474   : > { %v5999_v0 = vcombine.low %v11445_v40, %v11451_v1  ;;  %7305 = vrot.lane.b32.xlu0 %v7304_v2, %s7436_s29  ;;  %v11477_v29 = vcombine.low %v13185_v3, %v11224_v43  ;;  %v5764_v30 = vrot.slane %v6901_v35, %v12633_v57  ;;  %v6912_v22 = vcombine.high %v10779_v28, %v11348_v52  ;;  %v13192_v35 = vld [vmem:[#allocation33_spill] sm:$0xff] }
 0x475   : > { %v3712_v34 = vrot.slane %v3705_v20, %v8091_v13  ;;  %7325 = vrot.lane.b32.xlu1 %v7324_v17, %s7442_s7  ;;  %v6128_v41 = vcombine.low %v11406_v9, %v13186_v27  ;;  %v5619_v45 = vcombine.low %v11424_v49, %v11427_v60  ;;  %v5828_v61 = vcombine.low %v13187_v54, %v11448_v39  ;;  %v7131_v15 = vpop.permute.xlu0 %7130  ;;  %v13189_v60 = vld [vmem:[#allocation112_spill] sm:$0xff] }
 0x476   : > { %v7309_v43 = vpack.i.bf16 %v6050_v4, %v11464_v53  ;;  %v5757_v51 = vrot.slane %v6900_v6, %v12633_v57  ;;  %v6066_v28 = vrot.slane %v6913_v14, %v12633_v57  ;;  %v6130_v52 = vcombine.low %v10791_v32, %v11458_v55 }
 0x477   : > { %v7329_v7 = vpack.i.bf16 %v11477_v29, %v5541_v47  ;;  %v11500_v49 = vcombine.low %v13188_v21, %v11394_v11  ;;  %v11503_v50 = vcombine.low %v13189_v60, %v5859_v46  ;;  %v6147_v59 = vcombine.low %v13190_v25, %v11467_v44  ;;  %v13193_v11 = vld [vmem:[#allocation132_spill] sm:$0xff]  ;;  %v13194_v21 = vld [vmem:[#allocation63_spill] sm:$0xff] }
 0x478   : > { %v5827_v38 = vcombine.low %v13191_v56, %v11470_v24  ;;  %7310 = vrot.lane.b32.xlu0 %v7309_v43, %s7442_s7  ;;  %v5765_v4 = vcombine.low %v5757_v51, %v5764_v30  ;;  %v3777_v47 = vcombine.low %v13192_v35, %v11266_v18  ;;  %v6059_v23 = vrot.slane %v6912_v22, %v12633_v57  ;;  %v11524_v3 = vpop.permute.xlu1 %4065 }
 0x479   : > { %v6129_v20 = vcombine.low %v13193_v11, %v3712_v34  ;;  %7330 = vrot.lane.b32.xlu1 %v7329_v7, %s7440_s6  ;;  %v6921_v46 = vcombine.high %v13190_v25, %v11467_v44  ;;  %v5842_v2 = vrot.slane %v5828_v61, %v12633_v57  ;;  %v6907_v6 = vcombine.high %v13187_v54, %v11448_v39  ;;  %v7136_v30 = vpop.permute.xlu0 %7135 }
 0x47a   : > { %v7314_v14 = vpack.i.bf16 %v6128_v41, %v11500_v49  ;;  %v6067_v17 = vcombine.low %v6059_v23, %v6066_v28  ;;  %v6144_v18 = vrot.slane %v6130_v52, %v12633_v57  ;;  %v6919_v36 = vcombine.high %v10791_v32, %v11458_v55  ;;  %v13199_v23 = vld [vmem:[#allocation28_spill] sm:$0xff] }
 0x47b   : > { %v7334_v22 = vpack.i.bf16 %v11271_v33, %v5619_v45  ;;  %v6161_v44 = vrot.slane %v6147_v59, %v12633_v57  ;;  %v5835_v27 = vrot.slane %v5827_v38, %v12633_v57  ;;  %v6906_v39 = vcombine.high %v13191_v56, %v11470_v24  ;;  %v13195_v56 = vld [vmem:[#allocation49_spill] sm:$0xff] }
 0x47c   : > { %v6918_v41 = vcombine.high %v13193_v11, %v3712_v34  ;;  %7315 = vrot.lane.b32.xlu0 %v7314_v14, %s7440_s6  ;;  %v6137_v54 = vrot.slane %v6129_v20, %v12633_v57  ;;  %v7133_v61 = vunpack.i.h.bf16 %v7131_v15  ;;  %v7132_v32 = vunpack.i.l.bf16 %v7131_v15  ;;  %v11539_v52 = vpop.permute.xlu1 %4143  ;;  %v13196_v38 = vld [vmem:[#allocation105_spill] sm:$0xff] }
 0x47d   : > { %7335 = vrot.lane.b32.xlu1 %v7334_v22, %s7436_s29  ;;  %v7339_v55 = vpack.i.bf16 %v11353_v8, %v5765_v4  ;;  %v5843_v33 = vcombine.low %v5835_v27, %v5842_v2  ;;  %v5920_v45 = vrot.slane %v6907_v6, %v12633_v57  ;;  %v7138_v43 = vunpack.i.h.bf16 %v7136_v30  ;;  %v7141_v59 = vpop.permute.xlu0 %7140 }
 0x47e   : > { %v7137_v51 = vunpack.i.l.bf16 %v7136_v30  ;;  %v3784_v28 = vrot.slane %v3777_v47, %v8091_v13  ;;  %v6145_v24 = vcombine.low %v6137_v54, %v6144_v18  ;;  %v6222_v34 = vrot.slane %v6919_v36, %v12633_v57  ;;  %v13198_v47 = vld [vmem:[#allocation73_spill] sm:$0xff] }
 0x47f   : > { %v7354_v7 = vpack.i.bf16 %v11403_v63, %v6067_v17  ;;  %v6162_v15 = vcombine.low %v13194_v21, %v6161_v44  ;;  %v6239_v60 = vrot.slane %v6921_v46, %v12633_v57  ;;  %v5913_v8 = vrot.slane %v6906_v39, %v12633_v57  ;;  %v13201_v39 = vld [vmem:[#allocation170_spill] sm:$0xff] }
 0x480   : > { %v6215_v25 = vrot.slane %v6918_v41, %v12633_v57  ;;  %7340 = vrot.lane.b32.xlu0 %v7339_v55, %s7442_s7  ;;  %v13197_v4 = vcombine.low %v13195_v56, %v13196_v38  ;;  %v13200_v11 = vcombine.low %v13198_v47, %v13199_v23  ;;  %v7143_v20 = vunpack.i.h.bf16 %v7141_v59  ;;  %v7146_v22 = vpop.permute.xlu1 %7145  ;;  %v13202_v41 = vld [vmem:[#allocation228_spill] sm:$0xff]  ;;  %v13206_v56 = vld [vmem:[#allocation79_spill] sm:$0xff] }
 0x481   : > { %v7142_v2 = vunpack.i.l.bf16 %v7141_v59  ;;  %7355 = vrot.lane.b32.xlu1 %v7354_v7, %s7442_s7  ;;  %v5921_v46 = vcombine.low %v5913_v8, %v5920_v45  ;;  %v7344_v17 = vpack.i.bf16 %v11503_v50, %v5843_v33  ;;  %v7359_v44 = vpack.i.bf16 %v6162_v15, %v6145_v24  ;;  %v13205_v59 = vld [vmem:[#allocation62_spill] sm:$0xff] }
 0x482   : > { %v6266_v35 = vsel %vm6264_vm12, %v13197_v4, %v7133_v61  ;;  %v6265_v63 = vsel %vm6264_vm12, %v13200_v11, %v7132_v32  ;;  %v6223_v18 = vcombine.low %v6215_v25, %v6222_v34  ;;  %v13203_v54 = vcombine.low %v13201_v39, %v13202_v41  ;;  %v13204_v32 = vld [vmem:[#allocation158_spill] sm:$0xff]  ;;  %v13208_v4 = vld [vmem:[#allocation191_spill] sm:$0xff] }
 0x483   : > { %v6271_v6 = vsel %vm6270_vm13, %v6265_v63, %v7137_v51  ;;  %v6272_v14 = vsel %vm6270_vm13, %v6266_v35, %v7138_v43  ;;  %v6240_v55 = vcombine.low %v13204_v32, %v6239_v60  ;;  %v7349_v45 = vpack.i.bf16 %v11464_v53, %v5921_v46 }
 0x484   : > { %v6277_v36 = vsel %vm6276_vm14, %v6271_v6, %v7142_v2  ;;  %v6278_v30 = vsel %vm6276_vm14, %v6272_v14, %v7143_v20  ;;  %7345 = vrot.lane.b32.xlu0 %v7344_v17, %s7440_s6  ;;  %v3775_v61 = vrot.slane %v13203_v54, %v8091_v13  ;;  %v4446_v33 = vpop.permute.xlu0 %4445  ;;  %v7148_v7 = vunpack.i.h.bf16 %v7146_v22 }
 0x485   : > { %v7050_v27 = vpack.c.bf16 %v6278_v30, %v6277_v36  ;;  %7360 = vrot.lane.b32.xlu1 %v7359_v44, %s7440_s6  ;;  %v7151_v51 = vpop.permute.xlu1 %7150  ;;  %v7364_v34 = vpack.i.bf16 %v6240_v55, %v6223_v18  ;;  %v7147_v24 = vunpack.i.l.bf16 %v7146_v22  ;;  %v13207_v38 = vcombine.low %v13205_v59, %v13206_v56  ;;  %v13209_v44 = vld [vmem:[#allocation96_spill] sm:$0xff] }
 0x486   : > { %v6163_v43 = vcombine.low %v3775_v61, %v3784_v28  ;;  %v7153_v21 = vunpack.i.h.bf16 %v7151_v51  ;;  %v7152_v15 = vunpack.i.l.bf16 %v7151_v51  ;;  %v6922_v60 = vcombine.high %v3775_v61, %v3784_v28  ;;  %v13212_v59 = vld [vmem:[#allocation184_spill] sm:$0xff] }
 0x487   : > { %v6283_v53 = vsel %vm6264_vm12, %v13207_v38, %v7148_v7  ;;  %v6282_v35 = vsel %vm6264_vm12, %v13208_v4, %v7147_v24  ;;  %v13214_v4 = vld [vmem:[#allocation220_spill] sm:$0xff] }
 0x488   : > { %7350 = vrot.lane.b32.xlu0 %v7349_v45, %s7436_s29  ;;  %v4592_v8 = vpop.permute.xlu0 %4591  ;;  %v6170_v13 = vrot.slane %v6163_v43, %v12633_v57  ;;  %v6288_v11 = vsel %vm6270_vm13, %v6283_v53, %v7153_v21  ;;  %v6287_v63 = vsel %vm6270_vm13, %v6282_v35, %v7152_v15  ;;  %v6248_v46 = vrot.slane %v6922_v60, %v12633_v57  ;;  %v13210_v43 = vld [vmem:[#allocation52_spill] sm:$0xff] }
 0x489   : > { %7365 = vrot.lane.b32.xlu1 %v7364_v34, %s7436_s29  ;;  %v7156_v25 = vpop.permute.xlu1 %7155  ;;  %v6301_v57 = vsel %vm6264_vm12, %v13209_v44, %v4592_v8  ;;  %v6286_v51 = vsel %vm6264_vm12, %v13210_v43, %v11492_v16  ;;  %v13213_v16 = vld [vmem:[#allocation242_spill] sm:$0xff] }
 0x48a   : > { %v7158_v47 = vunpack.i.h.bf16 %v7156_v25  ;;  %v7157_v23 = vunpack.i.l.bf16 %v7156_v25  ;;  %v13215_v35 = vcombine.low %v13213_v16, %v13214_v4  ;;  %v13222_v16 = vld [vmem:[#allocation190_spill] sm:$0xff] }
 0x48c   : > { %5877 = vrot.lane.b32.xlu0 %v11255_v37, %s7440_s6  ;;  %v7161_v28 = vpop.permute.xlu0 %7160  ;;  %v6292_v20 = vsel %vm6276_vm14, %v6287_v63, %v7157_v23  ;;  %v6293_v2 = vsel %vm6276_vm14, %v6288_v11, %v7158_v47 }
 0x48d   : > { %6179 = vrot.lane.b32.xlu1 %v6170_v13, %s7440_s6  ;;  %v4368_v6 = vpop.permute.xlu1 %4367  ;;  %v7048_v14 = vpack.c.bf16 %v6293_v2, %v6292_v20  ;;  %v7163_v34 = vunpack.i.h.bf16 %v7161_v28  ;;  %v7162_v21 = vunpack.i.l.bf16 %v7161_v28  ;;  %v13211_v13 = vld [vmem:[#allocation58_spill] sm:$0xff] }
 0x48e   : > { %v6291_v24 = vsel %vm6270_vm13, %v6286_v51, %v4368_v6  ;;  %v6269_v60 = vsel %vm6264_vm12, %v13211_v13, %v11460_v42  ;;  %v13216_v20 = vld [vmem:[#allocation70_spill] sm:$0xff]  ;;  %v13217_v42 = vld [vmem:[#allocation77_spill] sm:$0xff]  ;;  %v13220_v13 = vld [vmem:[#allocation188_spill] sm:$0xff] }
 0x48f   : > { %7049 = vmatprep.subr.bf16.mxu0 %v7048_v14  ;;  %v6296_v25 = vsel %vm6276_vm14, %v6291_v24, %v4446_v33  ;;  %v6268_v56 = vsel %vm6264_vm12, %v13212_v59, %v7163_v34  ;;  %v6267_v47 = vsel %vm6264_vm12, %v13215_v35, %v7162_v21  ;;  %v13218_v2 = vcombine.low %v13216_v20, %v13217_v42  ;;  %v13221_v59 = vld [vmem:[#allocation90_spill] sm:$0xff] }
 0x490   : > { %5955 = vrot.lane.b32.xlu0 %v11413_v12, %s7436_s29  ;;  %7051 = vmatpush1.bf16.msra.mxu0 %v7050_v27  ;;  %v11589_v17 = vpop.permute.xlu0 %7170  ;;  %v13223_v4 = vcombine.low %v13221_v59, %v13222_v16 }
 0x491   : > { %6257 = vrot.lane.b32.xlu1 %v6248_v46, %s7436_s29  ;;  %v7166_v18 = vpop.permute.xlu1 %7165  ;;  %v7173_v23 = vunpack.i.h.bf16 %v11589_v17  ;;  %v7172_v46 = vunpack.i.l.bf16 %v11589_v17  ;;  %s7373_s29 = sshll.u32 %s7443_s19, 4  ;;  %s7374_s29 = int_to_ptr.vmem [resolvable:$false] %s7373_s29 }
 0x492   : > { %v7168_v8 = vunpack.i.h.bf16 %v7166_v18  ;;  %v7167_v38 = vunpack.i.l.bf16 %v7166_v18  ;;  %s7375_s30 = scalar_lea.vmem %s7374_s29, 2048  ;;  %p7376_p0 = scmp.lt.s32.totalorder %s11876_s14, %s7374_s29 }
 0x493   : > { %p7377_p1 = scmp.lt.s32.totalorder %s7375_s30, %s7369_s28 }
 0x494   : > { %v6298_v33 = vsel %vm6264_vm12, %v13218_v2, %v7168_v8  ;;  %v13227_v2 = vld [vmem:[#allocation196_spill] sm:$0xff] }
 0x495   : > { %v11591_v36 = vpop.permute.xlu0 %7175  ;;  %v11593_v30 = vpop.permute.xlu1 %4893  ;;  %p7378_p2 = por %p7377_p1, %p7376_p0 }
 0x497   : > { %p7379_p3 = pnand %p7378_p2, %p7372_p13 }
 0x499   : > { %v7181_v22 = vpop.permute.xlu0 %7180 }
 0x49a   : > { %v4670_v39 = vpop.permute.xlu1 %4669  ;;  %v7183_v11 = vunpack.i.h.bf16 %v7181_v22  ;;  %v7182_v63 = vunpack.i.l.bf16 %v7181_v22  ;;  %v7178_v22 = vunpack.i.h.bf16 %v11591_v36 }
 0x49b   : > { %v6306_v41 = vsel %vm6270_vm13, %v6301_v57, %v4670_v39 }
 0x49c   : > { %v6273_v24 = vsel %vm6270_vm13, %v6267_v47, %v7182_v63  ;;  %v6274_v17 = vsel %vm6270_vm13, %v6268_v56, %v7183_v11  ;;  %v13225_v11 = vld [vmem:[#allocation80_spill] sm:$0xff] }
 0x49d   : > { %v7186_v54 = vpop.permute.xlu0 %7185 }
 0x49e   : > { %v4748_v12 = vpop.permute.xlu1 %4747  ;;  %v7188_v18 = vunpack.i.h.bf16 %v7186_v54  ;;  %v7187_v44 = vunpack.i.l.bf16 %v7186_v54 }
 0x49f   : > { %v11599_v61 = vsel %vm6276_vm14, %v6306_v41, %v4748_v12  ;;  %v13219_v41 = vld [vmem:[#allocation88_spill] sm:$0xff] }
 0x4a0   : > { %v6297_v12 = vsel %vm6264_vm12, %v13219_v41, %v7167_v38  ;;  %v6280_v20 = vsel %vm6276_vm14, %v6274_v17, %v7188_v18  ;;  %v7177_v18 = vunpack.i.l.bf16 %v11591_v36  ;;  %v6388_v36 = vsel %vm336_vm4, %v6296_v25, 1.0 }
 0x4a1   : > { %v7191_v27 = vpop.permute.xlu0 %7190 }
 0x4a2   : > { %v11601_v32 = vpop.permute.xlu1 %7200  ;;  %v7193_v43 = vunpack.i.h.bf16 %v7191_v27  ;;  %v7192_v51 = vunpack.i.l.bf16 %v7191_v27  ;;  %v6279_v27 = vsel %vm6276_vm14, %v6273_v24, %v7187_v44 }
 0x4a5   : > { %v7196_v55 = vpop.permute.xlu0 %7195 }
 0x4a6   : > { %v11603_v45 = vpop.permute.xlu1 %4971  ;;  %v7198_v21 = vunpack.i.h.bf16 %v7196_v55 }
 0x4a9   : > { %v11608_v7 = vpop.permute.xlu0 %5049 }
 0x4aa   : > { %v7206_v15 = vpop.permute.xlu1 %7205 }
 0x4ab   : > { %v7208_v6 = vunpack.i.h.bf16 %v7206_v15  ;;  %v7207_v14 = vunpack.i.l.bf16 %v7206_v15  ;;  %v7197_v15 = vunpack.i.l.bf16 %v7196_v55  ;;  %v13224_v55 = vld [vmem:[#allocation81_spill] sm:$0xff] }
 0x4ac   : > { %v13226_v63 = vcombine.low %v13224_v55, %v13225_v11  ;;  %v13229_v11 = vld [vmem:[#allocation222_spill] sm:$0xff] }
 0x4ad   : > { %v11617_v53 = vpop.permute.xlu0 %5195  ;;  %v6285_v54 = vsel %vm6264_vm12, %v13220_v13, %v7208_v6  ;;  %v6284_v38 = vsel %vm6264_vm12, %v13223_v4, %v7207_v14  ;;  %v6312_v6 = vsel %vm6264_vm12, %v13227_v2, %v7192_v51  ;;  %v7203_v51 = vunpack.i.h.bf16 %v11601_v32 }
 0x4ae   : > { %v7211_v28 = vpop.permute.xlu1 %7210  ;;  %v6313_v42 = vsel %vm6264_vm12, %v13226_v63, %v7193_v43  ;;  %v6275_v43 = vsel %vm6270_vm13, %v6269_v60, %v11524_v3  ;;  %v7202_v13 = vunpack.i.l.bf16 %v11601_v32  ;;  %v6316_v63 = vsel %vm6264_vm12, %v13229_v11, %v11593_v30  ;;  %v13230_v30 = vld [vmem:[#allocation140_spill] sm:$0xff] }
 0x4af   : > { %v7213_v57 = vunpack.i.h.bf16 %v7211_v28  ;;  %v7212_v39 = vunpack.i.l.bf16 %v7211_v28 }
 0x4b1   : > { %v11632_v34 = vpop.permute.xlu0 %7225  ;;  %v6289_v47 = vsel %vm6270_vm13, %v6284_v38, %v7212_v39  ;;  %v6290_v56 = vsel %vm6270_vm13, %v6285_v54, %v7213_v57  ;;  %v6317_v39 = vsel %vm6270_vm13, %v6312_v6, %v7197_v15  ;;  %v6318_v57 = vsel %vm6270_vm13, %v6313_v42, %v7198_v21 }
 0x4b2   : > { %v7216_v8 = vpop.permute.xlu1 %7215  ;;  %v6281_v54 = vsel %vm6276_vm14, %v6275_v43, %v11539_v52  ;;  %v6303_v15 = vsel %vm6270_vm13, %v6298_v33, %v7173_v23  ;;  %v6302_v21 = vsel %vm6270_vm13, %v6297_v12, %v7172_v46  ;;  %v6322_v16 = vsel %vm6276_vm14, %v6317_v39, %v7202_v13  ;;  %v11678_v52 = vld [vmem:[%s11919_s3] sm:$0xff]  ;;  %v13231_v13 = vld [vmem:[#allocation10_spill] sm:$0xff] }
 0x4b3   : > { %v7218_v35 = vunpack.i.h.bf16 %v7216_v8  ;;  %v7217_v28 = vunpack.i.l.bf16 %v7216_v8  ;;  %v7054_v8 = vpack.c.bf16 %v6280_v20, %v6279_v27  ;;  %v6323_v3 = vsel %vm6276_vm14, %v6318_v57, %v7203_v51 }
 0x4b4   : > { %v6307_v60 = vsel %vm6276_vm14, %v6302_v21, %v7177_v18  ;;  %v6308_v32 = vsel %vm6276_vm14, %v6303_v15, %v7178_v22  ;;  %v6387_v25 = vsel %vm336_vm4, %v6281_v54, 1.0  ;;  %v7056_v23 = vpack.c.bf16 %v6323_v3, %v6322_v16  ;;  %v13233_v3 = vld [vmem:[#allocation189_spill] sm:$0xff] }
 0x4b5   : > { %v11652_v41 = vpop.permute.xlu0 %7230  ;;  %v6294_v14 = vsel %vm6276_vm14, %v6289_v47, %v7217_v28  ;;  %v6295_v44 = vsel %vm6276_vm14, %v6290_v56, %v7218_v35  ;;  %v7058_v33 = vpack.c.bf16 %v6308_v32, %v6307_v60  ;;  %v13228_v22 = vmov 0.0   ;;  %v13234_v60 = vld [vmem:[#allocation192_spill] sm:$0xff]  ;;  %v13235_v32 = vld [vmem:[#allocation67_spill] sm:$0xff] }
 0x4b6   : > { %v7052_v17 = vpack.c.bf16 %v6295_v44, %v6294_v14  ;;  %v6321_v6 = vsel %vm6270_vm13, %v6316_v63, %v11603_v45  ;;  %v7228_v57 = vunpack.i.h.bf16 %v11632_v34 }
 0x4b7   : > { %v7221_v24 = vpop.permute.xlu1 %7220  ;;  %v6326_v14 = vsel %vm6276_vm14, %v6321_v6, %v11608_v7 }
 0x4b8   : > { %7053 = vmatprep.subr.bf16.mxu0 %v7052_v17  ;;  %v7223_v42 = vunpack.i.h.bf16 %v7221_v24  ;;  %v7222_v2 = vunpack.i.l.bf16 %v7221_v24  ;;  %v7227_v17 = vunpack.i.l.bf16 %v11632_v34  ;;  %v13232_v24 = vcombine.low %v13230_v30, %v13231_v13 }
 0x4b9   : > { %7055 = vmatpush1.bf16.msra.mxu0 %v7054_v8  ;;  %v7236_v59 = vpop.permute.xlu0 %7235 }
 0x4ba   : > { %6923 = vmatprep.subr.msk.mxu0 %vm6400_vm15, %v6388_v36  ;;  %v7238_v44 = vunpack.i.h.bf16 %v7236_v59  ;;  %v7237_v18 = vunpack.i.l.bf16 %v7236_v59  ;;  %v6328_v54 = vsel %vm6264_vm12, %v13232_v24, %v7223_v42  ;;  %v6327_v45 = vsel %vm6264_vm12, %v11289_v48, %v7222_v2  ;;  %v13237_v2 = vld [vmem:[#allocation26_spill] sm:$0xff] }
 0x4bb   : > { %v11672_v4 = vpop.permute.xlu1 %5497 }
 0x4bc   : > { %v6300_v34 = vsel %vm6264_vm12, %v13233_v3, %v7238_v44  ;;  %v13238_v44 = vld [vmem:[#allocation195_spill] sm:$0xff] }
 0x4bd   : > { %6924 = vmatpush1.msk.msra.mxu0 %vm6400_vm15, %v6387_v25  ;;  %v13236_v25 = vcombine.low %v13234_v60, %v13235_v32 }
 0x4be   : > { %v7241_v46 = vpop.permute.xlu0 %7240  ;;  %7057 = vmatprep.subr.bf16.mxu0 %v7056_v23  ;;  %6925 = vmatmul.mubr.msk.f32.vlgmr.msra.gmra.mrb[10].mxu0 %vm6396_vm0, %v11678_v52 }
 0x4bf   : > { %v11682_v12 = vpop.permute.xlu1 %5273  ;;  %7059 = vmatpush1.bf16.msra.mxu0 %v7058_v33  ;;  %6560 = vmatprep.mubr.f32.mxu0 %v13228_v22  ;;  %v7243_v43 = vunpack.i.h.bf16 %v7241_v46  ;;  %v7242_v8 = vunpack.i.l.bf16 %v7241_v46  ;;  %v6299_v23 = vsel %vm6264_vm12, %v13236_v25, %v7237_v18 }
 0x4c1   : > { %v6304_v48 = vsel %vm6270_vm13, %v6299_v23, %v7242_v8 }
 0x4c2   : > { %v7246_v38 = vpop.permute.xlu0 %7245 }
 0x4c3   : > { %v11687_v35 = vpop.permute.xlu1 %5351  ;;  %v7248_v15 = vunpack.i.h.bf16 %v7246_v38  ;;  %v7247_v21 = vunpack.i.l.bf16 %v7246_v38 }
 0x4c6   : > { %v7251_v28 = vpop.permute.xlu0 %7250 }
 0x4c7   : > { %v11689_v27 = vpop.permute.xlu1 %7260  ;;  %v7253_v33 = vunpack.i.h.bf16 %v7251_v28  ;;  %v7252_v46 = vunpack.i.l.bf16 %v7251_v28  ;;  %v6309_v28 = vsel %vm6276_vm14, %v6304_v48, %v7247_v21 }
 0x4c9   : > { %v6342_v32 = vsel %vm6264_vm12, %v11153_v26, %v7252_v46  ;;  %v7262_v26 = vunpack.i.l.bf16 %v11689_v27  ;;  %v7233_v46 = vunpack.i.h.bf16 %v11652_v41 }
 0x4ca   : > { %v7256_v20 = vpop.permute.xlu0 %7255 }
 0x4cb   : > { %v11691_v47 = vpop.permute.xlu1 %5575  ;;  %v7258_v63 = vunpack.i.h.bf16 %v7256_v20  ;;  %v7257_v38 = vunpack.i.l.bf16 %v7256_v20  ;;  %v13241_v20 = vld [vmem:[#allocation243_spill] sm:$0xff] }
 0x4ce   : > { %v11693_v56 = vpop.permute.xlu0 %5653 }
 0x4cf   : > { %v7266_v55 = vpop.permute.xlu1 %7265 }
 0x4d0   : > { %v7268_v7 = vunpack.i.h.bf16 %v7266_v55  ;;  %v7267_v36 = vunpack.i.l.bf16 %v7266_v55  ;;  %v6305_v55 = vsel %vm6270_vm13, %v6300_v34, %v7243_v43  ;;  %v13242_v34 = vld [vmem:[#allocation118_spill] sm:$0xff] }
 0x4d1   : > { %v6310_v3 = vsel %vm6276_vm14, %v6305_v55, %v7248_v15  ;;  %v13243_v60 = vcombine.low %v13241_v20, %v13242_v34  ;;  %v6332_v15 = vsel %vm6270_vm13, %v6327_v45, %v7227_v17  ;;  %v6333_v55 = vsel %vm6270_vm13, %v6328_v54, %v7228_v57 }
 0x4d2   : > { %v11702_v39 = vpop.permute.xlu0 %5799  ;;  %v6315_v6 = vsel %vm6264_vm12, %v13237_v2, %v7268_v7  ;;  %v7232_v2 = vunpack.i.l.bf16 %v11652_v41  ;;  %v6390_v17 = vsel %vm336_vm4, %v6326_v14, 1.0  ;;  %v6338_v54 = vsel %vm6276_vm14, %v6333_v55, %v7233_v46  ;;  %v13249_v46 = vld [vmem:[#allocation85_spill] sm:$0xff] }
 0x4d3   : > { %v7271_v51 = vpop.permute.xlu1 %7270  ;;  %v6343_v7 = vsel %vm6264_vm12, %v13243_v60, %v7253_v33  ;;  %v7062_v33 = vpack.c.bf16 %v6310_v3, %v6309_v28  ;;  %v6389_v41 = vsel %vm336_vm4, %v11599_v61, 1.0  ;;  %v13245_v3 = vld [vmem:[#allocation193_spill] sm:$0xff] }
 0x4d4   : > { %v7273_v59 = vunpack.i.h.bf16 %v7271_v51  ;;  %v7272_v16 = vunpack.i.l.bf16 %v7271_v51  ;;  %v13239_v51 = vld [vmem:[#allocation75_spill] sm:$0xff]  ;;  %v6337_v57 = vsel %vm6276_vm14, %v6332_v15, %v7232_v2  ;;  %v13250_v2 = vld [vmem:[#allocation197_spill] sm:$0xff] }
 0x4d5   : > { %v13240_v30 = vcombine.low %v13238_v44, %v13239_v51  ;;  %v7066_v44 = vpack.c.bf16 %v6338_v54, %v6337_v57 }
 0x4d6   : > { %v11718_v11 = vpop.permute.xlu0 %7285  ;;  %v6320_v8 = vsel %vm6270_vm13, %v6315_v6, %v7273_v59  ;;  %v6347_v59 = vsel %vm6270_vm13, %v6342_v32, %v7257_v38 }
 0x4d7   : > { %v7276_v42 = vpop.permute.xlu1 %7275  ;;  %v6314_v13 = vsel %vm6264_vm12, %v13240_v30, %v7267_v36 }
 0x4d8   : > { %v7278_v18 = vunpack.i.h.bf16 %v7276_v42  ;;  %v7277_v24 = vunpack.i.l.bf16 %v7276_v42  ;;  %v6319_v43 = vsel %vm6270_vm13, %v6314_v13, %v7272_v16  ;;  %v6348_v16 = vsel %vm6270_vm13, %v6343_v7, %v7258_v63 }
 0x4d9   : > { %v7263_v42 = vunpack.i.h.bf16 %v11689_v27  ;;  %v6352_v63 = vsel %vm6276_vm14, %v6347_v59, %v7262_v26  ;;  %v13248_v26 = vld [vmem:[#allocation194_spill] sm:$0xff] }
 0x4da   : > { %v11738_v25 = vpop.permute.xlu0 %7290  ;;  %v6324_v36 = vsel %vm6276_vm14, %v6319_v43, %v7277_v24  ;;  %v6325_v21 = vsel %vm6276_vm14, %v6320_v8, %v7278_v18  ;;  %v13244_v18 = vld [vmem:[#allocation95_spill] sm:$0xff]  ;;  %v6331_v8 = vsel %vm6264_vm12, %v13245_v3, %v11617_v53  ;;  %v13246_v53 = vld [vmem:[#allocation106_spill] sm:$0xff] }
 0x4db   : > { %v7281_v23 = vpop.permute.xlu1 %7280  ;;  %v7060_v48 = vpack.c.bf16 %v6325_v21, %v6324_v36  ;;  %v6353_v38 = vsel %vm6276_vm14, %v6348_v16, %v7263_v42  ;;  %v6346_v61 = vsel %vm6264_vm12, %v13244_v18, %v11672_v4  ;;  %v6336_v20 = vsel %vm6270_vm13, %v6331_v8, %v11682_v12 }
 0x4dc   : > { %v7064_v27 = vpack.c.bf16 %v6353_v38, %v6352_v63  ;;  %v7283_v24 = vunpack.i.h.bf16 %v7281_v23  ;;  %v7282_v28 = vunpack.i.l.bf16 %v7281_v23  ;;  %v6351_v43 = vsel %vm6270_vm13, %v6346_v61, %v11691_v47 }
 0x4dd   : > { %7061 = vmatprep.subr.bf16.mxu0 %v7060_v48  ;;  %v6356_v34 = vsel %vm6276_vm14, %v6351_v43, %v11693_v56  ;;  %v7288_v4 = vunpack.i.h.bf16 %v11718_v11  ;;  %v7287_v36 = vunpack.i.l.bf16 %v11718_v11  ;;  %v13247_v16 = vcombine.low %v11086_v62, %v13246_v53 }
 0x4de   : > { %7063 = vmatpush1.bf16.msra.mxu0 %v7062_v33  ;;  %v7296_v45 = vpop.permute.xlu0 %7295  ;;  %v6357_v12 = vsel %vm6264_vm12, %v11477_v29, %v7282_v28 }
 0x4df   : > { %v11755_v6 = vpop.permute.xlu1 %6101  ;;  %6926 = vmatprep.subr.msk.mxu0 %vm6400_vm15, %v6390_v17  ;;  %v7298_v60 = vunpack.i.h.bf16 %v7296_v45  ;;  %v7297_v7 = vunpack.i.l.bf16 %v7296_v45  ;;  %v6358_v47 = vsel %vm6264_vm12, %v13247_v16, %v7283_v24  ;;  %v13251_v17 = vcombine.low %v13249_v46, %v13250_v2 }
 0x4e0   : > { %v6362_v53 = vsel %vm6270_vm13, %v6357_v12, %v7287_v36  ;;  %v7293_v36 = vunpack.i.h.bf16 %v11738_v25  ;;  %v7292_v12 = vunpack.i.l.bf16 %v11738_v25 }
 0x4e1   : > { %v6330_v11 = vsel %vm6264_vm12, %v13248_v26, %v7298_v60  ;;  %v6329_v45 = vsel %vm6264_vm12, %v13251_v17, %v7297_v7  ;;  %v13255_v60 = vld [vmem:[#allocation27_spill] sm:$0xff]  ;;  %v6392_v26 = vsel %vm336_vm4, %v6356_v34, 1.0 }
 0x4e2   : > { %6927 = vmatpush1.msk.msra.mxu0 %vm6400_vm15, %v6389_v41  ;;  %v7301_v14 = vpop.permute.xlu0 %7300  ;;  %v13256_v7 = vcombine.low %v11255_v37, %v13255_v60  ;;  %v6363_v37 = vsel %vm6270_vm13, %v6358_v47, %v7288_v4  ;;  %v13257_v60 = vld [vmem:[#allocation103_spill] sm:$0xff] }
 0x4e3   : > { %v11761_v51 = vpop.permute.xlu1 %7320  ;;  %7065 = vmatprep.subr.bf16.mxu0 %v7064_v27  ;;  %6928 = vmatmul.mubr.msk.f32.vlgmr.msra.gmra.mrb[12].mxu0 %vm6396_vm0, %v11678_v52  ;;  %v7303_v21 = vunpack.i.h.bf16 %v7301_v14  ;;  %v7302_v15 = vunpack.i.l.bf16 %v7301_v14  ;;  %v13252_v14 = vld [vmem:[#allocation99_spill] sm:$0xff]  ;;  %v6368_v17 = vsel %vm6276_vm14, %v6363_v37, %v7293_v36 }
 0x4e4   : > { %7067 = vmatpush1.bf16.msra.mxu0 %v7066_v44  ;;  %6631 = vmatprep.mubr.f32.mxu0 %v13228_v22 }
 0x4e5   : > { %v6334_v57 = vsel %vm6270_vm13, %v6329_v45, %v7302_v15  ;;  %v6335_v29 = vsel %vm6270_vm13, %v6330_v11, %v7303_v21 }
 0x4e6   : > { %v7306_v30 = vpop.permute.xlu0 %7305 }
 0x4e7   : > { %v7326_v13 = vpop.permute.xlu1 %7325  ;;  %v7308_v48 = vunpack.i.h.bf16 %v7306_v30  ;;  %v7307_v55 = vunpack.i.l.bf16 %v7306_v30  ;;  %v13253_v30 = vld [vmem:[#allocation198_spill] sm:$0xff] }
 0x4e8   : > { %v7328_v23 = vunpack.i.h.bf16 %v7326_v13  ;;  %v7327_v56 = vunpack.i.l.bf16 %v7326_v13  ;;  %v13254_v13 = vcombine.low %v13252_v14, %v13253_v30 }
 0x4e9   : > { %v6339_v28 = vsel %vm6276_vm14, %v6334_v57, %v7307_v55  ;;  %v6340_v3 = vsel %vm6276_vm14, %v6335_v29, %v7308_v48  ;;  %v7323_v55 = vunpack.i.h.bf16 %v11761_v51 }
 0x4ea   : > { %v7311_v32 = vpop.permute.xlu0 %7310  ;;  %v6345_v44 = vsel %vm6264_vm12, %v11197_v5, %v7328_v23  ;;  %v6344_v18 = vsel %vm6264_vm12, %v13254_v13, %v7327_v56 }
 0x4eb   : > { %v7331_v59 = vpop.permute.xlu1 %7330  ;;  %v7313_v62 = vunpack.i.h.bf16 %v7311_v32  ;;  %v7312_v63 = vunpack.i.l.bf16 %v7311_v32 }
 0x4ec   : > { %v7333_v33 = vunpack.i.h.bf16 %v7331_v59  ;;  %v7332_v42 = vunpack.i.l.bf16 %v7331_v59 }
 0x4ed   : > { %v6373_v5 = vsel %vm6264_vm12, %v13256_v7, %v7313_v62  ;;  %v6372_v32 = vsel %vm6264_vm12, %v11503_v50, %v7312_v63  ;;  %v7070_v50 = vpack.c.bf16 %v6340_v3, %v6339_v28  ;;  %v6376_v7 = vsel %vm6264_vm12, %v11406_v9, %v11755_v6 }
 0x4ee   : > { %v7316_v38 = vpop.permute.xlu0 %7315  ;;  %v6350_v8 = vsel %vm6270_vm13, %v6345_v44, %v7333_v33  ;;  %v6349_v43 = vsel %vm6270_vm13, %v6344_v18, %v7332_v42  ;;  %v7322_v33 = vunpack.i.l.bf16 %v11761_v51  ;;  %v6341_v42 = vsel %vm6276_vm14, %v6336_v20, %v11687_v35 }
 0x4ef   : > { %v7336_v54 = vpop.permute.xlu1 %7335  ;;  %v7318_v41 = vunpack.i.h.bf16 %v7316_v38  ;;  %v7317_v27 = vunpack.i.l.bf16 %v7316_v38  ;;  %v6367_v51 = vsel %vm6276_vm14, %v6362_v53, %v7292_v12  ;;  %v6391_v62 = vsel %vm336_vm4, %v6341_v42, 1.0 }
 0x4f0   : > { %v7338_v61 = vunpack.i.h.bf16 %v7336_v54  ;;  %v7337_v24 = vunpack.i.l.bf16 %v7336_v54  ;;  %v7074_v29 = vpack.c.bf16 %v6368_v17, %v6367_v51 }
 0x4f1   : > { %v6377_v16 = vsel %vm6270_vm13, %v6372_v32, %v7317_v27  ;;  %v6378_v23 = vsel %vm6270_vm13, %v6373_v5, %v7318_v41 }
 0x4f2   : > { %v7341_v21 = vpop.permute.xlu0 %7340  ;;  %v6354_v15 = vsel %vm6276_vm14, %v6349_v43, %v7337_v24  ;;  %v6355_v59 = vsel %vm6276_vm14, %v6350_v8, %v7338_v61  ;;  %v6382_v4 = vsel %vm6276_vm14, %v6377_v16, %v7322_v33  ;;  %v6383_v47 = vsel %vm6276_vm14, %v6378_v23, %v7323_v55 }
 0x4f3   : > { %v7356_v56 = vpop.permute.xlu1 %7355  ;;  %v7068_v48 = vpack.c.bf16 %v6355_v59, %v6354_v15  ;;  %v7343_v11 = vunpack.i.h.bf16 %v7341_v21  ;;  %v7342_v46 = vunpack.i.l.bf16 %v7341_v21  ;;  %v7072_v57 = vpack.c.bf16 %v6383_v47, %v6382_v4 }
 0x4f4   : > { %v7358_v35 = vunpack.i.h.bf16 %v7356_v56  ;;  %v7357_v20 = vunpack.i.l.bf16 %v7356_v56 }
 0x4f5   : > { %7069 = vmatprep.subr.bf16.mxu0 %v7068_v48  ;;  %v6360_v54 = vsel %vm6264_vm12, %v11320_v10, %v7343_v11  ;;  %v6359_v41 = vsel %vm6264_vm12, %v5697_v31, %v7342_v46 }
 0x4f6   : > { %7071 = vmatpush1.bf16.msra.mxu0 %v7070_v50  ;;  %v7346_v2 = vpop.permute.xlu0 %7345  ;;  %v6375_v44 = vsel %vm6264_vm12, %v11500_v49, %v7358_v35  ;;  %v6374_v14 = vsel %vm6264_vm12, %v5999_v0, %v7357_v20 }
 0x4f7   : > { %v7361_v34 = vpop.permute.xlu1 %7360  ;;  %6929 = vmatprep.subr.msk.mxu0 %vm6400_vm15, %v6392_v26  ;;  %v7348_v45 = vunpack.i.h.bf16 %v7346_v2  ;;  %v7347_v25 = vunpack.i.l.bf16 %v7346_v2 }
 0x4f8   : > { %v7363_v63 = vunpack.i.h.bf16 %v7361_v34  ;;  %v7362_v38 = vunpack.i.l.bf16 %v7361_v34 }
 0x4f9   : > { %v6364_v10 = vsel %vm6270_vm13, %v6359_v41, %v7347_v25  ;;  %v6365_v58 = vsel %vm6270_vm13, %v6360_v54, %v7348_v45 }
 0x4fa   : > { %6930 = vmatpush1.msk.msra.mxu0 %vm6400_vm15, %v6391_v62  ;;  %v7351_v27 = vpop.permute.xlu0 %7350  ;;  %v6380_v40 = vsel %vm6270_vm13, %v6375_v44, %v7363_v63  ;;  %v6379_v1 = vsel %vm6270_vm13, %v6374_v14, %v7362_v38 }
 0x4fb   : > { %v7366_v30 = vpop.permute.xlu1 %7365  ;;  %v7353_v13 = vunpack.i.h.bf16 %v7351_v27  ;;  %v7352_v18 = vunpack.i.l.bf16 %v7351_v27  ;;  %7073 = vmatprep.subr.bf16.mxu0 %v7072_v57  ;;  %6931 = vmatmul.mubr.msk.f32.vlgmr.msra.gmra.mrb[14].mxu0 %vm6396_vm0, %v11678_v52 }
 0x4fc   : > { %v7368_v19 = vunpack.i.h.bf16 %v7366_v30  ;;  %v7367_v31 = vunpack.i.l.bf16 %v7366_v30  ;;  %7075 = vmatpush1.bf16.msra.mxu0 %v7074_v29  ;;  %6702 = vmatprep.mubr.f32.mxu0 %v13228_v22  ;;  %v6361_v22 = vsel %vm6264_vm12, %v13257_v60, %v11702_v39 }
 0x4fd   : > { %v6369_v0 = vsel %vm6276_vm14, %v6364_v10, %v7352_v18  ;;  %v6370_v49 = vsel %vm6276_vm14, %v6365_v58, %v7353_v13 }
 0x4fe   : > { %v7078_v61 = vpack.c.bf16 %v6370_v49, %v6369_v0  ;;  %v5878_v24 = vpop.permute.xlu0 %5877  ;;  %v6384_v28 = vsel %vm6276_vm14, %v6379_v1, %v7367_v31  ;;  %v6385_v3 = vsel %vm6276_vm14, %v6380_v40, %v7368_v19 }
 0x4ff   : > { %v6180_v8 = vpop.permute.xlu1 %6179  ;;  %v7076_v43 = vpack.c.bf16 %v6385_v3, %v6384_v28  ;;  %v6366_v5 = vsel %vm6270_vm13, %v6361_v22, %v5878_v24 }
 0x500   : > { %v6381_v21 = vsel %vm6270_vm13, %v6376_v7, %v6180_v8 }
 0x501   : > { %7077 = vmatprep.subr.bf16.mxu0 %v7076_v43 }
 0x502   : > { %7079 = vmatpush1.bf16.msra.mxu0 %v7078_v61  ;;  %v5956_v32 = vpop.permute.xlu0 %5955 }
 0x503   : > { %v6258_v15 = vpop.permute.xlu1 %6257  ;;  %v6371_v59 = vsel %vm6276_vm14, %v6366_v5, %v5956_v32 }
 0x504   : > { %v6386_v53 = vsel %vm6276_vm14, %v6381_v21, %v6258_v15  ;;  %v6393_v16 = vsel %vm336_vm4, %v6371_v59, 1.0 }
 0x505   : > { %v6394_v39 = vsel %vm336_vm4, %v6386_v53, 1.0 }
 0x506   : > { %6932 = vmatprep.subr.msk.mxu0 %vm6400_vm15, %v6394_v39 }
 0x507   : > { %6933 = vmatpush1.msk.msra.mxu0 %vm6400_vm15, %v6393_v16 }
 0x508   : > { %6934 = vmatmul.mubr.msk.f32.vlgmr.msra.gmra.mrb[16].mxu0 %vm6396_vm0, %v11678_v52 }
 0x591   : > { %v6491_v9 = vpop.f32.mrb[10].mxu0 }
 0x592   : > { %6709 = vst [vmem:[%s190_s12] sm:$0xff] %v6491_v9  ;;  %v6493_v6 = vpop.f32.mrb[11].mxu0 }
 0x593   : > { %6710 = vst [vmem:[%s190_s12 + $0x8] sm:$0xff] %v6493_v6 }
 0x5b6   : > { %v6562_v23 = vpop.f32.mrb[12].mxu0 }
 0x5b7   : > { %6711 = vst [vmem:[%s190_s12 + $0x10] sm:$0xff] %v6562_v23  ;;  %v6564_v56 = vpop.f32.mrb[13].mxu0 }
 0x5b8   : > { %6712 = vst [vmem:[%s190_s12 + $0x18] sm:$0xff] %v6564_v56 }
 0x5ce   : > { %v6633_v48 = vpop.f32.mrb[14].mxu0 }
 0x5cf   : > { %6713 = vst [vmem:[%s190_s12 + $0x20] sm:$0xff] %v6633_v48  ;;  %v6635_v37 = vpop.f32.mrb[15].mxu0 }
 0x5d0   : > { %6714 = vst [vmem:[%s190_s12 + $0x28] sm:$0xff] %v6635_v37 }
 0x5db   : > { %v6704_v52 = vpop.f32.mrb[16].mxu0 }
 0x5dc   : > { %6715 = vst [vmem:[%s190_s12 + $0x30] sm:$0xff] %v6704_v52  ;;  %v6706_v55 = vpop.f32.mrb[17].mxu0 }
 0x5dd   : > { %6716 = vst [vmem:[%s190_s12 + $0x38] sm:$0xff] %v6706_v55 }
 0x5de   : > { %7382 = shalt.err (!%p7379_p3)
}
 0x5df   : > { %s7383_s5 = scalar_lea.hbm %s11874_s23, 1024  ;;  %s7387_s8 = scalar_lea.hbm %s11920_s4, 2048 }
 0x5e0   : > { %p7384_p4 = scmp.ne.s32.totalorder %s11874_s23, %s7383_s5  ;;  %p7388_p9 = scmp.lt.u32.totalorder %s11874_s23, %s11920_s4 }
 0x5e1   : > { %p7389_p10 = scmp.lt.u32.totalorder %s7387_s8, %s7383_s5  ;;  %p7391_p12 = scmp.lt.u32.totalorder %s7383_s5, %s11874_s23 }
 0x5e2   : > { %p7385_p7 = pnand %p7384_p4, %p7507_p5 }
 0x5e3   : > { %p7390_p11 = por %p7389_p10, %p7388_p9 }
 0x5e4   : > { %p7386_p8 = pneg %p7385_p7 }
 0x5e5   : > { %p7392_p13 = por %p7391_p12, %p7390_p11 }
 0x5e7   : > { %p7393_p0 = pnand %p7392_p13, %p7386_p8 }
 0x5e9   : > { %7396 = shalt.err (!%p7393_p0)
}
 0x5ea   : > { %7080 = dma.vmem_to_hbm [thread:$0]  (%p7507_p5), %s11876_s14, 1024, %s11874_s23, %s6718_s27  }
 0x5eb PF: > { %p7086_p1 = scmp.ge.s32.totalorder %s7431_s18, 2  ;;  %s6744_s11 = sand.u32 1, %s7419_s15  }
 0x5ec   : > { %s6745_s12 = scalar_lea.sflag [#allocation3], %s6744_s11 }
 0x5ed   : > { %p7083_p2 = pnand %p7086_p1, %p7511_p6 }
 0x5ef   : > { %7414 = dma.done.wait (!%p7083_p2), %s6745_s12, 1024  }
 0x5f0   : > { %7416 = vsyncadd (!%p7083_p2), %s6745_s12, 4294966272  ;;  %p14_p3 = scmp.ge.s32.totalorder %s7494_s21, 4   ;;  %s13258_s15 = smov %s7423_s16 }
 0x5f1   : > { %s13259_s16 = smov %s7427_s17  ;;  %s13260_s17 = smov %s7505_s24 }
 0x5f2   : > { %s13261_s18 = smov %s7494_s21  ;;  %16 = sbr.rel (!%p14_p3) target bundleno = 3 (0x3), region = 71 }
 0x5f9   :  { %6750 = vsyncpa [#allocation3], 1 }
 0x5fa   :  { %6752 = vsyncpa [#allocation3 + $0x1], 1 }

</bundles_post_ra>
